<compile_context>
chip_gen: v7x
topology: tpu7x:2x2x1
jax: 0.10.0
libtpu: 0.0.40
codegen_flags: <defaults>
</compile_context>

<pallas_src>
import functools

import jax
import jax.numpy as jnp
from jax import lax
from jax.experimental import pallas as pl
from jax.experimental.pallas import tpu as pltpu


def _round_up(v, m):
    return ((v + m - 1) // m) * m


def _tbconv_kernel(x_ref, w_ref, b_ref, o_ref, pmat_ref, *,
                   TB, KH, KW, H_o, W_o, S_pad, stride, cin_b, cout_b):
    """One grid step: TB tied-block group-batches -> one fused MXU matmul.

    x_ref    : (TB, Hp, Wp, cin_b)   pre-padded grouped input, channels-last
    w_ref    : (cout_b, K)           im2col-folded tied weight (K = KH*KW*cin_b)
    b_ref    : (cout_b, 1)           bias (f32)
    o_ref    : (TB, cout_b, S_pad)   lane-dense output (spatial on lanes)
    pmat_ref : (TB*S_pad, K)         persistent im2col scratch
    """
    S = H_o * W_o

    # Zero only once (scratch persists across grid steps; the valid rows are
    # fully overwritten every step, only the pad rows need to stay defined).
    if S_pad != S:
        @pl.when(pl.program_id(0) == 0)
        def _init():
            pmat_ref[...] = jnp.zeros_like(pmat_ref)

    # ---- im2col: one (S, cin_b) store per (image, tap); aligned offsets --------
    for tb in range(TB):
        r0 = tb * S_pad
        for kh in range(KH):
            for kw in range(KW):
                if stride == 1:
                    patch = x_ref[tb, kh:kh + H_o, kw:kw + W_o, :]
                else:
                    # TODO(synk): stride>1 (strided loads on non-minor dims) is
                    # untested on hardware; the module default is stride=1.
                    patch = x_ref[tb, pl.ds(kh, H_o, stride),
                                  pl.ds(kw, W_o, stride), :]
                t = kh * KW + kw
                pmat_ref[r0:r0 + S, t * cin_b:(t + 1) * cin_b] = (
                    patch.reshape(S, cin_b))

    # ---- one long-N MXU matmul over all TB images; f32 accumulation ------------
    acc = lax.dot_general(w_ref[...], pmat_ref[...],
                          dimension_numbers=(((1,), (1,)), ((), ())),
                          preferred_element_type=jnp.float32)  # (cout_b, TB*S_pad)
    acc = acc + b_ref[...]                                      # bias added once

    for tb in range(TB):
        o_ref[tb] = lax.slice(acc, (0, tb * S_pad),
                              (cout_b, (tb + 1) * S_pad)).astype(o_ref.dtype)


def tied_block_conv2d(x, weight, bias, *, B, kernel_size, stride=1, padding=0,
                      use_bf16=False):
    """x: (N, C, H, W).  weight: (planes//B, C//B, KH, KW).  bias: (planes//B,) or None."""
    n, c, h, w = x.shape
    assert c % B == 0
    cin_b = c // B
    cout_b = weight.shape[0]
    out_planes = cout_b * B
    KH = KW = kernel_size
    h_o = (h - kernel_size + 2 * padding) // stride + 1
    w_o = (w - kernel_size + 2 * padding) // stride + 1
    S = h_o * w_o
    S_pad = _round_up(S, 128)            # lane-aligned per-image blocks
    K = KH * KW * cin_b
    NB = n * B
    Hp, Wp = h + 2 * padding, w + 2 * padding

    out_dtype = x.dtype
    comp_dtype = jnp.bfloat16 if use_bf16 else x.dtype
    isz_c = jnp.dtype(comp_dtype).itemsize
    isz_o = jnp.dtype(out_dtype).itemsize

    if bias is None:
        bias = jnp.zeros((cout_b,), dtype=jnp.float32)

    # ---- wrapper glue (one fused XLA pass): grouped NCHW->NHWC + halo pad ------
    xg = x.reshape(NB, cin_b, h, w).transpose(0, 2, 3, 1)        # (NB, H, W, cin_b)
    if padding:
        xg = jnp.pad(xg, ((0, 0), (padding, padding), (padding, padding), (0, 0)))
    xg = xg.astype(comp_dtype)

    # im2col-folded tied weight, row-major over (kh, kw, c): (cout_b, K)
    w2 = weight.transpose(0, 2, 3, 1).reshape(cout_b, K).astype(comp_dtype)
    b2 = bias.reshape(cout_b, 1).astype(jnp.float32)

    # ---- honest VMEM accounting: include (8,128) layout padding ----------------
    LANE, SUB = 128, 8

    def vmem_bytes(tb):
        in_blk = 2 * tb * Hp * _round_up(Wp, SUB) * _round_up(cin_b, LANE) * isz_c
        out_blk = 2 * tb * _round_up(cout_b, SUB) * S_pad * isz_o
        pmat = tb * S_pad * _round_up(K, LANE) * isz_c
        accb = _round_up(cout_b, SUB) * tb * S_pad * 4
        wblk = 2 * _round_up(cout_b, SUB) * _round_up(K, LANE) * isz_c
        bblk = 2 * _round_up(cout_b, SUB) * LANE * 4
        tmp = 2 * _round_up(S, SUB) * _round_up(cin_b, LANE) * isz_c  # tap temps
        return in_blk + out_blk + pmat + accb + wblk + bblk + tmp

    # ---- generation-aware budget / grid shaping --------------------------------
    try:
        cap = int(pltpu.get_tpu_info().vmem_capacity_bytes)
    except Exception:
        cap = 64 * 1024 * 1024
    if cap <= 0:
        cap = 64 * 1024 * 1024
    small_vmem = cap < (100 << 20)        # v7x-class: 64 MiB VMEM, 2 TCs/chip
    if small_vmem:
        budget = int(0.40 * cap)
    else:                                 # v5e / v6e: 128 MiB VMEM, single TC
        budget = min(80 << 20, int(0.55 * cap))

    MAX_TB = 16   # static-unroll bound
    # TODO(synk): switch the tb loops to lax.fori_loop when TB must exceed this.
    TB = 1
    for tb in range(1, min(NB, MAX_TB) + 1):
        if NB % tb:
            continue
        if vmem_bytes(tb) > budget:
            continue
        g = NB // tb
        if small_vmem and NB > 1 and (g < 2 or g % 2):
            continue      # keep an even grid so the two TensorCores split evenly
        TB = tb
    grid = (NB // TB,)

    est = vmem_bytes(TB)
    vmem_limit = int(min(0.75 * cap, max(32 << 20, 1.3 * est)))

    kernel = functools.partial(
        _tbconv_kernel, TB=TB, KH=KH, KW=KW, H_o=h_o, W_o=w_o, S_pad=S_pad,
        stride=stride, cin_b=cin_b, cout_b=cout_b)

    out = pl.pallas_call(
        kernel,
        out_shape=jax.ShapeDtypeStruct((NB, cout_b, S_pad), out_dtype),
        grid=grid,
        in_specs=[
            pl.BlockSpec((TB, Hp, Wp, cin_b), lambda i: (i, 0, 0, 0)),
            pl.BlockSpec((cout_b, K), lambda i: (0, 0)),   # tied weight: constant
            pl.BlockSpec((cout_b, 1), lambda i: (0, 0)),
        ],
        out_specs=pl.BlockSpec((TB, cout_b, S_pad), lambda i: (i, 0, 0)),
        scratch_shapes=[pltpu.VMEM((TB * S_pad, K), comp_dtype)],
        compiler_params=pltpu.CompilerParams(
            dimension_semantics=("parallel",),
            vmem_limit_bytes=vmem_limit),
    )(xg, w2, b2)

    # TODO(synk): dropout_tbc > 0 (training-time nn.Dropout) and groups > 1 are not
    # implemented; the module defaults (0.0 / 1) make both identity here.

    # Trim lane padding, then free reshape back to NCHW.
    if S_pad != S:
        out = out[:, :, :S]
    return out.reshape(n, out_planes, h_o, w_o)


def _reference(x, weight, bias, *, B, stride, padding):
    """Pure-JAX reference (lax conv) for correctness checking."""
    n, c, h, w = x.shape
    cin_b = c // B
    cout_b = weight.shape[0]
    xg = x.reshape(n * B, cin_b, h, w)
    y = lax.conv_general_dilated(
        xg, weight, window_strides=(stride, stride),
        padding=((padding, padding), (padding, padding)),
        dimension_numbers=("NCHW", "OIHW", "NCHW"))
    y = y + bias.reshape(1, cout_b, 1, 1)
    return y.reshape(n, cout_b * B, y.shape[2], y.shape[3])


if __name__ == "__main__":
    # in_planes=8, planes=8, B=2, kernel_size=3 (module-consistent small shapes)
    N, C, H, W = 2, 8, 16, 16
    B = 2
    planes = 8
    kernel_size = 3
    cin_b, cout_b = C // B, planes // B

    key = jax.random.PRNGKey(0)
    kx, kw_, kb = jax.random.split(key, 3)
    x = jax.random.normal(kx, (N, C, H, W), dtype=jnp.float32)
    weight = jax.random.normal(kw_, (cout_b, cin_b, kernel_size, kernel_size),
                               dtype=jnp.float32) * 0.1
    bias = jax.random.normal(kb, (cout_b,), dtype=jnp.float32) * 0.1

    # stride=1/padding=1 (aligned S) and stride=1/padding=0 (module default,
    # exercises the S % 128 != 0 padded-output path).
    for stride, padding in ((1, 1), (1, 0)):
        out = tied_block_conv2d(x, weight, bias, B=B, kernel_size=kernel_size,
                                stride=stride, padding=padding)
        out = jax.block_until_ready(out)
        ref = _reference(x, weight, bias, B=B, stride=stride, padding=padding)
        assert out.shape == ref.shape, (out.shape, ref.shape)
        err = float(jnp.max(jnp.abs(out - ref)))
        assert jnp.allclose(out, ref, atol=1e-4, rtol=1e-4), (stride, padding, err)

    print("KERNEL_OK")
</pallas_src>

<mosaic_0001>
module attributes {stable_mosaic.version = 11 : i64} {
  func.func @_tbconv_kernel(%arg0: i32, %arg1: memref<2x18x18x4xf32, #tpu.memory_space<vmem>>, %arg2: memref<4x36xf32, #tpu.memory_space<vmem>>, %arg3: memref<4x1xf32, #tpu.memory_space<vmem>>, %arg4: memref<2x4x256xf32, #tpu.memory_space<vmem>>, %arg5: memref<512x36xf32, #tpu.memory_space<vmem>>) attributes {dimension_semantics = [#tpu.dimension_semantics<parallel>], iteration_bounds = array<i64: 2>, scalar_prefetch = 0 : i64, scratch_operands = 1 : i64, tpu.core_type = #tpu.core_type<tc>, window_params = [{transform_indices = @transform_0, window_bounds = array<i64: 2, 18, 18, 4>}, {pipeline_mode = #tpu.pipeline_mode<synchronous>, transform_indices = @transform_1, window_bounds = array<i64: 4, 36>}, {pipeline_mode = #tpu.pipeline_mode<synchronous>, transform_indices = @transform_2, window_bounds = array<i64: 4, 1>}, {transform_indices = @transform_3, window_bounds = array<i64: 2, 4, 256>}]} {
    %c0 = arith.constant 0 : index
    %c0_0 = arith.constant 0 : index
    %c0_1 = arith.constant 0 : index
    %c0_2 = arith.constant 0 : index
    %0 = vector.load %arg1[%c0, %c0_0, %c0_1, %c0_2] : memref<2x18x18x4xf32, #tpu.memory_space<vmem>>, vector<1x16x16x4xf32>
    %1 = vector.shape_cast %0 : vector<1x16x16x4xf32> to vector<16x16x4xf32>
    %2 = vector.shape_cast %1 : vector<16x16x4xf32> to vector<256x4xf32>
    %c0_3 = arith.constant 0 : index
    %c0_4 = arith.constant 0 : index
    %3 = vector.load %arg5[%c0_3, %c0_4] : memref<512x36xf32, #tpu.memory_space<vmem>>, vector<256x4xf32>
    tpu.vector_store %arg5[%c0_3, %c0_4], %2 {strides = array<i32>} : memref<512x36xf32, #tpu.memory_space<vmem>>, vector<256x4xf32>,
    %c0_5 = arith.constant 0 : index
    %c0_6 = arith.constant 0 : index
    %c1 = arith.constant 1 : index
    %c0_7 = arith.constant 0 : index
    %4 = vector.load %arg1[%c0_5, %c0_6, %c1, %c0_7] : memref<2x18x18x4xf32, #tpu.memory_space<vmem>>, vector<1x16x16x4xf32>
    %5 = vector.shape_cast %4 : vector<1x16x16x4xf32> to vector<16x16x4xf32>
    %6 = vector.shape_cast %5 : vector<16x16x4xf32> to vector<256x4xf32>
    %c0_8 = arith.constant 0 : index
    %c4 = arith.constant 4 : index
    %7 = vector.load %arg5[%c0_8, %c4] : memref<512x36xf32, #tpu.memory_space<vmem>>, vector<256x4xf32>
    tpu.vector_store %arg5[%c0_8, %c4], %6 {strides = array<i32>} : memref<512x36xf32, #tpu.memory_space<vmem>>, vector<256x4xf32>,
    %c0_9 = arith.constant 0 : index
    %c0_10 = arith.constant 0 : index
    %c2 = arith.constant 2 : index
    %c0_11 = arith.constant 0 : index
    %8 = vector.load %arg1[%c0_9, %c0_10, %c2, %c0_11] : memref<2x18x18x4xf32, #tpu.memory_space<vmem>>, vector<1x16x16x4xf32>
    %9 = vector.shape_cast %8 : vector<1x16x16x4xf32> to vector<16x16x4xf32>
    %10 = vector.shape_cast %9 : vector<16x16x4xf32> to vector<256x4xf32>
    %c0_12 = arith.constant 0 : index
    %c8 = arith.constant 8 : index
    %11 = vector.load %arg5[%c0_12, %c8] : memref<512x36xf32, #tpu.memory_space<vmem>>, vector<256x4xf32>
    tpu.vector_store %arg5[%c0_12, %c8], %10 {strides = array<i32>} : memref<512x36xf32, #tpu.memory_space<vmem>>, vector<256x4xf32>,
    %c0_13 = arith.constant 0 : index
    %c1_14 = arith.constant 1 : index
    %c0_15 = arith.constant 0 : index
    %c0_16 = arith.constant 0 : index
    %12 = vector.load %arg1[%c0_13, %c1_14, %c0_15, %c0_16] : memref<2x18x18x4xf32, #tpu.memory_space<vmem>>, vector<1x16x16x4xf32>
    %13 = vector.shape_cast %12 : vector<1x16x16x4xf32> to vector<16x16x4xf32>
    %14 = vector.shape_cast %13 : vector<16x16x4xf32> to vector<256x4xf32>
    %c0_17 = arith.constant 0 : index
    %c12 = arith.constant 12 : index
    %15 = vector.load %arg5[%c0_17, %c12] : memref<512x36xf32, #tpu.memory_space<vmem>>, vector<256x4xf32>
    tpu.vector_store %arg5[%c0_17, %c12], %14 {strides = array<i32>} : memref<512x36xf32, #tpu.memory_space<vmem>>, vector<256x4xf32>,
    %c0_18 = arith.constant 0 : index
    %c1_19 = arith.constant 1 : index
    %c1_20 = arith.constant 1 : index
    %c0_21 = arith.constant 0 : index
    %16 = vector.load %arg1[%c0_18, %c1_19, %c1_20, %c0_21] : memref<2x18x18x4xf32, #tpu.memory_space<vmem>>, vector<1x16x16x4xf32>
    %17 = vector.shape_cast %16 : vector<1x16x16x4xf32> to vector<16x16x4xf32>
    %18 = vector.shape_cast %17 : vector<16x16x4xf32> to vector<256x4xf32>
    %c0_22 = arith.constant 0 : index
    %c16 = arith.constant 16 : index
    %19 = vector.load %arg5[%c0_22, %c16] : memref<512x36xf32, #tpu.memory_space<vmem>>, vector<256x4xf32>
    tpu.vector_store %arg5[%c0_22, %c16], %18 {strides = array<i32>} : memref<512x36xf32, #tpu.memory_space<vmem>>, vector<256x4xf32>,
    %c0_23 = arith.constant 0 : index
    %c1_24 = arith.constant 1 : index
    %c2_25 = arith.constant 2 : index
    %c0_26 = arith.constant 0 : index
    %20 = vector.load %arg1[%c0_23, %c1_24, %c2_25, %c0_26] : memref<2x18x18x4xf32, #tpu.memory_space<vmem>>, vector<1x16x16x4xf32>
    %21 = vector.shape_cast %20 : vector<1x16x16x4xf32> to vector<16x16x4xf32>
    %22 = vector.shape_cast %21 : vector<16x16x4xf32> to vector<256x4xf32>
    %c0_27 = arith.constant 0 : index
    %c20 = arith.constant 20 : index
    %23 = vector.load %arg5[%c0_27, %c20] : memref<512x36xf32, #tpu.memory_space<vmem>>, vector<256x4xf32>
    tpu.vector_store %arg5[%c0_27, %c20], %22 {strides = array<i32>} : memref<512x36xf32, #tpu.memory_space<vmem>>, vector<256x4xf32>,
    %c0_28 = arith.constant 0 : index
    %c2_29 = arith.constant 2 : index
    %c0_30 = arith.constant 0 : index
    %c0_31 = arith.constant 0 : index
    %24 = vector.load %arg1[%c0_28, %c2_29, %c0_30, %c0_31] : memref<2x18x18x4xf32, #tpu.memory_space<vmem>>, vector<1x16x16x4xf32>
    %25 = vector.shape_cast %24 : vector<1x16x16x4xf32> to vector<16x16x4xf32>
    %26 = vector.shape_cast %25 : vector<16x16x4xf32> to vector<256x4xf32>
    %c0_32 = arith.constant 0 : index
    %c24 = arith.constant 24 : index
    %27 = vector.load %arg5[%c0_32, %c24] : memref<512x36xf32, #tpu.memory_space<vmem>>, vector<256x4xf32>
    tpu.vector_store %arg5[%c0_32, %c24], %26 {strides = array<i32>} : memref<512x36xf32, #tpu.memory_space<vmem>>, vector<256x4xf32>,
    %c0_33 = arith.constant 0 : index
    %c2_34 = arith.constant 2 : index
    %c1_35 = arith.constant 1 : index
    %c0_36 = arith.constant 0 : index
    %28 = vector.load %arg1[%c0_33, %c2_34, %c1_35, %c0_36] : memref<2x18x18x4xf32, #tpu.memory_space<vmem>>, vector<1x16x16x4xf32>
    %29 = vector.shape_cast %28 : vector<1x16x16x4xf32> to vector<16x16x4xf32>
    %30 = vector.shape_cast %29 : vector<16x16x4xf32> to vector<256x4xf32>
    %c0_37 = arith.constant 0 : index
    %c28 = arith.constant 28 : index
    %31 = vector.load %arg5[%c0_37, %c28] : memref<512x36xf32, #tpu.memory_space<vmem>>, vector<256x4xf32>
    tpu.vector_store %arg5[%c0_37, %c28], %30 {strides = array<i32>} : memref<512x36xf32, #tpu.memory_space<vmem>>, vector<256x4xf32>,
    %c0_38 = arith.constant 0 : index
    %c2_39 = arith.constant 2 : index
    %c2_40 = arith.constant 2 : index
    %c0_41 = arith.constant 0 : index
    %32 = vector.load %arg1[%c0_38, %c2_39, %c2_40, %c0_41] : memref<2x18x18x4xf32, #tpu.memory_space<vmem>>, vector<1x16x16x4xf32>
    %33 = vector.shape_cast %32 : vector<1x16x16x4xf32> to vector<16x16x4xf32>
    %34 = vector.shape_cast %33 : vector<16x16x4xf32> to vector<256x4xf32>
    %c0_42 = arith.constant 0 : index
    %c32 = arith.constant 32 : index
    %35 = vector.load %arg5[%c0_42, %c32] : memref<512x36xf32, #tpu.memory_space<vmem>>, vector<256x4xf32>
    tpu.vector_store %arg5[%c0_42, %c32], %34 {strides = array<i32>} : memref<512x36xf32, #tpu.memory_space<vmem>>, vector<256x4xf32>,
    %c1_43 = arith.constant 1 : index
    %c0_44 = arith.constant 0 : index
    %c0_45 = arith.constant 0 : index
    %c0_46 = arith.constant 0 : index
    %36 = vector.load %arg1[%c1_43, %c0_44, %c0_45, %c0_46] : memref<2x18x18x4xf32, #tpu.memory_space<vmem>>, vector<1x16x16x4xf32>
    %37 = vector.shape_cast %36 : vector<1x16x16x4xf32> to vector<16x16x4xf32>
    %38 = vector.shape_cast %37 : vector<16x16x4xf32> to vector<256x4xf32>
    %c256 = arith.constant 256 : index
    %c0_47 = arith.constant 0 : index
    %39 = vector.load %arg5[%c256, %c0_47] : memref<512x36xf32, #tpu.memory_space<vmem>>, vector<256x4xf32>
    tpu.vector_store %arg5[%c256, %c0_47], %38 {strides = array<i32>} : memref<512x36xf32, #tpu.memory_space<vmem>>, vector<256x4xf32>,
    %c1_48 = arith.constant 1 : index
    %c0_49 = arith.constant 0 : index
    %c1_50 = arith.constant 1 : index
    %c0_51 = arith.constant 0 : index
    %40 = vector.load %arg1[%c1_48, %c0_49, %c1_50, %c0_51] : memref<2x18x18x4xf32, #tpu.memory_space<vmem>>, vector<1x16x16x4xf32>
    %41 = vector.shape_cast %40 : vector<1x16x16x4xf32> to vector<16x16x4xf32>
    %42 = vector.shape_cast %41 : vector<16x16x4xf32> to vector<256x4xf32>
    %c256_52 = arith.constant 256 : index
    %c4_53 = arith.constant 4 : index
    %43 = vector.load %arg5[%c256_52, %c4_53] : memref<512x36xf32, #tpu.memory_space<vmem>>, vector<256x4xf32>
    tpu.vector_store %arg5[%c256_52, %c4_53], %42 {strides = array<i32>} : memref<512x36xf32, #tpu.memory_space<vmem>>, vector<256x4xf32>,
    %c1_54 = arith.constant 1 : index
    %c0_55 = arith.constant 0 : index
    %c2_56 = arith.constant 2 : index
    %c0_57 = arith.constant 0 : index
    %44 = vector.load %arg1[%c1_54, %c0_55, %c2_56, %c0_57] : memref<2x18x18x4xf32, #tpu.memory_space<vmem>>, vector<1x16x16x4xf32>
    %45 = vector.shape_cast %44 : vector<1x16x16x4xf32> to vector<16x16x4xf32>
    %46 = vector.shape_cast %45 : vector<16x16x4xf32> to vector<256x4xf32>
    %c256_58 = arith.constant 256 : index
    %c8_59 = arith.constant 8 : index
    %47 = vector.load %arg5[%c256_58, %c8_59] : memref<512x36xf32, #tpu.memory_space<vmem>>, vector<256x4xf32>
    tpu.vector_store %arg5[%c256_58, %c8_59], %46 {strides = array<i32>} : memref<512x36xf32, #tpu.memory_space<vmem>>, vector<256x4xf32>,
    %c1_60 = arith.constant 1 : index
    %c1_61 = arith.constant 1 : index
    %c0_62 = arith.constant 0 : index
    %c0_63 = arith.constant 0 : index
    %48 = vector.load %arg1[%c1_60, %c1_61, %c0_62, %c0_63] : memref<2x18x18x4xf32, #tpu.memory_space<vmem>>, vector<1x16x16x4xf32>
    %49 = vector.shape_cast %48 : vector<1x16x16x4xf32> to vector<16x16x4xf32>
    %50 = vector.shape_cast %49 : vector<16x16x4xf32> to vector<256x4xf32>
    %c256_64 = arith.constant 256 : index
    %c12_65 = arith.constant 12 : index
    %51 = vector.load %arg5[%c256_64, %c12_65] : memref<512x36xf32, #tpu.memory_space<vmem>>, vector<256x4xf32>
    tpu.vector_store %arg5[%c256_64, %c12_65], %50 {strides = array<i32>} : memref<512x36xf32, #tpu.memory_space<vmem>>, vector<256x4xf32>,
    %c1_66 = arith.constant 1 : index
    %c1_67 = arith.constant 1 : index
    %c1_68 = arith.constant 1 : index
    %c0_69 = arith.constant 0 : index
    %52 = vector.load %arg1[%c1_66, %c1_67, %c1_68, %c0_69] : memref<2x18x18x4xf32, #tpu.memory_space<vmem>>, vector<1x16x16x4xf32>
    %53 = vector.shape_cast %52 : vector<1x16x16x4xf32> to vector<16x16x4xf32>
    %54 = vector.shape_cast %53 : vector<16x16x4xf32> to vector<256x4xf32>
    %c256_70 = arith.constant 256 : index
    %c16_71 = arith.constant 16 : index
    %55 = vector.load %arg5[%c256_70, %c16_71] : memref<512x36xf32, #tpu.memory_space<vmem>>, vector<256x4xf32>
    tpu.vector_store %arg5[%c256_70, %c16_71], %54 {strides = array<i32>} : memref<512x36xf32, #tpu.memory_space<vmem>>, vector<256x4xf32>,
    %c1_72 = arith.constant 1 : index
    %c1_73 = arith.constant 1 : index
    %c2_74 = arith.constant 2 : index
    %c0_75 = arith.constant 0 : index
    %56 = vector.load %arg1[%c1_72, %c1_73, %c2_74, %c0_75] : memref<2x18x18x4xf32, #tpu.memory_space<vmem>>, vector<1x16x16x4xf32>
    %57 = vector.shape_cast %56 : vector<1x16x16x4xf32> to vector<16x16x4xf32>
    %58 = vector.shape_cast %57 : vector<16x16x4xf32> to vector<256x4xf32>
    %c256_76 = arith.constant 256 : index
    %c20_77 = arith.constant 20 : index
    %59 = vector.load %arg5[%c256_76, %c20_77] : memref<512x36xf32, #tpu.memory_space<vmem>>, vector<256x4xf32>
    tpu.vector_store %arg5[%c256_76, %c20_77], %58 {strides = array<i32>} : memref<512x36xf32, #tpu.memory_space<vmem>>, vector<256x4xf32>,
    %c1_78 = arith.constant 1 : index
    %c2_79 = arith.constant 2 : index
    %c0_80 = arith.constant 0 : index
    %c0_81 = arith.constant 0 : index
    %60 = vector.load %arg1[%c1_78, %c2_79, %c0_80, %c0_81] : memref<2x18x18x4xf32, #tpu.memory_space<vmem>>, vector<1x16x16x4xf32>
    %61 = vector.shape_cast %60 : vector<1x16x16x4xf32> to vector<16x16x4xf32>
    %62 = vector.shape_cast %61 : vector<16x16x4xf32> to vector<256x4xf32>
    %c256_82 = arith.constant 256 : index
    %c24_83 = arith.constant 24 : index
    %63 = vector.load %arg5[%c256_82, %c24_83] : memref<512x36xf32, #tpu.memory_space<vmem>>, vector<256x4xf32>
    tpu.vector_store %arg5[%c256_82, %c24_83], %62 {strides = array<i32>} : memref<512x36xf32, #tpu.memory_space<vmem>>, vector<256x4xf32>,
    %c1_84 = arith.constant 1 : index
    %c2_85 = arith.constant 2 : index
    %c1_86 = arith.constant 1 : index
    %c0_87 = arith.constant 0 : index
    %64 = vector.load %arg1[%c1_84, %c2_85, %c1_86, %c0_87] : memref<2x18x18x4xf32, #tpu.memory_space<vmem>>, vector<1x16x16x4xf32>
    %65 = vector.shape_cast %64 : vector<1x16x16x4xf32> to vector<16x16x4xf32>
    %66 = vector.shape_cast %65 : vector<16x16x4xf32> to vector<256x4xf32>
    %c256_88 = arith.constant 256 : index
    %c28_89 = arith.constant 28 : index
    %67 = vector.load %arg5[%c256_88, %c28_89] : memref<512x36xf32, #tpu.memory_space<vmem>>, vector<256x4xf32>
    tpu.vector_store %arg5[%c256_88, %c28_89], %66 {strides = array<i32>} : memref<512x36xf32, #tpu.memory_space<vmem>>, vector<256x4xf32>,
    %c1_90 = arith.constant 1 : index
    %c2_91 = arith.constant 2 : index
    %c2_92 = arith.constant 2 : index
    %c0_93 = arith.constant 0 : index
    %68 = vector.load %arg1[%c1_90, %c2_91, %c2_92, %c0_93] : memref<2x18x18x4xf32, #tpu.memory_space<vmem>>, vector<1x16x16x4xf32>
    %69 = vector.shape_cast %68 : vector<1x16x16x4xf32> to vector<16x16x4xf32>
    %70 = vector.shape_cast %69 : vector<16x16x4xf32> to vector<256x4xf32>
    %c256_94 = arith.constant 256 : index
    %c32_95 = arith.constant 32 : index
    %71 = vector.load %arg5[%c256_94, %c32_95] : memref<512x36xf32, #tpu.memory_space<vmem>>, vector<256x4xf32>
    tpu.vector_store %arg5[%c256_94, %c32_95], %70 {strides = array<i32>} : memref<512x36xf32, #tpu.memory_space<vmem>>, vector<256x4xf32>,
    %c0_96 = arith.constant 0 : index
    %c0_97 = arith.constant 0 : index
    %72 = vector.load %arg2[%c0_96, %c0_97] : memref<4x36xf32, #tpu.memory_space<vmem>>, vector<4x36xf32>
    %c0_98 = arith.constant 0 : index
    %c0_99 = arith.constant 0 : index
    %73 = vector.load %arg5[%c0_98, %c0_99] : memref<512x36xf32, #tpu.memory_space<vmem>>, vector<512x36xf32>
    %cst = arith.constant dense<0.000000e+00> : vector<4x512xf32>
    %74 = tpu.matmul %72, %73, %cst {dimension_numbers = #tpu.dot_dimension_numbers<[1], [1], [0], [0], [0, 0, 1, 0], [], []>} : vector<4x36xf32>, vector<512x36xf32>, vector<4x512xf32> -> vector<4x512xf32>
    %c0_100 = arith.constant 0 : index
    %c0_101 = arith.constant 0 : index
    %75 = vector.load %arg3[%c0_100, %c0_101] : memref<4x1xf32, #tpu.memory_space<vmem>>, vector<4x1xf32>
    %76 = vector.broadcast %75 : vector<4x1xf32> to vector<4x512xf32>
    %77 = arith.addf %74, %76 : vector<4x512xf32>
    %78 = vector.extract_strided_slice %77 {offsets = [0, 0], sizes = [4, 256], strides = [1, 1]} : vector<4x512xf32> to vector<4x256xf32>
    %c0_102 = arith.constant 0 : index
    %c0_103 = arith.constant 0 : index
    %c0_104 = arith.constant 0 : index
    %79 = vector.load %arg4[%c0_102, %c0_103, %c0_104] : memref<2x4x256xf32, #tpu.memory_space<vmem>>, vector<1x4x256xf32>
    %80 = vector.shape_cast %79 : vector<1x4x256xf32> to vector<4x256xf32>
    %81 = vector.shape_cast %78 : vector<4x256xf32> to vector<1x4x256xf32>
    tpu.vector_store %arg4[%c0_102, %c0_103, %c0_104], %81 {strides = array<i32>} : memref<2x4x256xf32, #tpu.memory_space<vmem>>, vector<1x4x256xf32>,
    %82 = vector.extract_strided_slice %77 {offsets = [0, 256], sizes = [4, 256], strides = [1, 1]} : vector<4x512xf32> to vector<4x256xf32>
    %c1_105 = arith.constant 1 : index
    %c0_106 = arith.constant 0 : index
    %c0_107 = arith.constant 0 : index
    %83 = vector.load %arg4[%c1_105, %c0_106, %c0_107] : memref<2x4x256xf32, #tpu.memory_space<vmem>>, vector<1x4x256xf32>
    %84 = vector.shape_cast %83 : vector<1x4x256xf32> to vector<4x256xf32>
    %85 = vector.shape_cast %82 : vector<4x256xf32> to vector<1x4x256xf32>
    tpu.vector_store %arg4[%c1_105, %c0_106, %c0_107], %85 {strides = array<i32>} : memref<2x4x256xf32, #tpu.memory_space<vmem>>, vector<1x4x256xf32>,
    return
  }
  func.func @transform_0(%arg0: i32) -> (i32, i32, i32, i32) {
    %c0_i32 = arith.constant 0 : i32
    %c0_i32_0 = arith.constant 0 : i32
    %c0_i32_1 = arith.constant 0 : i32
    %c0_i32_2 = arith.constant 0 : i32
    return %arg0, %c0_i32, %c0_i32_0, %c0_i32_1 : i32, i32, i32, i32
  }
  func.func @transform_1(%arg0: i32) -> (i32, i32) {
    %c0_i32 = arith.constant 0 : i32
    %c0_i32_0 = arith.constant 0 : i32
    %c0_i32_1 = arith.constant 0 : i32
    return %c0_i32, %c0_i32_0 : i32, i32
  }
  func.func @transform_2(%arg0: i32) -> (i32, i32) {
    %c0_i32 = arith.constant 0 : i32
    %c0_i32_0 = arith.constant 0 : i32
    %c0_i32_1 = arith.constant 0 : i32
    return %c0_i32, %c0_i32_0 : i32, i32
  }
  func.func @transform_3(%arg0: i32) -> (i32, i32, i32) {
    %c0_i32 = arith.constant 0 : i32
    %c0_i32_0 = arith.constant 0 : i32
    %c0_i32_1 = arith.constant 0 : i32
    return %arg0, %c0_i32, %c0_i32_0 : i32, i32, i32
  }
}

</mosaic_0001>

<bundles_post_ra>
// kernel: tpu_custom_call.1
= control target key start
LH: loop header
LB: loop body
LE: loop exit
PB: predicated region body
PF: predicated region fallthrough
CT: control target
= control target key end

     0   :  { %8 = vsyncpa [#allocation4], 0  ;;  %s7021_s0 = inlined_call_operand.vmem [shape: f32[4,18,18,4], index: 0, kind: input, shape index: {}]   ;;  %s7022_s1 = inlined_call_operand.vmem [shape: f32[4,36], index: 1, kind: input, shape index: {}]   ;;  %s7023_s2 = inlined_call_operand.vmem [shape: f32[4,1], index: 2, kind: input, shape index: {}]   ;;  %s7024_s3 = inlined_call_operand.hbm [shape: f32[4,4,256], index: 3, kind: output, shape index: {}]  }
   0x1   :  { %10 = vsyncpa [#allocation4 + $0x1], 0  ;;  %s4758_s12 = smov 0   ;;  %s4760_s13 = smov 0  }
   0x2   :  { %s4762_s14 = smov 0   ;;  %s4764_s15 = smov 0  }
   0x3 LB: > { %s4779_s16 = sadd.s32 4294967295, %s4725_s15   ;;  %s3886_s17 = sadd.s32 4294967294, %s4725_s15   ;;  %s4725_s15 = sphi %s4764_s15, %s7140_s15   ;;  %s4721_s14 = sphi %s4762_s14, %s7139_s14   ;;  %s4717_s13 = sphi %s4760_s13, %s7138_s13   ;;  %s4713_s12 = sphi %s4758_s12, %s7137_s12  }
   0x4   : > { %s4783_s18 = sadd.s32 1, %s4725_s15   ;;  %s91_s19 = sadd.s32 1, %s4721_s14 }
   0x5   : > { %s88_s20 = ssub.s32 %s4725_s15, %s4783_s18  ;;  %p101_p0 = scmp.ne.s32.totalorder %s4721_s14, %s4717_s13 }
   0x6   : > { %p89_p1 = scmp.eq.s32.totalorder %s88_s20, 0  ;;  %p102_p2 = scmp.eq.s32.totalorder %s4779_s16, 1 }
   0x7   : > { %p107_p3 = scmp.ne.s32.totalorder %s4717_s13, %s4713_s12  ;;  %p108_p4 = scmp.eq.s32.totalorder %s3886_s17, 1 }
   0x8   : > { %s4794_s21 = scalar_select %p89_p1, %s4721_s14, %s91_s19  }
   0x9   : > { %p4796_p5 = por %p102_p2, %p101_p0  ;;  %p4800_p6 = por %p108_p4, %p107_p3 }
   0xa   : > { %p3889_p7 = scmp.ge.s32.totalorder %s4725_s15, 1  ;;  %p142_p8 = scmp.lt.s32.totalorder %s4725_s15, 3 }
   0xc   : > { %p143_p9 = pnand %p3889_p7, %p142_p8 }
   0xe   : > { %146 = sbr.rel (%p143_p9) target bundleno = 1413 (0x585), region = 32 }
  0x15   : > { %s3891_s24 = sshll.u32 %s4779_s16, 1  ;;  %s4727_s29 = smov 4   ;;  %vm207_vm0 = vcmask 31744   ;;  %vm400_vm1 = vcmask 64544   ;;  %vm593_vm2 = vcmask 97344   ;;  %vm787_vm3 = vcmask 130144  }
  0x16   : > { %p168_p10 = scmp.lt.s32.totalorder %s3891_s24, 3  ;;  %s4728_s30 = smov 8   ;;  %vm980_vm4 = vcmask 162944   ;;  %vm1173_vm5 = vcmask 195744   ;;  %vm1367_vm6 = vcmask 228544   ;;  %vm1560_vm7 = vcmask 261344  }
  0x17   : > { %s4729_s4 = smov 12   ;;  %s4730_s5 = smov 16   ;;  %vm1753_vm8 = vcmask 294144   ;;  %vm3460_vm9 = vcmask 293888  }
  0x18   : > { %s7142_s24 = smov (!%p168_p10, %s3891_s24), 3  ;;  %s4731_s6 = smov 20   ;;  %vm6218_vm10 = vmpackc.low %vm3460_vm9, %vm3460_vm9 }
  0x19   : > { %s4612_s25 = smul.u32 432, %s7142_s24  ;;  %s4732_s7 = smov 24  }
  0x1a   : > { %s4733_s8 = smov 28   ;;  %s4734_s9 = smov 32  }
  0x1b   : > { %s4810_s28 = scalar_lea.vmem %s7021_s0, %s4612_s25  ;;  %s164_s20 = sand.u32 1, %s4717_s13  }
  0x1c   : > { %v4813_v0 = vld [vmem:[%s4810_s28 + $0x19] sm:$0xff]  ;;  %v240_v1 = vld [vmem:[%s4810_s28 + $0x1] sm:$0xff]  ;;  %v241_v3 = vld [vmem:[%s4810_s28 + $0x9] sm:$0xff]  ;;  %s3890_s24 = sshll.u32 %s164_s20, 4  ;;  %s4447_s27 = sshll.u32 %s4779_s16, 8 }
  0x1d   : > { %308 = vrot.lane.b32.xlu1 %v4813_v0, %s4727_s29  ;;  %304 = vrot.lane.b32.xlu0 %v240_v1, %s4727_s29  ;;  %v4820_v2 = vld [vmem:[%s4810_s28 + $0x21] sm:$0xff]  ;;  %v4827_v4 = vld [vmem:[%s4810_s28 + $0x39] sm:$0xff]  ;;  %s166_s25 = scalar_lea.vmem [#allocation3], %s3890_s24  ;;  %s4736_s16 = smov [#allocation3]  }
  0x1e   : > { %v4830_v5 = vld [vmem:[%s4810_s28 + $0x31] sm:$0xff]  ;;  %v4840_v7 = vld [vmem:[%s4810_s28 + $0x49] sm:$0xff]  ;;  %v4850_v9 = vld [vmem:[%s4810_s28 + $0x61] sm:$0xff]  ;;  %s3824_s26 = sshll.u32 %s166_s25, 4  ;;  %s6972_s26 = int_to_ptr.vmem [resolvable:$true] %s3824_s26 }
  0x1f   : > { %v4837_v6 = vld [vmem:[%s4810_s28 + $0x51] sm:$0xff]  ;;  %v4847_v8 = vld [vmem:[%s4810_s28 + $0x69] sm:$0xff]  ;;  %v4857_v10 = vld [vmem:[%s4810_s28 + $0x81] sm:$0xff] }
  0x20   : > { %v4860_v11 = vld [vmem:[%s4810_s28 + $0x79] sm:$0xff]  ;;  %v4874_v15 = vld [vmem:[%s4810_s28 + $0x91] sm:$0xff]  ;;  %v176_v17 = vld [vmem:[%s4810_s28 + $0x8] sm:$0xff] }
  0x21   : > { %310 = vrot.lane.b32.xlu1 %v4820_v2, %s4727_s29  ;;  %306 = vrot.lane.b32.xlu0 %v241_v3, %s4727_s29  ;;  %v4867_v12 = vld [vmem:[%s4810_s28 + $0x18] sm:$0xff]  ;;  %v175_v13 = vld [vmem:[%s4810_s28] sm:$0xff]  ;;  %209 = vst.msk [vmem:[#allocation2 + $0x8] sm:$0xff] %vm207_vm0, %v176_v17 }
  0x22   : > { %v4871_v14 = vld [vmem:[%s4810_s28 + $0x99] sm:$0xff]  ;;  %210 = vst.msk [vmem:[#allocation2 + $0x10] sm:$0xff] %vm207_vm0, %v4867_v12  ;;  %208 = vst.msk [vmem:[#allocation2] sm:$0xff] %vm207_vm0, %v175_v13  ;;  %v4886_v18 = vld [vmem:[%s4810_s28 + $0xb1] sm:$0xff] }
  0x23   : > { %v4880_v16 = vld [vmem:[%s4810_s28 + $0x20] sm:$0xff]  ;;  %v4890_v19 = vld [vmem:[%s4810_s28 + $0x38] sm:$0xff]  ;;  %v4893_v20 = vld [vmem:[%s4810_s28 + $0x30] sm:$0xff] }
  0x24   : > { %211 = vst.msk [vmem:[#allocation2 + $0x18] sm:$0xff] %vm207_vm0, %v4880_v16  ;;  %v4900_v21 = vld [vmem:[%s4810_s28 + $0xa9] sm:$0xff]  ;;  %213 = vst.msk [vmem:[#allocation2 + $0x28] sm:$0xff] %vm207_vm0, %v4890_v19  ;;  %v4918_v25 = vld [vmem:[%s4810_s28 + $0x60] sm:$0xff] }
  0x25   : > { %314 = vrot.lane.b32.xlu1 %v4827_v4, %s4727_s29  ;;  %312 = vrot.lane.b32.xlu0 %v4830_v5, %s4727_s29  ;;  %212 = vst.msk [vmem:[#allocation2 + $0x20] sm:$0xff] %vm207_vm0, %v4893_v20  ;;  %v4907_v22 = vld [vmem:[%s4810_s28 + $0x50] sm:$0xff]  ;;  %v4912_v23 = vld [vmem:[%s4810_s28 + $0x48] sm:$0xff]  ;;  %216 = vst.msk [vmem:[#allocation2 + $0x40] sm:$0xff] %vm207_vm0, %v4918_v25 }
  0x26   : > { %215 = vst.msk [vmem:[#allocation2 + $0x38] sm:$0xff] %vm207_vm0, %v4907_v22  ;;  %v4915_v24 = vld [vmem:[%s4810_s28 + $0x68] sm:$0xff]  ;;  %214 = vst.msk [vmem:[#allocation2 + $0x30] sm:$0xff] %vm207_vm0, %v4912_v23  ;;  %v4927_v26 = vld [vmem:[%s4810_s28 + $0x80] sm:$0xff] }
  0x27   : > { %217 = vst.msk [vmem:[#allocation2 + $0x48] sm:$0xff] %vm207_vm0, %v4915_v24  ;;  %v4930_v27 = vld [vmem:[%s4810_s28 + $0x78] sm:$0xff]  ;;  %v4936_v29 = vld [vmem:[%s4810_s28 + $0xc9] sm:$0xff]  ;;  %v4939_v30 = vld [vmem:[%s4810_s28 + $0xc1] sm:$0xff] }
  0x28   : > { %v4933_v28 = vld [vmem:[%s4810_s28 + $0x98] sm:$0xff]  ;;  %219 = vst.msk [vmem:[#allocation2 + $0x58] sm:$0xff] %vm207_vm0, %v4927_v26  ;;  %218 = vst.msk [vmem:[#allocation2 + $0x50] sm:$0xff] %vm207_vm0, %v4930_v27  ;;  %v4948_v31 = vld [vmem:[%s4810_s28 + $0x90] sm:$0xff] }
  0x29   : > { %318 = vrot.lane.b32.xlu1 %v4837_v6, %s4727_s29  ;;  %316 = vrot.lane.b32.xlu0 %v4840_v7, %s4727_s29  ;;  %221 = vst.msk [vmem:[#allocation2 + $0x68] sm:$0xff] %vm207_vm0, %v4933_v28  ;;  %v4951_v32 = vld [vmem:[%s4810_s28 + $0xb0] sm:$0xff]  ;;  %v4954_v33 = vld [vmem:[%s4810_s28 + $0xa8] sm:$0xff]  ;;  %220 = vst.msk [vmem:[#allocation2 + $0x60] sm:$0xff] %vm207_vm0, %v4948_v31 }
  0x2a   : > { %223 = vst.msk [vmem:[#allocation2 + $0x78] sm:$0xff] %vm207_vm0, %v4951_v32  ;;  %222 = vst.msk [vmem:[#allocation2 + $0x70] sm:$0xff] %vm207_vm0, %v4954_v33  ;;  %v4967_v34 = vld [vmem:[%s4810_s28 + $0xc8] sm:$0xff]  ;;  %v4970_v35 = vld [vmem:[%s4810_s28 + $0xc0] sm:$0xff] }
  0x2b   : > { %225 = vst.msk [vmem:[#allocation2 + $0x88] sm:$0xff] %vm207_vm0, %v4967_v34  ;;  %224 = vst.msk [vmem:[#allocation2 + $0x80] sm:$0xff] %vm207_vm0, %v4970_v35  ;;  %v4977_v36 = vld [vmem:[%s4810_s28 + $0xe0] sm:$0xff]  ;;  %v4980_v37 = vld [vmem:[%s4810_s28 + $0xd8] sm:$0xff] }
  0x2c   : > { %v4983_v38 = vld [vmem:[%s4810_s28 + $0xf8] sm:$0xff]  ;;  %227 = vst.msk [vmem:[#allocation2 + $0x98] sm:$0xff] %vm207_vm0, %v4977_v36  ;;  %226 = vst.msk [vmem:[#allocation2 + $0x90] sm:$0xff] %vm207_vm0, %v4980_v37  ;;  %v4992_v39 = vld [vmem:[%s4810_s28 + $0xf0] sm:$0xff] }
  0x2d   : > { %322 = vrot.lane.b32.xlu1 %v4847_v8, %s4727_s29  ;;  %320 = vrot.lane.b32.xlu0 %v4850_v9, %s4727_s29  ;;  %229 = vst.msk [vmem:[#allocation2 + $0xa8] sm:$0xff] %vm207_vm0, %v4983_v38  ;;  %v4995_v40 = vld [vmem:[%s4810_s28 + $0x110] sm:$0xff]  ;;  %v4998_v41 = vld [vmem:[%s4810_s28 + $0x108] sm:$0xff]  ;;  %228 = vst.msk [vmem:[#allocation2 + $0xa0] sm:$0xff] %vm207_vm0, %v4992_v39 }
  0x2e   : > { %231 = vst.msk [vmem:[#allocation2 + $0xb8] sm:$0xff] %vm207_vm0, %v4995_v40  ;;  %230 = vst.msk [vmem:[#allocation2 + $0xb0] sm:$0xff] %vm207_vm0, %v4998_v41  ;;  %v5011_v42 = vld [vmem:[%s4810_s28 + $0xe1] sm:$0xff]  ;;  %v5014_v43 = vld [vmem:[%s4810_s28 + $0xd9] sm:$0xff] }
  0x2f   : > { %v5017_v44 = vld [vmem:[%s4810_s28 + $0x128] sm:$0xff]  ;;  %v5020_v45 = vld [vmem:[%s4810_s28 + $0x120] sm:$0xff]  ;;  %v5034_v47 = vld [vmem:[%s4810_s28 + $0xf1] sm:$0xff] }
  0x30   : > { %233 = vst.msk [vmem:[#allocation2 + $0xc8] sm:$0xff] %vm207_vm0, %v5017_v44  ;;  %232 = vst.msk [vmem:[#allocation2 + $0xc0] sm:$0xff] %vm207_vm0, %v5020_v45  ;;  %v5031_v46 = vld [vmem:[%s4810_s28 + $0xf9] sm:$0xff]  ;;  %v5051_v50 = vld [vmem:[%s4810_s28 + $0x111] sm:$0xff] }
  0x31   : > { %326 = vrot.lane.b32.xlu1 %v4857_v10, %s4727_s29  ;;  %324 = vrot.lane.b32.xlu0 %v4860_v11, %s4727_s29  ;;  %v5037_v48 = vld [vmem:[%s4810_s28 + $0x140] sm:$0xff]  ;;  %v5040_v49 = vld [vmem:[%s4810_s28 + $0x138] sm:$0xff] }
  0x32   : > { %235 = vst.msk [vmem:[#allocation2 + $0xd8] sm:$0xff] %vm207_vm0, %v5037_v48  ;;  %234 = vst.msk [vmem:[#allocation2 + $0xd0] sm:$0xff] %vm207_vm0, %v5040_v49  ;;  %v5054_v51 = vld [vmem:[%s4810_s28 + $0x109] sm:$0xff]  ;;  %v5057_v52 = vld [vmem:[%s4810_s28 + $0x158] sm:$0xff] }
  0x33   : > { %v5060_v53 = vld [vmem:[%s4810_s28 + $0x150] sm:$0xff]  ;;  %237 = vst.msk [vmem:[#allocation2 + $0xe8] sm:$0xff] %vm207_vm0, %v5057_v52  ;;  %v5074_v55 = vld [vmem:[%s4810_s28 + $0x121] sm:$0xff]  ;;  %v5094_v59 = vld [vmem:[%s4810_s28 + $0x139] sm:$0xff] }
  0x34   : > { %236 = vst.msk [vmem:[#allocation2 + $0xe0] sm:$0xff] %vm207_vm0, %v5060_v53  ;;  %v5071_v54 = vld [vmem:[%s4810_s28 + $0x129] sm:$0xff]  ;;  %v5091_v58 = vld [vmem:[%s4810_s28 + $0x141] sm:$0xff]  ;;  %v5101_v60 = vld [vmem:[%s4810_s28 + $0x159] sm:$0xff] }
  0x35   : > { %330 = vrot.lane.b32.xlu1 %v4871_v14, %s4727_s29  ;;  %328 = vrot.lane.b32.xlu0 %v4874_v15, %s4727_s29  ;;  %v5077_v56 = vld [vmem:[%s4810_s28 + $0x170] sm:$0xff]  ;;  %v5080_v57 = vld [vmem:[%s4810_s28 + $0x168] sm:$0xff]  ;;  %7065 = vst [vmem:[#allocation6_spill] sm:$0xff] %v5101_v60 }
  0x36   : > { %239 = vst.msk [vmem:[#allocation2 + $0xf8] sm:$0xff] %vm207_vm0, %v5077_v56  ;;  %238 = vst.msk [vmem:[#allocation2 + $0xf0] sm:$0xff] %vm207_vm0, %v5080_v57  ;;  %v5104_v61 = vld [vmem:[%s4810_s28 + $0x151] sm:$0xff]  ;;  %v5114_v63 = vld [vmem:[%s4810_s28 + $0x169] sm:$0xff] }
  0x37   : > { %7066 = vst [vmem:[#allocation7_spill] sm:$0xff] %v5104_v61  ;;  %v5111_v62 = vld [vmem:[%s4810_s28 + $0x171] sm:$0xff]  ;;  %7068 = vst [vmem:[#allocation9_spill] sm:$0xff] %v5114_v63  ;;  %v433_v3 = vld [vmem:[%s4810_s28 + $0x2] sm:$0xff] }
  0x38   : > { %7067 = vst [vmem:[#allocation8_spill] sm:$0xff] %v5111_v62  ;;  %v434_v1 = vld [vmem:[%s4810_s28 + $0xa] sm:$0xff]  ;;  %v5125_v13 = vld [vmem:[%s4810_s28 + $0x22] sm:$0xff]  ;;  %v5128_v17 = vld [vmem:[%s4810_s28 + $0x1a] sm:$0xff] }
  0x39   : > { %334 = vrot.lane.b32.xlu1 %v4886_v18, %s4727_s29  ;;  %332 = vrot.lane.b32.xlu0 %v4900_v21, %s4727_s29  ;;  %7069 = vst [vmem:[#allocation10_spill] sm:$0xff] %v5125_v13  ;;  %7070 = vst [vmem:[#allocation11_spill] sm:$0xff] %v5128_v17 }
  0x3d   : > { %338 = vrot.lane.b32.xlu1 %v4936_v29, %s4727_s29  ;;  %336 = vrot.lane.b32.xlu0 %v4939_v30, %s4727_s29 }
  0x41   : > { %342 = vrot.lane.b32.xlu1 %v5011_v42, %s4727_s29  ;;  %340 = vrot.lane.b32.xlu0 %v5014_v43, %s4727_s29 }
  0x45   : > { %346 = vrot.lane.b32.xlu1 %v5031_v46, %s4727_s29  ;;  %344 = vrot.lane.b32.xlu0 %v5034_v47, %s4727_s29 }
  0x49   : > { %350 = vrot.lane.b32.xlu1 %v5051_v50, %s4727_s29  ;;  %348 = vrot.lane.b32.xlu0 %v5054_v51, %s4727_s29 }
  0x4d   : > { %354 = vrot.lane.b32.xlu1 %v5071_v54, %s4727_s29  ;;  %352 = vrot.lane.b32.xlu0 %v5074_v55, %s4727_s29 }
  0x51   : > { %358 = vrot.lane.b32.xlu1 %v5091_v58, %s4727_s29  ;;  %356 = vrot.lane.b32.xlu0 %v5094_v59, %s4727_s29 }
  0x55   : > { %362 = vrot.lane.b32.xlu1 %v5101_v60, %s4727_s29  ;;  %360 = vrot.lane.b32.xlu0 %v5104_v61, %s4727_s29 }
  0x59   : > { %366 = vrot.lane.b32.xlu1 %v5111_v62, %s4727_s29  ;;  %364 = vrot.lane.b32.xlu0 %v5114_v63, %s4727_s29  ;;  %v5135_v63 = vld [vmem:[%s4810_s28 + $0x3a] sm:$0xff]  ;;  %v5138_v62 = vld [vmem:[%s4810_s28 + $0x32] sm:$0xff] }
  0x5a   : > { %7071 = vst [vmem:[#allocation12_spill] sm:$0xff] %v5135_v63  ;;  %7072 = vst [vmem:[#allocation13_spill] sm:$0xff] %v5138_v62 }
  0x5d   : > { %499 = vrot.lane.b32.xlu1 %v434_v1, %s4728_s30  ;;  %497 = vrot.lane.b32.xlu0 %v433_v3, %s4728_s30  ;;  %v5145_v1 = vld [vmem:[%s4810_s28 + $0x52] sm:$0xff]  ;;  %v5148_v3 = vld [vmem:[%s4810_s28 + $0x4a] sm:$0xff] }
  0x5e   : > { %7073 = vst [vmem:[#allocation14_spill] sm:$0xff] %v5145_v1  ;;  %7074 = vst [vmem:[#allocation15_spill] sm:$0xff] %v5148_v3 }
  0x61   : > { %503 = vrot.lane.b32.xlu1 %v5125_v13, %s4728_s30  ;;  %501 = vrot.lane.b32.xlu0 %v5128_v17, %s4728_s30  ;;  %v5155_v17 = vld [vmem:[%s4810_s28 + $0x6a] sm:$0xff]  ;;  %v5158_v13 = vld [vmem:[%s4810_s28 + $0x62] sm:$0xff] }
  0x62   : > { %7075 = vst [vmem:[#allocation16_spill] sm:$0xff] %v5155_v17  ;;  %7076 = vst [vmem:[#allocation17_spill] sm:$0xff] %v5158_v13 }
  0x65   : > { %507 = vrot.lane.b32.xlu1 %v5135_v63, %s4728_s30  ;;  %505 = vrot.lane.b32.xlu0 %v5138_v62, %s4728_s30  ;;  %v5165_v62 = vld [vmem:[%s4810_s28 + $0x82] sm:$0xff]  ;;  %v5168_v63 = vld [vmem:[%s4810_s28 + $0x7a] sm:$0xff] }
  0x66   : > { %7077 = vst [vmem:[#allocation18_spill] sm:$0xff] %v5165_v62  ;;  %7078 = vst [vmem:[#allocation19_spill] sm:$0xff] %v5168_v63 }
  0x69   : > { %511 = vrot.lane.b32.xlu1 %v5145_v1, %s4728_s30  ;;  %509 = vrot.lane.b32.xlu0 %v5148_v3, %s4728_s30  ;;  %v5175_v3 = vld [vmem:[%s4810_s28 + $0x9a] sm:$0xff]  ;;  %v5178_v1 = vld [vmem:[%s4810_s28 + $0x92] sm:$0xff] }
  0x6a   : > { %7079 = vst [vmem:[#allocation20_spill] sm:$0xff] %v5175_v3  ;;  %7080 = vst [vmem:[#allocation21_spill] sm:$0xff] %v5178_v1 }
  0x6d   : > { %515 = vrot.lane.b32.xlu1 %v5155_v17, %s4728_s30  ;;  %513 = vrot.lane.b32.xlu0 %v5158_v13, %s4728_s30  ;;  %v5185_v13 = vld [vmem:[%s4810_s28 + $0xb2] sm:$0xff]  ;;  %v5188_v17 = vld [vmem:[%s4810_s28 + $0xaa] sm:$0xff] }
  0x6e   : > { %7081 = vst [vmem:[#allocation22_spill] sm:$0xff] %v5185_v13  ;;  %7082 = vst [vmem:[#allocation23_spill] sm:$0xff] %v5188_v17 }
  0x71   : > { %519 = vrot.lane.b32.xlu1 %v5165_v62, %s4728_s30  ;;  %517 = vrot.lane.b32.xlu0 %v5168_v63, %s4728_s30  ;;  %v5195_v63 = vld [vmem:[%s4810_s28 + $0xca] sm:$0xff]  ;;  %v5198_v62 = vld [vmem:[%s4810_s28 + $0xc2] sm:$0xff] }
  0x72   : > { %7083 = vst [vmem:[#allocation24_spill] sm:$0xff] %v5195_v63  ;;  %7084 = vst [vmem:[#allocation25_spill] sm:$0xff] %v5198_v62 }
  0x75   : > { %523 = vrot.lane.b32.xlu1 %v5175_v3, %s4728_s30  ;;  %521 = vrot.lane.b32.xlu0 %v5178_v1, %s4728_s30  ;;  %v5205_v1 = vld [vmem:[%s4810_s28 + $0xe2] sm:$0xff]  ;;  %v5208_v3 = vld [vmem:[%s4810_s28 + $0xda] sm:$0xff] }
  0x76   : > { %7085 = vst [vmem:[#allocation26_spill] sm:$0xff] %v5205_v1  ;;  %7086 = vst [vmem:[#allocation27_spill] sm:$0xff] %v5208_v3 }
  0x79   : > { %527 = vrot.lane.b32.xlu1 %v5185_v13, %s4728_s30  ;;  %525 = vrot.lane.b32.xlu0 %v5188_v17, %s4728_s30  ;;  %v5215_v17 = vld [vmem:[%s4810_s28 + $0xfa] sm:$0xff]  ;;  %v5218_v13 = vld [vmem:[%s4810_s28 + $0xf2] sm:$0xff] }
  0x7a   : > { %7087 = vst [vmem:[#allocation28_spill] sm:$0xff] %v5215_v17  ;;  %7088 = vst [vmem:[#allocation29_spill] sm:$0xff] %v5218_v13 }
  0x7d   : > { %531 = vrot.lane.b32.xlu1 %v5195_v63, %s4728_s30  ;;  %529 = vrot.lane.b32.xlu0 %v5198_v62, %s4728_s30  ;;  %v5225_v62 = vld [vmem:[%s4810_s28 + $0x112] sm:$0xff]  ;;  %v5228_v63 = vld [vmem:[%s4810_s28 + $0x10a] sm:$0xff] }
  0x7e   : > { %7089 = vst [vmem:[#allocation30_spill] sm:$0xff] %v5225_v62  ;;  %7090 = vst [vmem:[#allocation31_spill] sm:$0xff] %v5228_v63 }
  0x81   : > { %535 = vrot.lane.b32.xlu1 %v5205_v1, %s4728_s30  ;;  %533 = vrot.lane.b32.xlu0 %v5208_v3, %s4728_s30  ;;  %v5235_v3 = vld [vmem:[%s4810_s28 + $0x12a] sm:$0xff]  ;;  %v5238_v1 = vld [vmem:[%s4810_s28 + $0x122] sm:$0xff] }
  0x82   : > { %7091 = vst [vmem:[#allocation32_spill] sm:$0xff] %v5235_v3  ;;  %7092 = vst [vmem:[#allocation33_spill] sm:$0xff] %v5238_v1 }
  0x85   : > { %539 = vrot.lane.b32.xlu1 %v5215_v17, %s4728_s30  ;;  %537 = vrot.lane.b32.xlu0 %v5218_v13, %s4728_s30  ;;  %v5245_v13 = vld [vmem:[%s4810_s28 + $0x142] sm:$0xff]  ;;  %v5248_v17 = vld [vmem:[%s4810_s28 + $0x13a] sm:$0xff] }
  0x86   : > { %7093 = vst [vmem:[#allocation34_spill] sm:$0xff] %v5245_v13  ;;  %7094 = vst [vmem:[#allocation35_spill] sm:$0xff] %v5248_v17 }
  0x89   : > { %543 = vrot.lane.b32.xlu1 %v5225_v62, %s4728_s30  ;;  %541 = vrot.lane.b32.xlu0 %v5228_v63, %s4728_s30 }
  0x8d   : > { %547 = vrot.lane.b32.xlu1 %v5235_v3, %s4728_s30  ;;  %545 = vrot.lane.b32.xlu0 %v5238_v1, %s4728_s30  ;;  %v5257_v1 = vld [vmem:[%s4810_s28 + $0x15a] sm:$0xff]  ;;  %v5260_v3 = vld [vmem:[%s4810_s28 + $0x152] sm:$0xff] }
  0x8f   : > { %v309_v62 = vpop.permute.xlu1 %308  ;;  %v305_v61 = vpop.permute.xlu0 %304 }
  0x90   : > { %403 = vst.msk [vmem:[#allocation2 + $0x10] sm:$0xff] %vm400_vm1, %v309_v62  ;;  %401 = vst.msk [vmem:[#allocation2] sm:$0xff] %vm400_vm1, %v305_v61  ;;  %v5269_v61 = vld [vmem:[%s4810_s28 + $0x172] sm:$0xff]  ;;  %v5272_v62 = vld [vmem:[%s4810_s28 + $0x16a] sm:$0xff] }
  0x91   : > { %551 = vrot.lane.b32.xlu1 %v5245_v13, %s4728_s30  ;;  %549 = vrot.lane.b32.xlu0 %v5248_v17, %s4728_s30 }
  0x93   : > { %v311_v63 = vpop.permute.xlu1 %310  ;;  %v307_v60 = vpop.permute.xlu0 %306 }
  0x94   : > { %404 = vst.msk [vmem:[#allocation2 + $0x18] sm:$0xff] %vm400_vm1, %v311_v63  ;;  %402 = vst.msk [vmem:[#allocation2 + $0x8] sm:$0xff] %vm400_vm1, %v307_v60 }
  0x95   : > { %555 = vrot.lane.b32.xlu1 %v5257_v1, %s4728_s30  ;;  %553 = vrot.lane.b32.xlu0 %v5260_v3, %s4728_s30 }
  0x97   : > { %v315_v17 = vpop.permute.xlu1 %314  ;;  %v313_v13 = vpop.permute.xlu0 %312 }
  0x98   : > { %406 = vst.msk [vmem:[#allocation2 + $0x28] sm:$0xff] %vm400_vm1, %v315_v17  ;;  %405 = vst.msk [vmem:[#allocation2 + $0x20] sm:$0xff] %vm400_vm1, %v313_v13 }
  0x99   : > { %559 = vrot.lane.b32.xlu1 %v5269_v61, %s4728_s30  ;;  %557 = vrot.lane.b32.xlu0 %v5272_v62, %s4728_s30 }
  0x9b   : > { %v319_v60 = vpop.permute.xlu1 %318  ;;  %v317_v63 = vpop.permute.xlu0 %316 }
  0x9c   : > { %408 = vst.msk [vmem:[#allocation2 + $0x38] sm:$0xff] %vm400_vm1, %v319_v60  ;;  %407 = vst.msk [vmem:[#allocation2 + $0x30] sm:$0xff] %vm400_vm1, %v317_v63 }
  0x9d   : > { %693 = vrot.lane.b32.xlu1 %v4880_v16, %s4729_s4  ;;  %691 = vrot.lane.b32.xlu0 %v4867_v12, %s4729_s4 }
  0x9f   : > { %v323_v13 = vpop.permute.xlu1 %322  ;;  %v321_v17 = vpop.permute.xlu0 %320 }
  0xa0   : > { %410 = vst.msk [vmem:[#allocation2 + $0x48] sm:$0xff] %vm400_vm1, %v323_v13  ;;  %409 = vst.msk [vmem:[#allocation2 + $0x40] sm:$0xff] %vm400_vm1, %v321_v17 }
  0xa1   : > { %697 = vrot.lane.b32.xlu1 %v4890_v19, %s4729_s4  ;;  %695 = vrot.lane.b32.xlu0 %v4893_v20, %s4729_s4 }
  0xa3   : > { %v327_v60 = vpop.permute.xlu1 %326  ;;  %v325_v63 = vpop.permute.xlu0 %324 }
  0xa4   : > { %412 = vst.msk [vmem:[#allocation2 + $0x58] sm:$0xff] %vm400_vm1, %v327_v60  ;;  %411 = vst.msk [vmem:[#allocation2 + $0x50] sm:$0xff] %vm400_vm1, %v325_v63 }
  0xa5   : > { %701 = vrot.lane.b32.xlu1 %v4907_v22, %s4729_s4  ;;  %699 = vrot.lane.b32.xlu0 %v4912_v23, %s4729_s4 }
  0xa7   : > { %v331_v12 = vpop.permute.xlu1 %330  ;;  %v329_v16 = vpop.permute.xlu0 %328 }
  0xa8   : > { %414 = vst.msk [vmem:[#allocation2 + $0x68] sm:$0xff] %vm400_vm1, %v331_v12  ;;  %413 = vst.msk [vmem:[#allocation2 + $0x60] sm:$0xff] %vm400_vm1, %v329_v16 }
  0xa9   : > { %705 = vrot.lane.b32.xlu1 %v4915_v24, %s4729_s4  ;;  %703 = vrot.lane.b32.xlu0 %v4918_v25, %s4729_s4 }
  0xab   : > { %v335_v13 = vpop.permute.xlu1 %334  ;;  %v333_v17 = vpop.permute.xlu0 %332 }
  0xac   : > { %416 = vst.msk [vmem:[#allocation2 + $0x78] sm:$0xff] %vm400_vm1, %v335_v13  ;;  %415 = vst.msk [vmem:[#allocation2 + $0x70] sm:$0xff] %vm400_vm1, %v333_v17 }
  0xad   : > { %709 = vrot.lane.b32.xlu1 %v4927_v26, %s4729_s4  ;;  %707 = vrot.lane.b32.xlu0 %v4930_v27, %s4729_s4 }
  0xaf   : > { %v339_v60 = vpop.permute.xlu1 %338  ;;  %v337_v63 = vpop.permute.xlu0 %336 }
  0xb0   : > { %418 = vst.msk [vmem:[#allocation2 + $0x88] sm:$0xff] %vm400_vm1, %v339_v60  ;;  %417 = vst.msk [vmem:[#allocation2 + $0x80] sm:$0xff] %vm400_vm1, %v337_v63 }
  0xb1   : > { %713 = vrot.lane.b32.xlu1 %v4933_v28, %s4729_s4  ;;  %711 = vrot.lane.b32.xlu0 %v4948_v31, %s4729_s4 }
  0xb3   : > { %v343_v12 = vpop.permute.xlu1 %342  ;;  %v341_v16 = vpop.permute.xlu0 %340 }
  0xb4   : > { %420 = vst.msk [vmem:[#allocation2 + $0x98] sm:$0xff] %vm400_vm1, %v343_v12  ;;  %419 = vst.msk [vmem:[#allocation2 + $0x90] sm:$0xff] %vm400_vm1, %v341_v16 }
  0xb5   : > { %717 = vrot.lane.b32.xlu1 %v4951_v32, %s4729_s4  ;;  %715 = vrot.lane.b32.xlu0 %v4954_v33, %s4729_s4 }
  0xb7   : > { %v347_v13 = vpop.permute.xlu1 %346  ;;  %v345_v17 = vpop.permute.xlu0 %344 }
  0xb8   : > { %422 = vst.msk [vmem:[#allocation2 + $0xa8] sm:$0xff] %vm400_vm1, %v347_v13  ;;  %421 = vst.msk [vmem:[#allocation2 + $0xa0] sm:$0xff] %vm400_vm1, %v345_v17 }
  0xb9   : > { %721 = vrot.lane.b32.xlu1 %v4967_v34, %s4729_s4  ;;  %719 = vrot.lane.b32.xlu0 %v4970_v35, %s4729_s4 }
  0xbb   : > { %v351_v60 = vpop.permute.xlu1 %350  ;;  %v349_v63 = vpop.permute.xlu0 %348 }
  0xbc   : > { %424 = vst.msk [vmem:[#allocation2 + $0xb8] sm:$0xff] %vm400_vm1, %v351_v60  ;;  %423 = vst.msk [vmem:[#allocation2 + $0xb0] sm:$0xff] %vm400_vm1, %v349_v63 }
  0xbd   : > { %725 = vrot.lane.b32.xlu1 %v4977_v36, %s4729_s4  ;;  %723 = vrot.lane.b32.xlu0 %v4980_v37, %s4729_s4 }
  0xbf   : > { %v355_v12 = vpop.permute.xlu1 %354  ;;  %v353_v16 = vpop.permute.xlu0 %352 }
  0xc0   : > { %426 = vst.msk [vmem:[#allocation2 + $0xc8] sm:$0xff] %vm400_vm1, %v355_v12  ;;  %425 = vst.msk [vmem:[#allocation2 + $0xc0] sm:$0xff] %vm400_vm1, %v353_v16 }
  0xc1   : > { %729 = vrot.lane.b32.xlu1 %v4983_v38, %s4729_s4  ;;  %727 = vrot.lane.b32.xlu0 %v4992_v39, %s4729_s4 }
  0xc3   : > { %v359_v13 = vpop.permute.xlu1 %358  ;;  %v357_v17 = vpop.permute.xlu0 %356 }
  0xc4   : > { %428 = vst.msk [vmem:[#allocation2 + $0xd8] sm:$0xff] %vm400_vm1, %v359_v13  ;;  %427 = vst.msk [vmem:[#allocation2 + $0xd0] sm:$0xff] %vm400_vm1, %v357_v17 }
  0xc5   : > { %733 = vrot.lane.b32.xlu1 %v4995_v40, %s4729_s4  ;;  %731 = vrot.lane.b32.xlu0 %v4998_v41, %s4729_s4 }
  0xc7   : > { %v363_v60 = vpop.permute.xlu1 %362  ;;  %v361_v63 = vpop.permute.xlu0 %360 }
  0xc8   : > { %430 = vst.msk [vmem:[#allocation2 + $0xe8] sm:$0xff] %vm400_vm1, %v363_v60  ;;  %429 = vst.msk [vmem:[#allocation2 + $0xe0] sm:$0xff] %vm400_vm1, %v361_v63 }
  0xc9   : > { %737 = vrot.lane.b32.xlu1 %v5017_v44, %s4729_s4  ;;  %735 = vrot.lane.b32.xlu0 %v5020_v45, %s4729_s4 }
  0xcb   : > { %v367_v12 = vpop.permute.xlu1 %366  ;;  %v365_v16 = vpop.permute.xlu0 %364 }
  0xcc   : > { %432 = vst.msk [vmem:[#allocation2 + $0xf8] sm:$0xff] %vm400_vm1, %v367_v12  ;;  %431 = vst.msk [vmem:[#allocation2 + $0xf0] sm:$0xff] %vm400_vm1, %v365_v16  ;;  %v5371_v12 = vld [vmem:[%s4810_s28 + $0x188] sm:$0xff]  ;;  %v5374_v16 = vld [vmem:[%s4810_s28 + $0x180] sm:$0xff] }
  0xcd   : > { %741 = vrot.lane.b32.xlu1 %v5037_v48, %s4729_s4  ;;  %739 = vrot.lane.b32.xlu0 %v5040_v49, %s4729_s4 }
  0xcf   : > { %v500_v13 = vpop.permute.xlu1 %499  ;;  %v498_v17 = vpop.permute.xlu0 %497 }
  0xd0   : > { %595 = vst.msk [vmem:[#allocation2 + $0x8] sm:$0xff] %vm593_vm2, %v500_v13  ;;  %594 = vst.msk [vmem:[#allocation2] sm:$0xff] %vm593_vm2, %v498_v17 }
  0xd1   : > { %745 = vrot.lane.b32.xlu1 %v5057_v52, %s4729_s4  ;;  %743 = vrot.lane.b32.xlu0 %v5060_v53, %s4729_s4 }
  0xd3   : > { %v504_v60 = vpop.permute.xlu1 %503  ;;  %v502_v63 = vpop.permute.xlu0 %501 }
  0xd4   : > { %597 = vst.msk [vmem:[#allocation2 + $0x18] sm:$0xff] %vm593_vm2, %v504_v60  ;;  %596 = vst.msk [vmem:[#allocation2 + $0x10] sm:$0xff] %vm593_vm2, %v502_v63 }
  0xd5   : > { %749 = vrot.lane.b32.xlu1 %v5077_v56, %s4729_s4  ;;  %747 = vrot.lane.b32.xlu0 %v5080_v57, %s4729_s4 }
  0xd7   : > { %v508_v13 = vpop.permute.xlu1 %507  ;;  %v506_v17 = vpop.permute.xlu0 %505 }
  0xd8   : > { %599 = vst.msk [vmem:[#allocation2 + $0x28] sm:$0xff] %vm593_vm2, %v508_v13  ;;  %598 = vst.msk [vmem:[#allocation2 + $0x20] sm:$0xff] %vm593_vm2, %v506_v17 }
  0xd9   : > { %753 = vrot.lane.b32.xlu1 %v5371_v12, %s4729_s4  ;;  %751 = vrot.lane.b32.xlu0 %v5374_v16, %s4729_s4 }
  0xdb   : > { %v512_v60 = vpop.permute.xlu1 %511  ;;  %v510_v63 = vpop.permute.xlu0 %509 }
  0xdc   : > { %601 = vst.msk [vmem:[#allocation2 + $0x38] sm:$0xff] %vm593_vm2, %v512_v60  ;;  %600 = vst.msk [vmem:[#allocation2 + $0x30] sm:$0xff] %vm593_vm2, %v510_v63 }
  0xdd   : > { %886 = vrot.lane.b32.xlu1 %v4820_v2, %s4730_s5  ;;  %884 = vrot.lane.b32.xlu0 %v4813_v0, %s4730_s5 }
  0xdf   : > { %v516_v13 = vpop.permute.xlu1 %515  ;;  %v514_v17 = vpop.permute.xlu0 %513 }
  0xe0   : > { %603 = vst.msk [vmem:[#allocation2 + $0x48] sm:$0xff] %vm593_vm2, %v516_v13  ;;  %602 = vst.msk [vmem:[#allocation2 + $0x40] sm:$0xff] %vm593_vm2, %v514_v17 }
  0xe1   : > { %890 = vrot.lane.b32.xlu1 %v4827_v4, %s4730_s5  ;;  %888 = vrot.lane.b32.xlu0 %v4830_v5, %s4730_s5 }
  0xe3   : > { %v520_v60 = vpop.permute.xlu1 %519  ;;  %v518_v63 = vpop.permute.xlu0 %517 }
  0xe4   : > { %605 = vst.msk [vmem:[#allocation2 + $0x58] sm:$0xff] %vm593_vm2, %v520_v60  ;;  %604 = vst.msk [vmem:[#allocation2 + $0x50] sm:$0xff] %vm593_vm2, %v518_v63  ;;  %v5473_v60 = vld [vmem:[%s4810_s28 + $0x189] sm:$0xff]  ;;  %v5476_v63 = vld [vmem:[%s4810_s28 + $0x181] sm:$0xff] }
  0xe5   : > { %894 = vrot.lane.b32.xlu1 %v4837_v6, %s4730_s5  ;;  %892 = vrot.lane.b32.xlu0 %v4840_v7, %s4730_s5 }
  0xe7   : > { %v524_v0 = vpop.permute.xlu1 %523  ;;  %v522_v2 = vpop.permute.xlu0 %521 }
  0xe8   : > { %607 = vst.msk [vmem:[#allocation2 + $0x68] sm:$0xff] %vm593_vm2, %v524_v0  ;;  %606 = vst.msk [vmem:[#allocation2 + $0x60] sm:$0xff] %vm593_vm2, %v522_v2 }
  0xe9   : > { %898 = vrot.lane.b32.xlu1 %v4847_v8, %s4730_s5  ;;  %896 = vrot.lane.b32.xlu0 %v4850_v9, %s4730_s5 }
  0xeb   : > { %v528_v4 = vpop.permute.xlu1 %527  ;;  %v526_v5 = vpop.permute.xlu0 %525 }
  0xec   : > { %609 = vst.msk [vmem:[#allocation2 + $0x78] sm:$0xff] %vm593_vm2, %v528_v4  ;;  %608 = vst.msk [vmem:[#allocation2 + $0x70] sm:$0xff] %vm593_vm2, %v526_v5 }
  0xed   : > { %902 = vrot.lane.b32.xlu1 %v4857_v10, %s4730_s5  ;;  %900 = vrot.lane.b32.xlu0 %v4860_v11, %s4730_s5 }
  0xef   : > { %v532_v6 = vpop.permute.xlu1 %531  ;;  %v530_v7 = vpop.permute.xlu0 %529 }
  0xf0   : > { %611 = vst.msk [vmem:[#allocation2 + $0x88] sm:$0xff] %vm593_vm2, %v532_v6  ;;  %610 = vst.msk [vmem:[#allocation2 + $0x80] sm:$0xff] %vm593_vm2, %v530_v7  ;;  %v7099_v6 = vld [vmem:[#allocation10_spill] sm:$0xff]  ;;  %v7100_v7 = vld [vmem:[#allocation11_spill] sm:$0xff] }
  0xf1   : > { %906 = vrot.lane.b32.xlu1 %v4871_v14, %s4730_s5  ;;  %904 = vrot.lane.b32.xlu0 %v4874_v15, %s4730_s5 }
  0xf3   : > { %v536_v8 = vpop.permute.xlu1 %535  ;;  %v534_v9 = vpop.permute.xlu0 %533 }
  0xf4   : > { %613 = vst.msk [vmem:[#allocation2 + $0x98] sm:$0xff] %vm593_vm2, %v536_v8  ;;  %612 = vst.msk [vmem:[#allocation2 + $0x90] sm:$0xff] %vm593_vm2, %v534_v9 }
  0xf5   : > { %910 = vrot.lane.b32.xlu1 %v4886_v18, %s4730_s5  ;;  %908 = vrot.lane.b32.xlu0 %v4900_v21, %s4730_s5 }
  0xf7   : > { %v540_v10 = vpop.permute.xlu1 %539  ;;  %v538_v11 = vpop.permute.xlu0 %537 }
  0xf8   : > { %615 = vst.msk [vmem:[#allocation2 + $0xa8] sm:$0xff] %vm593_vm2, %v540_v10  ;;  %614 = vst.msk [vmem:[#allocation2 + $0xa0] sm:$0xff] %vm593_vm2, %v538_v11  ;;  %v7101_v10 = vld [vmem:[#allocation12_spill] sm:$0xff]  ;;  %v7102_v11 = vld [vmem:[#allocation13_spill] sm:$0xff] }
  0xf9   : > { %914 = vrot.lane.b32.xlu1 %v4936_v29, %s4730_s5  ;;  %912 = vrot.lane.b32.xlu0 %v4939_v30, %s4730_s5 }
  0xfb   : > { %v544_v14 = vpop.permute.xlu1 %543  ;;  %v542_v15 = vpop.permute.xlu0 %541 }
  0xfc   : > { %617 = vst.msk [vmem:[#allocation2 + $0xb8] sm:$0xff] %vm593_vm2, %v544_v14  ;;  %616 = vst.msk [vmem:[#allocation2 + $0xb0] sm:$0xff] %vm593_vm2, %v542_v15 }
  0xfd   : > { %918 = vrot.lane.b32.xlu1 %v5011_v42, %s4730_s5  ;;  %916 = vrot.lane.b32.xlu0 %v5014_v43, %s4730_s5 }
  0xff   : > { %v548_v18 = vpop.permute.xlu1 %547  ;;  %v546_v21 = vpop.permute.xlu0 %545 }
 0x100   : > { %619 = vst.msk [vmem:[#allocation2 + $0xc8] sm:$0xff] %vm593_vm2, %v548_v18  ;;  %618 = vst.msk [vmem:[#allocation2 + $0xc0] sm:$0xff] %vm593_vm2, %v546_v21  ;;  %v7103_v18 = vld [vmem:[#allocation14_spill] sm:$0xff]  ;;  %v7104_v21 = vld [vmem:[#allocation15_spill] sm:$0xff] }
 0x101   : > { %922 = vrot.lane.b32.xlu1 %v5031_v46, %s4730_s5  ;;  %920 = vrot.lane.b32.xlu0 %v5034_v47, %s4730_s5 }
 0x103   : > { %v552_v29 = vpop.permute.xlu1 %551  ;;  %v550_v30 = vpop.permute.xlu0 %549 }
 0x104   : > { %621 = vst.msk [vmem:[#allocation2 + $0xd8] sm:$0xff] %vm593_vm2, %v552_v29  ;;  %620 = vst.msk [vmem:[#allocation2 + $0xd0] sm:$0xff] %vm593_vm2, %v550_v30 }
 0x105   : > { %926 = vrot.lane.b32.xlu1 %v5051_v50, %s4730_s5  ;;  %924 = vrot.lane.b32.xlu0 %v5054_v51, %s4730_s5 }
 0x107   : > { %v556_v42 = vpop.permute.xlu1 %555  ;;  %v554_v43 = vpop.permute.xlu0 %553 }
 0x108   : > { %623 = vst.msk [vmem:[#allocation2 + $0xe8] sm:$0xff] %vm593_vm2, %v556_v42  ;;  %622 = vst.msk [vmem:[#allocation2 + $0xe0] sm:$0xff] %vm593_vm2, %v554_v43  ;;  %v7105_v42 = vld [vmem:[#allocation16_spill] sm:$0xff]  ;;  %v7106_v43 = vld [vmem:[#allocation17_spill] sm:$0xff] }
 0x109   : > { %930 = vrot.lane.b32.xlu1 %v5071_v54, %s4730_s5  ;;  %928 = vrot.lane.b32.xlu0 %v5074_v55, %s4730_s5  ;;  %v7095_v54 = vld [vmem:[#allocation6_spill] sm:$0xff]  ;;  %v7096_v55 = vld [vmem:[#allocation7_spill] sm:$0xff] }
 0x10b   : > { %v560_v46 = vpop.permute.xlu1 %559  ;;  %v558_v47 = vpop.permute.xlu0 %557 }
 0x10c   : > { %625 = vst.msk [vmem:[#allocation2 + $0xf8] sm:$0xff] %vm593_vm2, %v560_v46  ;;  %624 = vst.msk [vmem:[#allocation2 + $0xf0] sm:$0xff] %vm593_vm2, %v558_v47 }
 0x10d   : > { %934 = vrot.lane.b32.xlu1 %v5091_v58, %s4730_s5  ;;  %932 = vrot.lane.b32.xlu0 %v5094_v59, %s4730_s5  ;;  %v7097_v58 = vld [vmem:[#allocation8_spill] sm:$0xff]  ;;  %v7098_v59 = vld [vmem:[#allocation9_spill] sm:$0xff] }
 0x10f   : > { %v694_v50 = vpop.permute.xlu1 %693  ;;  %v692_v51 = vpop.permute.xlu0 %691 }
 0x110   : > { %789 = vst.msk [vmem:[#allocation2 + $0x8] sm:$0xff] %vm787_vm3, %v694_v50  ;;  %788 = vst.msk [vmem:[#allocation2] sm:$0xff] %vm787_vm3, %v692_v51  ;;  %v7107_v50 = vld [vmem:[#allocation18_spill] sm:$0xff]  ;;  %v7108_v51 = vld [vmem:[#allocation19_spill] sm:$0xff] }
 0x111   : > { %938 = vrot.lane.b32.xlu1 %v7095_v54, %s4730_s5  ;;  %936 = vrot.lane.b32.xlu0 %v7096_v55, %s4730_s5 }
 0x113   : > { %v698_v13 = vpop.permute.xlu1 %697  ;;  %v696_v17 = vpop.permute.xlu0 %695 }
 0x114   : > { %791 = vst.msk [vmem:[#allocation2 + $0x18] sm:$0xff] %vm787_vm3, %v698_v13  ;;  %790 = vst.msk [vmem:[#allocation2 + $0x10] sm:$0xff] %vm787_vm3, %v696_v17  ;;  %v7109_v13 = vld [vmem:[#allocation20_spill] sm:$0xff]  ;;  %v7110_v17 = vld [vmem:[#allocation21_spill] sm:$0xff] }
 0x115   : > { %942 = vrot.lane.b32.xlu1 %v7097_v58, %s4730_s5  ;;  %940 = vrot.lane.b32.xlu0 %v7098_v59, %s4730_s5 }
 0x117   : > { %v702_v0 = vpop.permute.xlu1 %701  ;;  %v700_v2 = vpop.permute.xlu0 %699 }
 0x118   : > { %793 = vst.msk [vmem:[#allocation2 + $0x28] sm:$0xff] %vm787_vm3, %v702_v0  ;;  %792 = vst.msk [vmem:[#allocation2 + $0x20] sm:$0xff] %vm787_vm3, %v700_v2  ;;  %v7111_v0 = vld [vmem:[#allocation22_spill] sm:$0xff]  ;;  %v7112_v2 = vld [vmem:[#allocation23_spill] sm:$0xff] }
 0x119   : > { %946 = vrot.lane.b32.xlu1 %v5473_v60, %s4730_s5  ;;  %944 = vrot.lane.b32.xlu0 %v5476_v63, %s4730_s5 }
 0x11b   : > { %v706_v4 = vpop.permute.xlu1 %705  ;;  %v704_v5 = vpop.permute.xlu0 %703 }
 0x11c   : > { %795 = vst.msk [vmem:[#allocation2 + $0x38] sm:$0xff] %vm787_vm3, %v706_v4  ;;  %794 = vst.msk [vmem:[#allocation2 + $0x30] sm:$0xff] %vm787_vm3, %v704_v5 }
 0x11d   : > { %1079 = vrot.lane.b32.xlu1 %v7099_v6, %s4731_s6  ;;  %1077 = vrot.lane.b32.xlu0 %v7100_v7, %s4731_s6  ;;  %v7113_v6 = vld [vmem:[#allocation24_spill] sm:$0xff]  ;;  %v7114_v7 = vld [vmem:[#allocation25_spill] sm:$0xff] }
 0x11f   : > { %v710_v8 = vpop.permute.xlu1 %709  ;;  %v708_v9 = vpop.permute.xlu0 %707 }
 0x120   : > { %797 = vst.msk [vmem:[#allocation2 + $0x48] sm:$0xff] %vm787_vm3, %v710_v8  ;;  %796 = vst.msk [vmem:[#allocation2 + $0x40] sm:$0xff] %vm787_vm3, %v708_v9 }
 0x121   : > { %1083 = vrot.lane.b32.xlu1 %v7101_v10, %s4731_s6  ;;  %1081 = vrot.lane.b32.xlu0 %v7102_v11, %s4731_s6  ;;  %v7115_v10 = vld [vmem:[#allocation26_spill] sm:$0xff]  ;;  %v7116_v11 = vld [vmem:[#allocation27_spill] sm:$0xff] }
 0x123   : > { %v714_v14 = vpop.permute.xlu1 %713  ;;  %v712_v15 = vpop.permute.xlu0 %711 }
 0x124   : > { %799 = vst.msk [vmem:[#allocation2 + $0x58] sm:$0xff] %vm787_vm3, %v714_v14  ;;  %798 = vst.msk [vmem:[#allocation2 + $0x50] sm:$0xff] %vm787_vm3, %v712_v15 }
 0x125   : > { %1087 = vrot.lane.b32.xlu1 %v7103_v18, %s4731_s6  ;;  %1085 = vrot.lane.b32.xlu0 %v7104_v21, %s4731_s6  ;;  %v7117_v18 = vld [vmem:[#allocation28_spill] sm:$0xff]  ;;  %v7118_v21 = vld [vmem:[#allocation29_spill] sm:$0xff] }
 0x127   : > { %v718_v29 = vpop.permute.xlu1 %717  ;;  %v716_v30 = vpop.permute.xlu0 %715 }
 0x128   : > { %801 = vst.msk [vmem:[#allocation2 + $0x68] sm:$0xff] %vm787_vm3, %v718_v29  ;;  %800 = vst.msk [vmem:[#allocation2 + $0x60] sm:$0xff] %vm787_vm3, %v716_v30 }
 0x129   : > { %1091 = vrot.lane.b32.xlu1 %v7105_v42, %s4731_s6  ;;  %1089 = vrot.lane.b32.xlu0 %v7106_v43, %s4731_s6  ;;  %v7119_v42 = vld [vmem:[#allocation30_spill] sm:$0xff]  ;;  %v7120_v43 = vld [vmem:[#allocation31_spill] sm:$0xff] }
 0x12b   : > { %v722_v46 = vpop.permute.xlu1 %721  ;;  %v720_v47 = vpop.permute.xlu0 %719 }
 0x12c   : > { %803 = vst.msk [vmem:[#allocation2 + $0x78] sm:$0xff] %vm787_vm3, %v722_v46  ;;  %802 = vst.msk [vmem:[#allocation2 + $0x70] sm:$0xff] %vm787_vm3, %v720_v47 }
 0x12d   : > { %1095 = vrot.lane.b32.xlu1 %v7107_v50, %s4731_s6  ;;  %1093 = vrot.lane.b32.xlu0 %v7108_v51, %s4731_s6  ;;  %v7121_v50 = vld [vmem:[#allocation32_spill] sm:$0xff]  ;;  %v7122_v51 = vld [vmem:[#allocation33_spill] sm:$0xff] }
 0x12f   : > { %v726_v54 = vpop.permute.xlu1 %725  ;;  %v724_v55 = vpop.permute.xlu0 %723 }
 0x130   : > { %805 = vst.msk [vmem:[#allocation2 + $0x88] sm:$0xff] %vm787_vm3, %v726_v54  ;;  %804 = vst.msk [vmem:[#allocation2 + $0x80] sm:$0xff] %vm787_vm3, %v724_v55 }
 0x131   : > { %1099 = vrot.lane.b32.xlu1 %v7109_v13, %s4731_s6  ;;  %1097 = vrot.lane.b32.xlu0 %v7110_v17, %s4731_s6  ;;  %v7123_v13 = vld [vmem:[#allocation34_spill] sm:$0xff]  ;;  %v7124_v17 = vld [vmem:[#allocation35_spill] sm:$0xff] }
 0x133   : > { %v730_v58 = vpop.permute.xlu1 %729  ;;  %v728_v59 = vpop.permute.xlu0 %727 }
 0x134   : > { %807 = vst.msk [vmem:[#allocation2 + $0x98] sm:$0xff] %vm787_vm3, %v730_v58  ;;  %806 = vst.msk [vmem:[#allocation2 + $0x90] sm:$0xff] %vm787_vm3, %v728_v59 }
 0x135   : > { %1103 = vrot.lane.b32.xlu1 %v7111_v0, %s4731_s6  ;;  %1101 = vrot.lane.b32.xlu0 %v7112_v2, %s4731_s6 }
 0x137   : > { %v734_v4 = vpop.permute.xlu1 %733  ;;  %v732_v5 = vpop.permute.xlu0 %731 }
 0x138   : > { %809 = vst.msk [vmem:[#allocation2 + $0xa8] sm:$0xff] %vm787_vm3, %v734_v4  ;;  %808 = vst.msk [vmem:[#allocation2 + $0xa0] sm:$0xff] %vm787_vm3, %v732_v5  ;;  %v5575_v4 = vld [vmem:[%s4810_s28 + $0x18a] sm:$0xff]  ;;  %v5578_v5 = vld [vmem:[%s4810_s28 + $0x182] sm:$0xff] }
 0x139   : > { %1107 = vrot.lane.b32.xlu1 %v7113_v6, %s4731_s6  ;;  %1105 = vrot.lane.b32.xlu0 %v7114_v7, %s4731_s6 }
 0x13b   : > { %v738_v8 = vpop.permute.xlu1 %737  ;;  %v736_v9 = vpop.permute.xlu0 %735 }
 0x13c   : > { %811 = vst.msk [vmem:[#allocation2 + $0xb8] sm:$0xff] %vm787_vm3, %v738_v8  ;;  %810 = vst.msk [vmem:[#allocation2 + $0xb0] sm:$0xff] %vm787_vm3, %v736_v9 }
 0x13d   : > { %1111 = vrot.lane.b32.xlu1 %v7115_v10, %s4731_s6  ;;  %1109 = vrot.lane.b32.xlu0 %v7116_v11, %s4731_s6  ;;  %v4021_v11 = vld [vmem:[%s4810_s28 + $0x31] sm:$0xff] }
 0x13f   : > { %v742_v14 = vpop.permute.xlu1 %741  ;;  %v740_v15 = vpop.permute.xlu0 %739 }
 0x140   : > { %813 = vst.msk [vmem:[#allocation2 + $0xc8] sm:$0xff] %vm787_vm3, %v742_v14  ;;  %812 = vst.msk [vmem:[#allocation2 + $0xc0] sm:$0xff] %vm787_vm3, %v740_v15  ;;  %v4024_v14 = vld [vmem:[%s4810_s28 + $0x51] sm:$0xff]  ;;  %v4023_v15 = vld [vmem:[%s4810_s28 + $0x49] sm:$0xff] }
 0x141   : > { %1115 = vrot.lane.b32.xlu1 %v7117_v18, %s4731_s6  ;;  %1113 = vrot.lane.b32.xlu0 %v7118_v21, %s4731_s6 }
 0x143   : > { %v746_v29 = vpop.permute.xlu1 %745  ;;  %v744_v30 = vpop.permute.xlu0 %743 }
 0x144   : > { %815 = vst.msk [vmem:[#allocation2 + $0xd8] sm:$0xff] %vm787_vm3, %v746_v29  ;;  %814 = vst.msk [vmem:[#allocation2 + $0xd0] sm:$0xff] %vm787_vm3, %v744_v30  ;;  %v4026_v29 = vld [vmem:[%s4810_s28 + $0x69] sm:$0xff]  ;;  %v4025_v30 = vld [vmem:[%s4810_s28 + $0x61] sm:$0xff] }
 0x145   : > { %1119 = vrot.lane.b32.xlu1 %v7119_v42, %s4731_s6  ;;  %1117 = vrot.lane.b32.xlu0 %v7120_v43, %s4731_s6 }
 0x147   : > { %v750_v46 = vpop.permute.xlu1 %749  ;;  %v748_v47 = vpop.permute.xlu0 %747 }
 0x148   : > { %817 = vst.msk [vmem:[#allocation2 + $0xe8] sm:$0xff] %vm787_vm3, %v750_v46  ;;  %816 = vst.msk [vmem:[#allocation2 + $0xe0] sm:$0xff] %vm787_vm3, %v748_v47  ;;  %v4028_v46 = vld [vmem:[%s4810_s28 + $0x81] sm:$0xff]  ;;  %v4027_v47 = vld [vmem:[%s4810_s28 + $0x79] sm:$0xff] }
 0x149   : > { %1123 = vrot.lane.b32.xlu1 %v7121_v50, %s4731_s6  ;;  %1121 = vrot.lane.b32.xlu0 %v7122_v51, %s4731_s6 }
 0x14b   : > { %v754_v54 = vpop.permute.xlu1 %753  ;;  %v752_v55 = vpop.permute.xlu0 %751 }
 0x14c   : > { %819 = vst.msk [vmem:[#allocation2 + $0xf8] sm:$0xff] %vm787_vm3, %v754_v54  ;;  %818 = vst.msk [vmem:[#allocation2 + $0xf0] sm:$0xff] %vm787_vm3, %v752_v55  ;;  %v4030_v54 = vld [vmem:[%s4810_s28 + $0x99] sm:$0xff]  ;;  %v4029_v55 = vld [vmem:[%s4810_s28 + $0x91] sm:$0xff] }
 0x14d   : > { %1127 = vrot.lane.b32.xlu1 %v7123_v13, %s4731_s6  ;;  %1125 = vrot.lane.b32.xlu0 %v7124_v17, %s4731_s6 }
 0x14f   : > { %v887_v58 = vpop.permute.xlu1 %886  ;;  %v885_v59 = vpop.permute.xlu0 %884 }
 0x150   : > { %982 = vst.msk [vmem:[#allocation2 + $0x8] sm:$0xff] %vm980_vm4, %v887_v58  ;;  %981 = vst.msk [vmem:[#allocation2] sm:$0xff] %vm980_vm4, %v885_v59  ;;  %v4032_v58 = vld [vmem:[%s4810_s28 + $0xb1] sm:$0xff]  ;;  %v4031_v59 = vld [vmem:[%s4810_s28 + $0xa9] sm:$0xff] }
 0x151   : > { %1131 = vrot.lane.b32.xlu1 %v5257_v1, %s4731_s6  ;;  %1129 = vrot.lane.b32.xlu0 %v5260_v3, %s4731_s6 }
 0x153   : > { %v891_v0 = vpop.permute.xlu1 %890  ;;  %v889_v2 = vpop.permute.xlu0 %888 }
 0x154   : > { %984 = vst.msk [vmem:[#allocation2 + $0x18] sm:$0xff] %vm980_vm4, %v891_v0  ;;  %983 = vst.msk [vmem:[#allocation2 + $0x10] sm:$0xff] %vm980_vm4, %v889_v2 }
 0x155   : > { %1135 = vrot.lane.b32.xlu1 %v5269_v61, %s4731_s6  ;;  %1133 = vrot.lane.b32.xlu0 %v5272_v62, %s4731_s6 }
 0x157   : > { %v895_v1 = vpop.permute.xlu1 %894  ;;  %v893_v6 = vpop.permute.xlu0 %892 }
 0x158   : > { %986 = vst.msk [vmem:[#allocation2 + $0x28] sm:$0xff] %vm980_vm4, %v895_v1  ;;  %985 = vst.msk [vmem:[#allocation2 + $0x20] sm:$0xff] %vm980_vm4, %v893_v6  ;;  %v4034_v1 = vld [vmem:[%s4810_s28 + $0xc9] sm:$0xff]  ;;  %v4033_v6 = vld [vmem:[%s4810_s28 + $0xc1] sm:$0xff] }
 0x159   : > { %1139 = vrot.lane.b32.xlu1 %v5575_v4, %s4731_s6  ;;  %1137 = vrot.lane.b32.xlu0 %v5578_v5, %s4731_s6 }
 0x15b   : > { %v899_v3 = vpop.permute.xlu1 %898  ;;  %v897_v61 = vpop.permute.xlu0 %896 }
 0x15c   : > { %988 = vst.msk [vmem:[#allocation2 + $0x38] sm:$0xff] %vm980_vm4, %v899_v3  ;;  %987 = vst.msk [vmem:[#allocation2 + $0x30] sm:$0xff] %vm980_vm4, %v897_v61 }
 0x15d   : > { %1273 = vrot.lane.b32.xlu1 %v4890_v19, %s4732_s7  ;;  %1271 = vrot.lane.b32.xlu0 %v4893_v20, %s4732_s7 }
 0x15f   : > { %v903_v62 = vpop.permute.xlu1 %902  ;;  %v901_v7 = vpop.permute.xlu0 %900 }
 0x160   : > { %990 = vst.msk [vmem:[#allocation2 + $0x48] sm:$0xff] %vm980_vm4, %v903_v62  ;;  %989 = vst.msk [vmem:[#allocation2 + $0x40] sm:$0xff] %vm980_vm4, %v901_v7  ;;  %v4036_v62 = vld [vmem:[%s4810_s28 + $0xe1] sm:$0xff]  ;;  %v4035_v7 = vld [vmem:[%s4810_s28 + $0xd9] sm:$0xff] }
 0x161   : > { %1277 = vrot.lane.b32.xlu1 %v4907_v22, %s4732_s7  ;;  %1275 = vrot.lane.b32.xlu0 %v4912_v23, %s4732_s7 }
 0x163   : > { %v907_v8 = vpop.permute.xlu1 %906  ;;  %v905_v9 = vpop.permute.xlu0 %904 }
 0x164   : > { %992 = vst.msk [vmem:[#allocation2 + $0x58] sm:$0xff] %vm980_vm4, %v907_v8  ;;  %991 = vst.msk [vmem:[#allocation2 + $0x50] sm:$0xff] %vm980_vm4, %v905_v9 }
 0x165   : > { %1281 = vrot.lane.b32.xlu1 %v4915_v24, %s4732_s7  ;;  %1279 = vrot.lane.b32.xlu0 %v4918_v25, %s4732_s7 }
 0x167   : > { %v911_v19 = vpop.permute.xlu1 %910  ;;  %v909_v20 = vpop.permute.xlu0 %908 }
 0x168   : > { %994 = vst.msk [vmem:[#allocation2 + $0x68] sm:$0xff] %vm980_vm4, %v911_v19  ;;  %993 = vst.msk [vmem:[#allocation2 + $0x60] sm:$0xff] %vm980_vm4, %v909_v20  ;;  %v4038_v19 = vld [vmem:[%s4810_s28 + $0xf9] sm:$0xff]  ;;  %v4037_v20 = vld [vmem:[%s4810_s28 + $0xf1] sm:$0xff] }
 0x169   : > { %1285 = vrot.lane.b32.xlu1 %v4927_v26, %s4732_s7  ;;  %1283 = vrot.lane.b32.xlu0 %v4930_v27, %s4732_s7 }
 0x16b   : > { %v915_v22 = vpop.permute.xlu1 %914  ;;  %v913_v23 = vpop.permute.xlu0 %912 }
 0x16c   : > { %996 = vst.msk [vmem:[#allocation2 + $0x78] sm:$0xff] %vm980_vm4, %v915_v22  ;;  %995 = vst.msk [vmem:[#allocation2 + $0x70] sm:$0xff] %vm980_vm4, %v913_v23 }
 0x16d   : > { %1289 = vrot.lane.b32.xlu1 %v4933_v28, %s4732_s7  ;;  %1287 = vrot.lane.b32.xlu0 %v4948_v31, %s4732_s7 }
 0x16f   : > { %v919_v24 = vpop.permute.xlu1 %918  ;;  %v917_v25 = vpop.permute.xlu0 %916 }
 0x170   : > { %998 = vst.msk [vmem:[#allocation2 + $0x88] sm:$0xff] %vm980_vm4, %v919_v24  ;;  %997 = vst.msk [vmem:[#allocation2 + $0x80] sm:$0xff] %vm980_vm4, %v917_v25  ;;  %v4040_v24 = vld [vmem:[%s4810_s28 + $0x111] sm:$0xff]  ;;  %v4039_v25 = vld [vmem:[%s4810_s28 + $0x109] sm:$0xff] }
 0x171   : > { %1293 = vrot.lane.b32.xlu1 %v4951_v32, %s4732_s7  ;;  %1291 = vrot.lane.b32.xlu0 %v4954_v33, %s4732_s7 }
 0x173   : > { %v923_v26 = vpop.permute.xlu1 %922  ;;  %v921_v27 = vpop.permute.xlu0 %920 }
 0x174   : > { %1000 = vst.msk [vmem:[#allocation2 + $0x98] sm:$0xff] %vm980_vm4, %v923_v26  ;;  %999 = vst.msk [vmem:[#allocation2 + $0x90] sm:$0xff] %vm980_vm4, %v921_v27 }
 0x175   : > { %1297 = vrot.lane.b32.xlu1 %v4967_v34, %s4732_s7  ;;  %1295 = vrot.lane.b32.xlu0 %v4970_v35, %s4732_s7 }
 0x177   : > { %v927_v28 = vpop.permute.xlu1 %926  ;;  %v925_v31 = vpop.permute.xlu0 %924 }
 0x178   : > { %1002 = vst.msk [vmem:[#allocation2 + $0xa8] sm:$0xff] %vm980_vm4, %v927_v28  ;;  %1001 = vst.msk [vmem:[#allocation2 + $0xa0] sm:$0xff] %vm980_vm4, %v925_v31  ;;  %v4042_v28 = vld [vmem:[%s4810_s28 + $0x129] sm:$0xff]  ;;  %v4041_v31 = vld [vmem:[%s4810_s28 + $0x121] sm:$0xff] }
 0x179   : > { %1301 = vrot.lane.b32.xlu1 %v4977_v36, %s4732_s7  ;;  %1299 = vrot.lane.b32.xlu0 %v4980_v37, %s4732_s7 }
 0x17b   : > { %v931_v32 = vpop.permute.xlu1 %930  ;;  %v929_v33 = vpop.permute.xlu0 %928 }
 0x17c   : > { %1004 = vst.msk [vmem:[#allocation2 + $0xb8] sm:$0xff] %vm980_vm4, %v931_v32  ;;  %1003 = vst.msk [vmem:[#allocation2 + $0xb0] sm:$0xff] %vm980_vm4, %v929_v33 }
 0x17d   : > { %1305 = vrot.lane.b32.xlu1 %v4983_v38, %s4732_s7  ;;  %1303 = vrot.lane.b32.xlu0 %v4992_v39, %s4732_s7 }
 0x17f   : > { %v935_v34 = vpop.permute.xlu1 %934  ;;  %v933_v35 = vpop.permute.xlu0 %932 }
 0x180   : > { %1006 = vst.msk [vmem:[#allocation2 + $0xc8] sm:$0xff] %vm980_vm4, %v935_v34  ;;  %1005 = vst.msk [vmem:[#allocation2 + $0xc0] sm:$0xff] %vm980_vm4, %v933_v35  ;;  %v4044_v34 = vld [vmem:[%s4810_s28 + $0x141] sm:$0xff]  ;;  %v4043_v35 = vld [vmem:[%s4810_s28 + $0x139] sm:$0xff] }
 0x181   : > { %1309 = vrot.lane.b32.xlu1 %v4995_v40, %s4732_s7  ;;  %1307 = vrot.lane.b32.xlu0 %v4998_v41, %s4732_s7 }
 0x183   : > { %v939_v36 = vpop.permute.xlu1 %938  ;;  %v937_v37 = vpop.permute.xlu0 %936 }
 0x184   : > { %1008 = vst.msk [vmem:[#allocation2 + $0xd8] sm:$0xff] %vm980_vm4, %v939_v36  ;;  %1007 = vst.msk [vmem:[#allocation2 + $0xd0] sm:$0xff] %vm980_vm4, %v937_v37 }
 0x185   : > { %1313 = vrot.lane.b32.xlu1 %v5017_v44, %s4732_s7  ;;  %1311 = vrot.lane.b32.xlu0 %v5020_v45, %s4732_s7 }
 0x187   : > { %v943_v38 = vpop.permute.xlu1 %942  ;;  %v941_v39 = vpop.permute.xlu0 %940 }
 0x188   : > { %1010 = vst.msk [vmem:[#allocation2 + $0xe8] sm:$0xff] %vm980_vm4, %v943_v38  ;;  %1009 = vst.msk [vmem:[#allocation2 + $0xe0] sm:$0xff] %vm980_vm4, %v941_v39  ;;  %v4046_v38 = vld [vmem:[%s4810_s28 + $0x159] sm:$0xff]  ;;  %v4045_v39 = vld [vmem:[%s4810_s28 + $0x151] sm:$0xff] }
 0x189   : > { %1317 = vrot.lane.b32.xlu1 %v5037_v48, %s4732_s7  ;;  %1315 = vrot.lane.b32.xlu0 %v5040_v49, %s4732_s7 }
 0x18b   : > { %v947_v40 = vpop.permute.xlu1 %946  ;;  %v945_v41 = vpop.permute.xlu0 %944 }
 0x18c   : > { %1012 = vst.msk [vmem:[#allocation2 + $0xf8] sm:$0xff] %vm980_vm4, %v947_v40  ;;  %1011 = vst.msk [vmem:[#allocation2 + $0xf0] sm:$0xff] %vm980_vm4, %v945_v41 }
 0x18d   : > { %1321 = vrot.lane.b32.xlu1 %v5057_v52, %s4732_s7  ;;  %1319 = vrot.lane.b32.xlu0 %v5060_v53, %s4732_s7  ;;  %v4020_v52 = vld [vmem:[%s4810_s28 + $0x1a0] sm:$0xff]  ;;  %v4019_v53 = vld [vmem:[%s4810_s28 + $0x198] sm:$0xff] }
 0x18f   : > { %v1080_v44 = vpop.permute.xlu1 %1079  ;;  %v1078_v45 = vpop.permute.xlu0 %1077 }
 0x190   : > { %1175 = vst.msk [vmem:[#allocation2 + $0x8] sm:$0xff] %vm1173_vm5, %v1080_v44  ;;  %1174 = vst.msk [vmem:[#allocation2] sm:$0xff] %vm1173_vm5, %v1078_v45  ;;  %v4048_v44 = vld [vmem:[%s4810_s28 + $0x171] sm:$0xff]  ;;  %v4047_v45 = vld [vmem:[%s4810_s28 + $0x169] sm:$0xff] }
 0x191   : > { %1325 = vrot.lane.b32.xlu1 %v5077_v56, %s4732_s7  ;;  %1323 = vrot.lane.b32.xlu0 %v5080_v57, %s4732_s7  ;;  %v4022_v57 = vld [vmem:[%s4810_s28 + $0x39] sm:$0xff] }
 0x193   : > { %v1084_v48 = vpop.permute.xlu1 %1083  ;;  %v1082_v49 = vpop.permute.xlu0 %1081 }
 0x194   : > { %1177 = vst.msk [vmem:[#allocation2 + $0x18] sm:$0xff] %vm1173_vm5, %v1084_v48  ;;  %1176 = vst.msk [vmem:[#allocation2 + $0x10] sm:$0xff] %vm1173_vm5, %v1082_v49 }
 0x195   : > { %1329 = vrot.lane.b32.xlu1 %v5371_v12, %s4732_s7  ;;  %1327 = vrot.lane.b32.xlu0 %v5374_v16, %s4732_s7 }
 0x197   : > { %v1088_v56 = vpop.permute.xlu1 %1087  ;;  %v1086_v10 = vpop.permute.xlu0 %1085 }
 0x198   : > { %1179 = vst.msk [vmem:[#allocation2 + $0x28] sm:$0xff] %vm1173_vm5, %v1088_v56  ;;  %1178 = vst.msk [vmem:[#allocation2 + $0x20] sm:$0xff] %vm1173_vm5, %v1086_v10  ;;  %v4052_v56 = vld [vmem:[%s4810_s28 + $0x1a1] sm:$0xff]  ;;  %v4051_v10 = vld [vmem:[%s4810_s28 + $0x199] sm:$0xff] }
 0x199   : > { %1333 = vrot.lane.b32.xlu1 %v4020_v52, %s4732_s7  ;;  %1331 = vrot.lane.b32.xlu0 %v4019_v53, %s4732_s7 }
 0x19b   : > { %v1092_v12 = vpop.permute.xlu1 %1091  ;;  %v1090_v16 = vpop.permute.xlu0 %1089 }
 0x19c   : > { %1181 = vst.msk [vmem:[#allocation2 + $0x38] sm:$0xff] %vm1173_vm5, %v1092_v12  ;;  %1180 = vst.msk [vmem:[#allocation2 + $0x30] sm:$0xff] %vm1173_vm5, %v1090_v16  ;;  %v4054_v12 = vld [vmem:[%s4810_s28 + $0x3a] sm:$0xff]  ;;  %v4053_v16 = vld [vmem:[%s4810_s28 + $0x32] sm:$0xff] }
 0x19d   : > { %1466 = vrot.lane.b32.xlu1 %v4022_v57, %s4733_s8  ;;  %1464 = vrot.lane.b32.xlu0 %v4021_v11, %s4733_s8 }
 0x19f   : > { %v1096_v18 = vpop.permute.xlu1 %1095  ;;  %v1094_v21 = vpop.permute.xlu0 %1093 }
 0x1a0   : > { %1183 = vst.msk [vmem:[#allocation2 + $0x48] sm:$0xff] %vm1173_vm5, %v1096_v18  ;;  %1182 = vst.msk [vmem:[#allocation2 + $0x40] sm:$0xff] %vm1173_vm5, %v1094_v21 }
 0x1a1   : > { %1470 = vrot.lane.b32.xlu1 %v4024_v14, %s4733_s8  ;;  %1468 = vrot.lane.b32.xlu0 %v4023_v15, %s4733_s8  ;;  %v4056_v14 = vld [vmem:[%s4810_s28 + $0x52] sm:$0xff]  ;;  %v4055_v15 = vld [vmem:[%s4810_s28 + $0x4a] sm:$0xff] }
 0x1a3   : > { %v1100_v42 = vpop.permute.xlu1 %1099  ;;  %v1098_v43 = vpop.permute.xlu0 %1097 }
 0x1a4   : > { %1185 = vst.msk [vmem:[#allocation2 + $0x58] sm:$0xff] %vm1173_vm5, %v1100_v42  ;;  %1184 = vst.msk [vmem:[#allocation2 + $0x50] sm:$0xff] %vm1173_vm5, %v1098_v43 }
 0x1a5   : > { %1474 = vrot.lane.b32.xlu1 %v4026_v29, %s4733_s8  ;;  %1472 = vrot.lane.b32.xlu0 %v4025_v30, %s4733_s8  ;;  %v4058_v29 = vld [vmem:[%s4810_s28 + $0x6a] sm:$0xff]  ;;  %v4057_v30 = vld [vmem:[%s4810_s28 + $0x62] sm:$0xff] }
 0x1a7   : > { %v1104_v50 = vpop.permute.xlu1 %1103  ;;  %v1102_v51 = vpop.permute.xlu0 %1101 }
 0x1a8   : > { %1187 = vst.msk [vmem:[#allocation2 + $0x68] sm:$0xff] %vm1173_vm5, %v1104_v50  ;;  %1186 = vst.msk [vmem:[#allocation2 + $0x60] sm:$0xff] %vm1173_vm5, %v1102_v51 }
 0x1a9   : > { %1478 = vrot.lane.b32.xlu1 %v4028_v46, %s4733_s8  ;;  %1476 = vrot.lane.b32.xlu0 %v4027_v47, %s4733_s8  ;;  %v4060_v46 = vld [vmem:[%s4810_s28 + $0x82] sm:$0xff]  ;;  %v4059_v47 = vld [vmem:[%s4810_s28 + $0x7a] sm:$0xff] }
 0x1ab   : > { %v1108_v13 = vpop.permute.xlu1 %1107  ;;  %v1106_v17 = vpop.permute.xlu0 %1105 }
 0x1ac   : > { %1189 = vst.msk [vmem:[#allocation2 + $0x78] sm:$0xff] %vm1173_vm5, %v1108_v13  ;;  %1188 = vst.msk [vmem:[#allocation2 + $0x70] sm:$0xff] %vm1173_vm5, %v1106_v17 }
 0x1ad   : > { %1482 = vrot.lane.b32.xlu1 %v4030_v54, %s4733_s8  ;;  %1480 = vrot.lane.b32.xlu0 %v4029_v55, %s4733_s8  ;;  %v4062_v54 = vld [vmem:[%s4810_s28 + $0x9a] sm:$0xff]  ;;  %v4061_v55 = vld [vmem:[%s4810_s28 + $0x92] sm:$0xff] }
 0x1af   : > { %v1112_v0 = vpop.permute.xlu1 %1111  ;;  %v1110_v2 = vpop.permute.xlu0 %1109 }
 0x1b0   : > { %1191 = vst.msk [vmem:[#allocation2 + $0x88] sm:$0xff] %vm1173_vm5, %v1112_v0  ;;  %1190 = vst.msk [vmem:[#allocation2 + $0x80] sm:$0xff] %vm1173_vm5, %v1110_v2 }
 0x1b1   : > { %1486 = vrot.lane.b32.xlu1 %v4032_v58, %s4733_s8  ;;  %1484 = vrot.lane.b32.xlu0 %v4031_v59, %s4733_s8  ;;  %v4064_v58 = vld [vmem:[%s4810_s28 + $0xb2] sm:$0xff]  ;;  %v4063_v59 = vld [vmem:[%s4810_s28 + $0xaa] sm:$0xff] }
 0x1b3   : > { %v1116_v3 = vpop.permute.xlu1 %1115  ;;  %v1114_v61 = vpop.permute.xlu0 %1113 }
 0x1b4   : > { %1193 = vst.msk [vmem:[#allocation2 + $0x98] sm:$0xff] %vm1173_vm5, %v1116_v3  ;;  %1192 = vst.msk [vmem:[#allocation2 + $0x90] sm:$0xff] %vm1173_vm5, %v1114_v61 }
 0x1b5   : > { %1490 = vrot.lane.b32.xlu1 %v4034_v1, %s4733_s8  ;;  %1488 = vrot.lane.b32.xlu0 %v4033_v6, %s4733_s8  ;;  %v4066_v1 = vld [vmem:[%s4810_s28 + $0xca] sm:$0xff]  ;;  %v4065_v6 = vld [vmem:[%s4810_s28 + $0xc2] sm:$0xff] }
 0x1b7   : > { %v1120_v8 = vpop.permute.xlu1 %1119  ;;  %v1118_v9 = vpop.permute.xlu0 %1117 }
 0x1b8   : > { %1195 = vst.msk [vmem:[#allocation2 + $0xa8] sm:$0xff] %vm1173_vm5, %v1120_v8  ;;  %1194 = vst.msk [vmem:[#allocation2 + $0xa0] sm:$0xff] %vm1173_vm5, %v1118_v9 }
 0x1b9   : > { %1494 = vrot.lane.b32.xlu1 %v4036_v62, %s4733_s8  ;;  %1492 = vrot.lane.b32.xlu0 %v4035_v7, %s4733_s8  ;;  %v4068_v62 = vld [vmem:[%s4810_s28 + $0xe2] sm:$0xff]  ;;  %v4067_v7 = vld [vmem:[%s4810_s28 + $0xda] sm:$0xff] }
 0x1bb   : > { %v1124_v22 = vpop.permute.xlu1 %1123  ;;  %v1122_v23 = vpop.permute.xlu0 %1121 }
 0x1bc   : > { %1197 = vst.msk [vmem:[#allocation2 + $0xb8] sm:$0xff] %vm1173_vm5, %v1124_v22  ;;  %1196 = vst.msk [vmem:[#allocation2 + $0xb0] sm:$0xff] %vm1173_vm5, %v1122_v23 }
 0x1bd   : > { %1498 = vrot.lane.b32.xlu1 %v4038_v19, %s4733_s8  ;;  %1496 = vrot.lane.b32.xlu0 %v4037_v20, %s4733_s8  ;;  %v4070_v19 = vld [vmem:[%s4810_s28 + $0xfa] sm:$0xff]  ;;  %v4069_v20 = vld [vmem:[%s4810_s28 + $0xf2] sm:$0xff] }
 0x1bf   : > { %v1128_v26 = vpop.permute.xlu1 %1127  ;;  %v1126_v27 = vpop.permute.xlu0 %1125 }
 0x1c0   : > { %1199 = vst.msk [vmem:[#allocation2 + $0xc8] sm:$0xff] %vm1173_vm5, %v1128_v26  ;;  %1198 = vst.msk [vmem:[#allocation2 + $0xc0] sm:$0xff] %vm1173_vm5, %v1126_v27 }
 0x1c1   : > { %1502 = vrot.lane.b32.xlu1 %v4040_v24, %s4733_s8  ;;  %1500 = vrot.lane.b32.xlu0 %v4039_v25, %s4733_s8  ;;  %v4072_v24 = vld [vmem:[%s4810_s28 + $0x112] sm:$0xff]  ;;  %v4071_v25 = vld [vmem:[%s4810_s28 + $0x10a] sm:$0xff] }
 0x1c3   : > { %v1132_v32 = vpop.permute.xlu1 %1131  ;;  %v1130_v33 = vpop.permute.xlu0 %1129 }
 0x1c4   : > { %1201 = vst.msk [vmem:[#allocation2 + $0xd8] sm:$0xff] %vm1173_vm5, %v1132_v32  ;;  %1200 = vst.msk [vmem:[#allocation2 + $0xd0] sm:$0xff] %vm1173_vm5, %v1130_v33 }
 0x1c5   : > { %1506 = vrot.lane.b32.xlu1 %v4042_v28, %s4733_s8  ;;  %1504 = vrot.lane.b32.xlu0 %v4041_v31, %s4733_s8  ;;  %v4074_v28 = vld [vmem:[%s4810_s28 + $0x12a] sm:$0xff]  ;;  %v4073_v31 = vld [vmem:[%s4810_s28 + $0x122] sm:$0xff] }
 0x1c7   : > { %v1136_v36 = vpop.permute.xlu1 %1135  ;;  %v1134_v37 = vpop.permute.xlu0 %1133 }
 0x1c8   : > { %1203 = vst.msk [vmem:[#allocation2 + $0xe8] sm:$0xff] %vm1173_vm5, %v1136_v36  ;;  %1202 = vst.msk [vmem:[#allocation2 + $0xe0] sm:$0xff] %vm1173_vm5, %v1134_v37 }
 0x1c9   : > { %1510 = vrot.lane.b32.xlu1 %v4044_v34, %s4733_s8  ;;  %1508 = vrot.lane.b32.xlu0 %v4043_v35, %s4733_s8  ;;  %v4076_v34 = vld [vmem:[%s4810_s28 + $0x142] sm:$0xff]  ;;  %v4075_v35 = vld [vmem:[%s4810_s28 + $0x13a] sm:$0xff] }
 0x1cb   : > { %v1140_v40 = vpop.permute.xlu1 %1139  ;;  %v1138_v41 = vpop.permute.xlu0 %1137 }
 0x1cc   : > { %1205 = vst.msk [vmem:[#allocation2 + $0xf8] sm:$0xff] %vm1173_vm5, %v1140_v40  ;;  %1204 = vst.msk [vmem:[#allocation2 + $0xf0] sm:$0xff] %vm1173_vm5, %v1138_v41 }
 0x1cd   : > { %1514 = vrot.lane.b32.xlu1 %v4046_v38, %s4733_s8  ;;  %1512 = vrot.lane.b32.xlu0 %v4045_v39, %s4733_s8  ;;  %v4078_v38 = vld [vmem:[%s4810_s28 + $0x15a] sm:$0xff]  ;;  %v4077_v39 = vld [vmem:[%s4810_s28 + $0x152] sm:$0xff] }
 0x1cf   : > { %v1274_v48 = vpop.permute.xlu1 %1273  ;;  %v1272_v49 = vpop.permute.xlu0 %1271 }
 0x1d0   : > { %1369 = vst.msk [vmem:[#allocation2 + $0x8] sm:$0xff] %vm1367_vm6, %v1274_v48  ;;  %1368 = vst.msk [vmem:[#allocation2] sm:$0xff] %vm1367_vm6, %v1272_v49  ;;  %v4079_v48 = vld [vmem:[%s4810_s28 + $0x16a] sm:$0xff] }
 0x1d1   : > { %1518 = vrot.lane.b32.xlu1 %v4048_v44, %s4733_s8  ;;  %1516 = vrot.lane.b32.xlu0 %v4047_v45, %s4733_s8  ;;  %v4086_v44 = vld [vmem:[%s4810_s28 + $0x1b8] sm:$0xff]  ;;  %v4085_v49 = vld [vmem:[%s4810_s28 + $0x1b0] sm:$0xff] }
 0x1d2   : > { %v4080_v45 = vld [vmem:[%s4810_s28 + $0x172] sm:$0xff]  ;;  %1820 = vst.msk [vmem:[#allocation2 + $0x108] sm:$0xff] %vm207_vm0, %v4086_v44  ;;  %1819 = vst.msk [vmem:[#allocation2 + $0x100] sm:$0xff] %vm207_vm0, %v4085_v49  ;;  %v6039_v44 = vld [vmem:[%s4810_s28 + $0x2c0] sm:$0xff] }
 0x1d3   : > { %v1278_v52 = vpop.permute.xlu1 %1277  ;;  %v1276_v53 = vpop.permute.xlu0 %1275  ;;  %1842 = vst.msk [vmem:[#allocation2 + $0x1b8] sm:$0xff] %vm207_vm0, %v6039_v44  ;;  %v6046_v49 = vld [vmem:[%s4810_s28 + $0x2b8] sm:$0xff] }
 0x1d4   : > { %1371 = vst.msk [vmem:[#allocation2 + $0x18] sm:$0xff] %vm1367_vm6, %v1278_v52  ;;  %1370 = vst.msk [vmem:[#allocation2 + $0x10] sm:$0xff] %vm1367_vm6, %v1276_v53 }
 0x1d5   : > { %1522 = vrot.lane.b32.xlu1 %v5473_v60, %s4733_s8  ;;  %1520 = vrot.lane.b32.xlu0 %v5476_v63, %s4733_s8  ;;  %1841 = vst.msk [vmem:[#allocation2 + $0x1b0] sm:$0xff] %vm207_vm0, %v6046_v49 }
 0x1d7   : > { %v1282_v57 = vpop.permute.xlu1 %1281  ;;  %v1280_v11 = vpop.permute.xlu0 %1279 }
 0x1d8   : > { %1373 = vst.msk [vmem:[#allocation2 + $0x28] sm:$0xff] %vm1367_vm6, %v1282_v57  ;;  %1372 = vst.msk [vmem:[#allocation2 + $0x20] sm:$0xff] %vm1367_vm6, %v1280_v11 }
 0x1d9   : > { %1526 = vrot.lane.b32.xlu1 %v4052_v56, %s4733_s8  ;;  %1524 = vrot.lane.b32.xlu0 %v4051_v10, %s4733_s8  ;;  %v5867_v56 = vld [vmem:[%s4810_s28 + $0x1d0] sm:$0xff]  ;;  %v5872_v10 = vld [vmem:[%s4810_s28 + $0x1c8] sm:$0xff] }
 0x1da   : > { %1822 = vst.msk [vmem:[#allocation2 + $0x118] sm:$0xff] %vm207_vm0, %v5867_v56  ;;  %1821 = vst.msk [vmem:[#allocation2 + $0x110] sm:$0xff] %vm207_vm0, %v5872_v10 }
 0x1db   : > { %v1286_v60 = vpop.permute.xlu1 %1285  ;;  %v1284_v63 = vpop.permute.xlu0 %1283 }
 0x1dc   : > { %1375 = vst.msk [vmem:[#allocation2 + $0x38] sm:$0xff] %vm1367_vm6, %v1286_v60  ;;  %1374 = vst.msk [vmem:[#allocation2 + $0x30] sm:$0xff] %vm1367_vm6, %v1284_v63  ;;  %v4083_v60 = vld [vmem:[%s4810_s28 + $0x19a] sm:$0xff] }
 0x1dd   : > { %1659 = vrot.lane.b32.xlu1 %v4054_v12, %s4734_s9  ;;  %1657 = vrot.lane.b32.xlu0 %v4053_v16, %s4734_s9  ;;  %v5883_v12 = vld [vmem:[%s4810_s28 + $0x1e8] sm:$0xff]  ;;  %v5890_v63 = vld [vmem:[%s4810_s28 + $0x1e0] sm:$0xff] }
 0x1de   : > { %v4084_v16 = vld [vmem:[%s4810_s28 + $0x1a2] sm:$0xff]  ;;  %1824 = vst.msk [vmem:[#allocation2 + $0x128] sm:$0xff] %vm207_vm0, %v5883_v12  ;;  %1823 = vst.msk [vmem:[#allocation2 + $0x120] sm:$0xff] %vm207_vm0, %v5890_v63 }
 0x1df   : > { %v1290_v18 = vpop.permute.xlu1 %1289  ;;  %v1288_v21 = vpop.permute.xlu0 %1287 }
 0x1e0   : > { %1377 = vst.msk [vmem:[#allocation2 + $0x48] sm:$0xff] %vm1367_vm6, %v1290_v18  ;;  %1376 = vst.msk [vmem:[#allocation2 + $0x40] sm:$0xff] %vm1367_vm6, %v1288_v21  ;;  %v4117_v18 = vld [vmem:[%s4810_s28 + $0x1b1] sm:$0xff] }
 0x1e1   : > { %1663 = vrot.lane.b32.xlu1 %v4056_v14, %s4734_s9  ;;  %1661 = vrot.lane.b32.xlu0 %v4055_v15, %s4734_s9  ;;  %v5906_v21 = vld [vmem:[%s4810_s28 + $0x1f8] sm:$0xff] }
 0x1e2   : > { %1825 = vst.msk [vmem:[#allocation2 + $0x130] sm:$0xff] %vm207_vm0, %v5906_v21 }
 0x1e3   : > { %v1294_v42 = vpop.permute.xlu1 %1293  ;;  %v1292_v43 = vpop.permute.xlu0 %1291 }
 0x1e4   : > { %1379 = vst.msk [vmem:[#allocation2 + $0x58] sm:$0xff] %vm1367_vm6, %v1294_v42  ;;  %1378 = vst.msk [vmem:[#allocation2 + $0x50] sm:$0xff] %vm1367_vm6, %v1292_v43  ;;  %v5915_v42 = vld [vmem:[%s4810_s28 + $0x218] sm:$0xff] }
 0x1e5   : > { %1667 = vrot.lane.b32.xlu1 %v4058_v29, %s4734_s9  ;;  %1665 = vrot.lane.b32.xlu0 %v4057_v30, %s4734_s9  ;;  %v5918_v43 = vld [vmem:[%s4810_s28 + $0x1d1] sm:$0xff]  ;;  %1828 = vst.msk [vmem:[#allocation2 + $0x148] sm:$0xff] %vm207_vm0, %v5915_v42 }
 0x1e7   : > { %v1298_v50 = vpop.permute.xlu1 %1297  ;;  %v1296_v51 = vpop.permute.xlu0 %1295 }
 0x1e8   : > { %1381 = vst.msk [vmem:[#allocation2 + $0x68] sm:$0xff] %vm1367_vm6, %v1298_v50  ;;  %1380 = vst.msk [vmem:[#allocation2 + $0x60] sm:$0xff] %vm1367_vm6, %v1296_v51 }
 0x1e9   : > { %1671 = vrot.lane.b32.xlu1 %v4060_v46, %s4734_s9  ;;  %1669 = vrot.lane.b32.xlu0 %v4059_v47, %s4734_s9  ;;  %v5921_v46 = vld [vmem:[%s4810_s28 + $0x1c9] sm:$0xff] }
 0x1ea   : > { %v5926_v47 = vld [vmem:[%s4810_s28 + $0x210] sm:$0xff] }
 0x1eb   : > { %v1302_v13 = vpop.permute.xlu1 %1301  ;;  %v1300_v17 = vpop.permute.xlu0 %1299  ;;  %1827 = vst.msk [vmem:[#allocation2 + $0x140] sm:$0xff] %vm207_vm0, %v5926_v47 }
 0x1ec   : > { %1383 = vst.msk [vmem:[#allocation2 + $0x78] sm:$0xff] %vm1367_vm6, %v1302_v13  ;;  %1382 = vst.msk [vmem:[#allocation2 + $0x70] sm:$0xff] %vm1367_vm6, %v1300_v17  ;;  %v5943_v13 = vld [vmem:[%s4810_s28 + $0x1e1] sm:$0xff] }
 0x1ed   : > { %1675 = vrot.lane.b32.xlu1 %v4062_v54, %s4734_s9  ;;  %1673 = vrot.lane.b32.xlu0 %v4061_v55, %s4734_s9  ;;  %v5937_v54 = vld [vmem:[%s4810_s28 + $0x230] sm:$0xff]  ;;  %v5948_v17 = vld [vmem:[%s4810_s28 + $0x228] sm:$0xff] }
 0x1ee   : > { %v5940_v55 = vld [vmem:[%s4810_s28 + $0x1e9] sm:$0xff]  ;;  %1830 = vst.msk [vmem:[#allocation2 + $0x158] sm:$0xff] %vm207_vm0, %v5937_v54  ;;  %1829 = vst.msk [vmem:[#allocation2 + $0x150] sm:$0xff] %vm207_vm0, %v5948_v17 }
 0x1ef   : > { %v1306_v0 = vpop.permute.xlu1 %1305  ;;  %v1304_v2 = vpop.permute.xlu0 %1303 }
 0x1f0   : > { %1385 = vst.msk [vmem:[#allocation2 + $0x88] sm:$0xff] %vm1367_vm6, %v1306_v0  ;;  %1384 = vst.msk [vmem:[#allocation2 + $0x80] sm:$0xff] %vm1367_vm6, %v1304_v2  ;;  %v5959_v0 = vld [vmem:[%s4810_s28 + $0x248] sm:$0xff] }
 0x1f1   : > { %1679 = vrot.lane.b32.xlu1 %v4064_v58, %s4734_s9  ;;  %1677 = vrot.lane.b32.xlu0 %v4063_v59, %s4734_s9  ;;  %v4124_v2 = vld [vmem:[%s4810_s28 + $0x201] sm:$0xff]  ;;  %1832 = vst.msk [vmem:[#allocation2 + $0x168] sm:$0xff] %vm207_vm0, %v5959_v0 }
 0x1f3   : > { %v1310_v3 = vpop.permute.xlu1 %1309  ;;  %v1308_v61 = vpop.permute.xlu0 %1307 }
 0x1f4   : > { %1387 = vst.msk [vmem:[#allocation2 + $0x98] sm:$0xff] %vm1367_vm6, %v1310_v3  ;;  %1386 = vst.msk [vmem:[#allocation2 + $0x90] sm:$0xff] %vm1367_vm6, %v1308_v61 }
 0x1f5   : > { %1683 = vrot.lane.b32.xlu1 %v4066_v1, %s4734_s9  ;;  %1681 = vrot.lane.b32.xlu0 %v4065_v6, %s4734_s9  ;;  %v4123_v1 = vld [vmem:[%s4810_s28 + $0x1f9] sm:$0xff] }
 0x1f6   : > { %v5966_v6 = vld [vmem:[%s4810_s28 + $0x240] sm:$0xff] }
 0x1f7   : > { %v1314_v8 = vpop.permute.xlu1 %1313  ;;  %v1312_v9 = vpop.permute.xlu0 %1311  ;;  %1831 = vst.msk [vmem:[#allocation2 + $0x160] sm:$0xff] %vm207_vm0, %v5966_v6 }
 0x1f8   : > { %1389 = vst.msk [vmem:[#allocation2 + $0xa8] sm:$0xff] %vm1367_vm6, %v1314_v8  ;;  %1388 = vst.msk [vmem:[#allocation2 + $0xa0] sm:$0xff] %vm1367_vm6, %v1312_v9  ;;  %v4125_v8 = vld [vmem:[%s4810_s28 + $0x211] sm:$0xff] }
 0x1f9   : > { %1687 = vrot.lane.b32.xlu1 %v4068_v62, %s4734_s9  ;;  %1685 = vrot.lane.b32.xlu0 %v4067_v7, %s4734_s9  ;;  %v5975_v62 = vld [vmem:[%s4810_s28 + $0x260] sm:$0xff]  ;;  %v5982_v9 = vld [vmem:[%s4810_s28 + $0x258] sm:$0xff] }
 0x1fa   : > { %v4126_v7 = vld [vmem:[%s4810_s28 + $0x219] sm:$0xff]  ;;  %1834 = vst.msk [vmem:[#allocation2 + $0x178] sm:$0xff] %vm207_vm0, %v5975_v62  ;;  %1833 = vst.msk [vmem:[#allocation2 + $0x170] sm:$0xff] %vm207_vm0, %v5982_v9 }
 0x1fb   : > { %v1318_v22 = vpop.permute.xlu1 %1317  ;;  %v1316_v23 = vpop.permute.xlu0 %1315 }
 0x1fc   : > { %1391 = vst.msk [vmem:[#allocation2 + $0xb8] sm:$0xff] %vm1367_vm6, %v1318_v22  ;;  %1390 = vst.msk [vmem:[#allocation2 + $0xb0] sm:$0xff] %vm1367_vm6, %v1316_v23  ;;  %v5991_v22 = vld [vmem:[%s4810_s28 + $0x278] sm:$0xff] }
 0x1fd   : > { %1691 = vrot.lane.b32.xlu1 %v4070_v19, %s4734_s9  ;;  %1689 = vrot.lane.b32.xlu0 %v4069_v20, %s4734_s9  ;;  %v4128_v23 = vld [vmem:[%s4810_s28 + $0x231] sm:$0xff]  ;;  %1836 = vst.msk [vmem:[#allocation2 + $0x188] sm:$0xff] %vm207_vm0, %v5991_v22 }
 0x1ff   : > { %v1322_v26 = vpop.permute.xlu1 %1321  ;;  %v1320_v27 = vpop.permute.xlu0 %1319 }
 0x200   : > { %1393 = vst.msk [vmem:[#allocation2 + $0xc8] sm:$0xff] %vm1367_vm6, %v1322_v26  ;;  %1392 = vst.msk [vmem:[#allocation2 + $0xc0] sm:$0xff] %vm1367_vm6, %v1320_v27 }
 0x201   : > { %1695 = vrot.lane.b32.xlu1 %v4072_v24, %s4734_s9  ;;  %1693 = vrot.lane.b32.xlu0 %v4071_v25, %s4734_s9  ;;  %v4127_v24 = vld [vmem:[%s4810_s28 + $0x229] sm:$0xff] }
 0x202   : > { %v5998_v25 = vld [vmem:[%s4810_s28 + $0x270] sm:$0xff] }
 0x203   : > { %v1326_v32 = vpop.permute.xlu1 %1325  ;;  %v1324_v33 = vpop.permute.xlu0 %1323  ;;  %1835 = vst.msk [vmem:[#allocation2 + $0x180] sm:$0xff] %vm207_vm0, %v5998_v25 }
 0x204   : > { %1395 = vst.msk [vmem:[#allocation2 + $0xd8] sm:$0xff] %vm1367_vm6, %v1326_v32  ;;  %1394 = vst.msk [vmem:[#allocation2 + $0xd0] sm:$0xff] %vm1367_vm6, %v1324_v33  ;;  %v4129_v32 = vld [vmem:[%s4810_s28 + $0x241] sm:$0xff] }
 0x205   : > { %1699 = vrot.lane.b32.xlu1 %v4074_v28, %s4734_s9  ;;  %1697 = vrot.lane.b32.xlu0 %v4073_v31, %s4734_s9  ;;  %v6007_v28 = vld [vmem:[%s4810_s28 + $0x290] sm:$0xff]  ;;  %v6014_v33 = vld [vmem:[%s4810_s28 + $0x288] sm:$0xff] }
 0x206   : > { %v4130_v31 = vld [vmem:[%s4810_s28 + $0x249] sm:$0xff]  ;;  %1838 = vst.msk [vmem:[#allocation2 + $0x198] sm:$0xff] %vm207_vm0, %v6007_v28  ;;  %1837 = vst.msk [vmem:[#allocation2 + $0x190] sm:$0xff] %vm207_vm0, %v6014_v33 }
 0x207   : > { %v1330_v36 = vpop.permute.xlu1 %1329  ;;  %v1328_v37 = vpop.permute.xlu0 %1327 }
 0x208   : > { %1397 = vst.msk [vmem:[#allocation2 + $0xe8] sm:$0xff] %vm1367_vm6, %v1330_v36  ;;  %1396 = vst.msk [vmem:[#allocation2 + $0xe0] sm:$0xff] %vm1367_vm6, %v1328_v37  ;;  %v6023_v36 = vld [vmem:[%s4810_s28 + $0x2a8] sm:$0xff] }
 0x209   : > { %1703 = vrot.lane.b32.xlu1 %v4076_v34, %s4734_s9  ;;  %1701 = vrot.lane.b32.xlu0 %v4075_v35, %s4734_s9  ;;  %v4132_v37 = vld [vmem:[%s4810_s28 + $0x261] sm:$0xff]  ;;  %1840 = vst.msk [vmem:[#allocation2 + $0x1a8] sm:$0xff] %vm207_vm0, %v6023_v36 }
 0x20b   : > { %v1334_v40 = vpop.permute.xlu1 %1333  ;;  %v1332_v41 = vpop.permute.xlu0 %1331 }
 0x20c   : > { %1399 = vst.msk [vmem:[#allocation2 + $0xf8] sm:$0xff] %vm1367_vm6, %v1334_v40  ;;  %1398 = vst.msk [vmem:[#allocation2 + $0xf0] sm:$0xff] %vm1367_vm6, %v1332_v41 }
 0x20d   : > { %1707 = vrot.lane.b32.xlu1 %v4078_v38, %s4734_s9  ;;  %1705 = vrot.lane.b32.xlu0 %v4077_v39, %s4734_s9  ;;  %v4131_v38 = vld [vmem:[%s4810_s28 + $0x259] sm:$0xff] }
 0x20e   : > { %v6030_v39 = vld [vmem:[%s4810_s28 + $0x2a0] sm:$0xff] }
 0x20f   : > { %v1467_v52 = vpop.permute.xlu1 %1466  ;;  %v1465_v53 = vpop.permute.xlu0 %1464  ;;  %1839 = vst.msk [vmem:[#allocation2 + $0x1a0] sm:$0xff] %vm207_vm0, %v6030_v39 }
 0x210   : > { %1562 = vst.msk [vmem:[#allocation2 + $0x8] sm:$0xff] %vm1560_vm7, %v1467_v52  ;;  %1561 = vst.msk [vmem:[#allocation2] sm:$0xff] %vm1560_vm7, %v1465_v53 }
 0x211   : > { %1711 = vrot.lane.b32.xlu1 %v4080_v45, %s4734_s9  ;;  %1709 = vrot.lane.b32.xlu0 %v4079_v48, %s4734_s9  ;;  %v4134_v45 = vld [vmem:[%s4810_s28 + $0x279] sm:$0xff]  ;;  %v4133_v48 = vld [vmem:[%s4810_s28 + $0x271] sm:$0xff] }
 0x213   : > { %v1471_v57 = vpop.permute.xlu1 %1470  ;;  %v1469_v11 = vpop.permute.xlu0 %1468 }
 0x214   : > { %1564 = vst.msk [vmem:[#allocation2 + $0x18] sm:$0xff] %vm1560_vm7, %v1471_v57  ;;  %1563 = vst.msk [vmem:[#allocation2 + $0x10] sm:$0xff] %vm1560_vm7, %v1469_v11  ;;  %v6055_v57 = vld [vmem:[%s4810_s28 + $0x2d8] sm:$0xff] }
 0x215   : > { %1715 = vrot.lane.b32.xlu1 %v5575_v4, %s4734_s9  ;;  %1713 = vrot.lane.b32.xlu0 %v5578_v5, %s4734_s9  ;;  %v5899_v4 = vld [vmem:[%s4810_s28 + $0x200] sm:$0xff]  ;;  %v6058_v11 = vld [vmem:[%s4810_s28 + $0x291] sm:$0xff]  ;;  %1844 = vst.msk [vmem:[#allocation2 + $0x1c8] sm:$0xff] %vm207_vm0, %v6055_v57 }
 0x216   : > { %v4118_v5 = vld [vmem:[%s4810_s28 + $0x1b9] sm:$0xff]  ;;  %1826 = vst.msk [vmem:[#allocation2 + $0x138] sm:$0xff] %vm207_vm0, %v5899_v4 }
 0x217   : > { %v1475_v14 = vpop.permute.xlu1 %1474  ;;  %v1473_v15 = vpop.permute.xlu0 %1472 }
 0x218   : > { %1566 = vst.msk [vmem:[#allocation2 + $0x28] sm:$0xff] %vm1560_vm7, %v1475_v14  ;;  %1565 = vst.msk [vmem:[#allocation2 + $0x20] sm:$0xff] %vm1560_vm7, %v1473_v15 }
 0x219   : > { %1719 = vrot.lane.b32.xlu1 %v4084_v16, %s4734_s9  ;;  %1717 = vrot.lane.b32.xlu0 %v4083_v60, %s4734_s9  ;;  %v6061_v16 = vld [vmem:[%s4810_s28 + $0x289] sm:$0xff] }
 0x21a   : > { %v6066_v60 = vld [vmem:[%s4810_s28 + $0x2d0] sm:$0xff] }
 0x21b   : > { %v1479_v29 = vpop.permute.xlu1 %1478  ;;  %v1477_v30 = vpop.permute.xlu0 %1476  ;;  %1843 = vst.msk [vmem:[#allocation2 + $0x1c0] sm:$0xff] %vm207_vm0, %v6066_v60 }
 0x21c   : > { %1568 = vst.msk [vmem:[#allocation2 + $0x38] sm:$0xff] %vm1560_vm7, %v1479_v29  ;;  %1567 = vst.msk [vmem:[#allocation2 + $0x30] sm:$0xff] %vm1560_vm7, %v1477_v30  ;;  %v6083_v29 = vld [vmem:[%s4810_s28 + $0x2a1] sm:$0xff] }
 0x21d   : > { %1917 = vrot.lane.b32.xlu1 %v4118_v5, %s4727_s29  ;;  %1915 = vrot.lane.b32.xlu0 %v4117_v18, %s4727_s29  ;;  %v6077_v5 = vld [vmem:[%s4810_s28 + $0x2f0] sm:$0xff]  ;;  %v6088_v30 = vld [vmem:[%s4810_s28 + $0x2e8] sm:$0xff] }
 0x21e   : > { %v6080_v18 = vld [vmem:[%s4810_s28 + $0x2a9] sm:$0xff]  ;;  %1846 = vst.msk [vmem:[#allocation2 + $0x1d8] sm:$0xff] %vm207_vm0, %v6077_v5  ;;  %7125 = vst [vmem:[#allocation6_spill] sm:$0xff] %v6088_v30 }
 0x21f   : > { %v1483_v50 = vpop.permute.xlu1 %1482  ;;  %v1481_v51 = vpop.permute.xlu0 %1480  ;;  %1845 = vst.msk [vmem:[#allocation2 + $0x1d0] sm:$0xff] %vm207_vm0, %v6088_v30 }
 0x220   : > { %1570 = vst.msk [vmem:[#allocation2 + $0x48] sm:$0xff] %vm1560_vm7, %v1483_v50  ;;  %1569 = vst.msk [vmem:[#allocation2 + $0x40] sm:$0xff] %vm1560_vm7, %v1481_v51 }
 0x221   : > { %1921 = vrot.lane.b32.xlu1 %v5918_v43, %s4727_s29  ;;  %1919 = vrot.lane.b32.xlu0 %v5921_v46, %s4727_s29 }
 0x223   : > { %v1487_v58 = vpop.permute.xlu1 %1486  ;;  %v1485_v59 = vpop.permute.xlu0 %1484 }
 0x224   : > { %1572 = vst.msk [vmem:[#allocation2 + $0x58] sm:$0xff] %vm1560_vm7, %v1487_v58  ;;  %1571 = vst.msk [vmem:[#allocation2 + $0x50] sm:$0xff] %vm1560_vm7, %v1485_v59  ;;  %v6099_v58 = vld [vmem:[%s4810_s28 + $0x308] sm:$0xff] }
 0x225   : > { %1925 = vrot.lane.b32.xlu1 %v5940_v55, %s4727_s29  ;;  %1923 = vrot.lane.b32.xlu0 %v5943_v13, %s4727_s29  ;;  %7126 = vst [vmem:[#allocation7_spill] sm:$0xff] %v6099_v58  ;;  %v6102_v59 = vld [vmem:[%s4810_s28 + $0x2c1] sm:$0xff]  ;;  %1848 = vst.msk [vmem:[#allocation2 + $0x1e8] sm:$0xff] %vm207_vm0, %v6099_v58 }
 0x227   : > { %v1491_v3 = vpop.permute.xlu1 %1490  ;;  %v1489_v61 = vpop.permute.xlu0 %1488 }
 0x228   : > { %1574 = vst.msk [vmem:[#allocation2 + $0x68] sm:$0xff] %vm1560_vm7, %v1491_v3  ;;  %1573 = vst.msk [vmem:[#allocation2 + $0x60] sm:$0xff] %vm1560_vm7, %v1489_v61 }
 0x229   : > { %1929 = vrot.lane.b32.xlu1 %v4124_v2, %s4727_s29  ;;  %1927 = vrot.lane.b32.xlu0 %v4123_v1, %s4727_s29  ;;  %v6105_v2 = vld [vmem:[%s4810_s28 + $0x2b9] sm:$0xff] }
 0x22a   : > { %v6110_v1 = vld [vmem:[%s4810_s28 + $0x300] sm:$0xff] }
 0x22b   : > { %v1495_v19 = vpop.permute.xlu1 %1494  ;;  %v1493_v20 = vpop.permute.xlu0 %1492  ;;  %7127 = vst [vmem:[#allocation8_spill] sm:$0xff] %v6110_v1  ;;  %1847 = vst.msk [vmem:[#allocation2 + $0x1e0] sm:$0xff] %vm207_vm0, %v6110_v1  ;;  %v4177_v1 = vld [vmem:[%s4810_s28 + $0x302] sm:$0xff] }
 0x22c   : > { %1576 = vst.msk [vmem:[#allocation2 + $0x78] sm:$0xff] %vm1560_vm7, %v1495_v19  ;;  %1575 = vst.msk [vmem:[#allocation2 + $0x70] sm:$0xff] %vm1560_vm7, %v1493_v20  ;;  %v4141_v19 = vld [vmem:[%s4810_s28 + $0x2d1] sm:$0xff] }
 0x22d   : > { %1933 = vrot.lane.b32.xlu1 %v4126_v7, %s4727_s29  ;;  %1931 = vrot.lane.b32.xlu0 %v4125_v8, %s4727_s29  ;;  %v6121_v7 = vld [vmem:[%s4810_s28 + $0x320] sm:$0xff]  ;;  %v6128_v20 = vld [vmem:[%s4810_s28 + $0x318] sm:$0xff] }
 0x22e   : > { %7128 = vst [vmem:[#allocation9_spill] sm:$0xff] %v6121_v7  ;;  %v4142_v8 = vld [vmem:[%s4810_s28 + $0x2d9] sm:$0xff]  ;;  %1850 = vst.msk [vmem:[#allocation2 + $0x1f8] sm:$0xff] %vm207_vm0, %v6121_v7  ;;  %v4178_v7 = vld [vmem:[%s4810_s28 + $0x30a] sm:$0xff] }
 0x22f   : > { %v1499_v26 = vpop.permute.xlu1 %1498  ;;  %v1497_v27 = vpop.permute.xlu0 %1496  ;;  %7129 = vst [vmem:[#allocation10_spill] sm:$0xff] %v6128_v20  ;;  %1849 = vst.msk [vmem:[#allocation2 + $0x1f0] sm:$0xff] %vm207_vm0, %v6128_v20 }
 0x230   : > { %1578 = vst.msk [vmem:[#allocation2 + $0x88] sm:$0xff] %vm1560_vm7, %v1499_v26  ;;  %1577 = vst.msk [vmem:[#allocation2 + $0x80] sm:$0xff] %vm1560_vm7, %v1497_v27  ;;  %v4144_v26 = vld [vmem:[%s4810_s28 + $0x2f1] sm:$0xff]  ;;  %v4143_v27 = vld [vmem:[%s4810_s28 + $0x2e9] sm:$0xff] }
 0x231   : > { %1937 = vrot.lane.b32.xlu1 %v4128_v23, %s4727_s29  ;;  %1935 = vrot.lane.b32.xlu0 %v4127_v24, %s4727_s29 }
 0x233   : > { %v1503_v34 = vpop.permute.xlu1 %1502  ;;  %v1501_v35 = vpop.permute.xlu0 %1500 }
 0x234   : > { %1580 = vst.msk [vmem:[#allocation2 + $0x98] sm:$0xff] %vm1560_vm7, %v1503_v34  ;;  %1579 = vst.msk [vmem:[#allocation2 + $0x90] sm:$0xff] %vm1560_vm7, %v1501_v35  ;;  %v4146_v34 = vld [vmem:[%s4810_s28 + $0x309] sm:$0xff]  ;;  %v4145_v35 = vld [vmem:[%s4810_s28 + $0x301] sm:$0xff] }
 0x235   : > { %1941 = vrot.lane.b32.xlu1 %v4130_v31, %s4727_s29  ;;  %1939 = vrot.lane.b32.xlu0 %v4129_v32, %s4727_s29 }
 0x237   : > { %v1507_v40 = vpop.permute.xlu1 %1506  ;;  %v1505_v41 = vpop.permute.xlu0 %1504 }
 0x238   : > { %1582 = vst.msk [vmem:[#allocation2 + $0xa8] sm:$0xff] %vm1560_vm7, %v1507_v40  ;;  %1581 = vst.msk [vmem:[#allocation2 + $0xa0] sm:$0xff] %vm1560_vm7, %v1505_v41  ;;  %v4148_v40 = vld [vmem:[%s4810_s28 + $0x321] sm:$0xff]  ;;  %v4147_v41 = vld [vmem:[%s4810_s28 + $0x319] sm:$0xff] }
 0x239   : > { %1945 = vrot.lane.b32.xlu1 %v4132_v37, %s4727_s29  ;;  %1943 = vrot.lane.b32.xlu0 %v4131_v38, %s4727_s29 }
 0x23b   : > { %v1511_v52 = vpop.permute.xlu1 %1510  ;;  %v1509_v53 = vpop.permute.xlu0 %1508 }
 0x23c   : > { %1584 = vst.msk [vmem:[#allocation2 + $0xb8] sm:$0xff] %vm1560_vm7, %v1511_v52  ;;  %1583 = vst.msk [vmem:[#allocation2 + $0xb0] sm:$0xff] %vm1560_vm7, %v1509_v53  ;;  %v4150_v52 = vld [vmem:[%s4810_s28 + $0x1ba] sm:$0xff]  ;;  %v4149_v53 = vld [vmem:[%s4810_s28 + $0x1b2] sm:$0xff] }
 0x23d   : > { %1949 = vrot.lane.b32.xlu1 %v4134_v45, %s4727_s29  ;;  %1947 = vrot.lane.b32.xlu0 %v4133_v48, %s4727_s29 }
 0x23f   : > { %v1515_v14 = vpop.permute.xlu1 %1514  ;;  %v1513_v15 = vpop.permute.xlu0 %1512 }
 0x240   : > { %1586 = vst.msk [vmem:[#allocation2 + $0xc8] sm:$0xff] %vm1560_vm7, %v1515_v14  ;;  %1585 = vst.msk [vmem:[#allocation2 + $0xc0] sm:$0xff] %vm1560_vm7, %v1513_v15 }
 0x241   : > { %1953 = vrot.lane.b32.xlu1 %v6058_v11, %s4727_s29  ;;  %1951 = vrot.lane.b32.xlu0 %v6061_v16, %s4727_s29 }
 0x243   : > { %v1519_v50 = vpop.permute.xlu1 %1518  ;;  %v1517_v51 = vpop.permute.xlu0 %1516 }
 0x244   : > { %1588 = vst.msk [vmem:[#allocation2 + $0xd8] sm:$0xff] %vm1560_vm7, %v1519_v50  ;;  %1587 = vst.msk [vmem:[#allocation2 + $0xd0] sm:$0xff] %vm1560_vm7, %v1517_v51  ;;  %v6161_v50 = vld [vmem:[%s4810_s28 + $0x1d2] sm:$0xff]  ;;  %v6164_v51 = vld [vmem:[%s4810_s28 + $0x1ca] sm:$0xff] }
 0x245   : > { %1957 = vrot.lane.b32.xlu1 %v6080_v18, %s4727_s29  ;;  %1955 = vrot.lane.b32.xlu0 %v6083_v29, %s4727_s29 }
 0x247   : > { %v1523_v3 = vpop.permute.xlu1 %1522  ;;  %v1521_v61 = vpop.permute.xlu0 %1520 }
 0x248   : > { %1590 = vst.msk [vmem:[#allocation2 + $0xe8] sm:$0xff] %vm1560_vm7, %v1523_v3  ;;  %1589 = vst.msk [vmem:[#allocation2 + $0xe0] sm:$0xff] %vm1560_vm7, %v1521_v61 }
 0x249   : > { %1961 = vrot.lane.b32.xlu1 %v6102_v59, %s4727_s29  ;;  %1959 = vrot.lane.b32.xlu0 %v6105_v2, %s4727_s29 }
 0x24b   : > { %v1527_v23 = vpop.permute.xlu1 %1526  ;;  %v1525_v24 = vpop.permute.xlu0 %1524 }
 0x24c   : > { %1592 = vst.msk [vmem:[#allocation2 + $0xf8] sm:$0xff] %vm1560_vm7, %v1527_v23  ;;  %1591 = vst.msk [vmem:[#allocation2 + $0xf0] sm:$0xff] %vm1560_vm7, %v1525_v24 }
 0x24d   : > { %1965 = vrot.lane.b32.xlu1 %v4142_v8, %s4727_s29  ;;  %1963 = vrot.lane.b32.xlu0 %v4141_v19, %s4727_s29  ;;  %v6173_v8 = vld [vmem:[%s4810_s28 + $0x1ea] sm:$0xff]  ;;  %v6176_v19 = vld [vmem:[%s4810_s28 + $0x1e2] sm:$0xff] }
 0x24f   : > { %v1660_v31 = vpop.permute.xlu1 %1659  ;;  %v1658_v32 = vpop.permute.xlu0 %1657 }
 0x250   : > { %1755 = vst.msk [vmem:[#allocation2 + $0x8] sm:$0xff] %vm1753_vm8, %v1660_v31  ;;  %1754 = vst.msk [vmem:[#allocation2] sm:$0xff] %vm1753_vm8, %v1658_v32 }
 0x251   : > { %1969 = vrot.lane.b32.xlu1 %v4144_v26, %s4727_s29  ;;  %1967 = vrot.lane.b32.xlu0 %v4143_v27, %s4727_s29  ;;  %v6185_v26 = vld [vmem:[%s4810_s28 + $0x202] sm:$0xff]  ;;  %v6188_v27 = vld [vmem:[%s4810_s28 + $0x1fa] sm:$0xff] }
 0x253   : > { %v1664_v37 = vpop.permute.xlu1 %1663  ;;  %v1662_v38 = vpop.permute.xlu0 %1661 }
 0x254   : > { %1757 = vst.msk [vmem:[#allocation2 + $0x18] sm:$0xff] %vm1753_vm8, %v1664_v37  ;;  %1756 = vst.msk [vmem:[#allocation2 + $0x10] sm:$0xff] %vm1753_vm8, %v1662_v38 }
 0x255   : > { %1973 = vrot.lane.b32.xlu1 %v4146_v34, %s4727_s29  ;;  %1971 = vrot.lane.b32.xlu0 %v4145_v35, %s4727_s29  ;;  %v4158_v34 = vld [vmem:[%s4810_s28 + $0x21a] sm:$0xff]  ;;  %v4157_v35 = vld [vmem:[%s4810_s28 + $0x212] sm:$0xff] }
 0x257   : > { %v1668_v45 = vpop.permute.xlu1 %1667  ;;  %v1666_v48 = vpop.permute.xlu0 %1665 }
 0x258   : > { %1759 = vst.msk [vmem:[#allocation2 + $0x28] sm:$0xff] %vm1753_vm8, %v1668_v45  ;;  %1758 = vst.msk [vmem:[#allocation2 + $0x20] sm:$0xff] %vm1753_vm8, %v1666_v48 }
 0x259   : > { %1977 = vrot.lane.b32.xlu1 %v4148_v40, %s4727_s29  ;;  %1975 = vrot.lane.b32.xlu0 %v4147_v41, %s4727_s29  ;;  %v4160_v40 = vld [vmem:[%s4810_s28 + $0x232] sm:$0xff]  ;;  %v4159_v41 = vld [vmem:[%s4810_s28 + $0x22a] sm:$0xff] }
 0x25b   : > { %v1672_v14 = vpop.permute.xlu1 %1671  ;;  %v1670_v15 = vpop.permute.xlu0 %1669 }
 0x25c   : > { %1761 = vst.msk [vmem:[#allocation2 + $0x38] sm:$0xff] %vm1753_vm8, %v1672_v14  ;;  %1760 = vst.msk [vmem:[#allocation2 + $0x30] sm:$0xff] %vm1753_vm8, %v1670_v15 }
 0x25d   : > { %2109 = vrot.lane.b32.xlu1 %v4150_v52, %s4728_s30  ;;  %2107 = vrot.lane.b32.xlu0 %v4149_v53, %s4728_s30  ;;  %v4162_v52 = vld [vmem:[%s4810_s28 + $0x24a] sm:$0xff]  ;;  %v4161_v53 = vld [vmem:[%s4810_s28 + $0x242] sm:$0xff] }
 0x25f   : > { %v1676_v3 = vpop.permute.xlu1 %1675  ;;  %v1674_v61 = vpop.permute.xlu0 %1673 }
 0x260   : > { %1763 = vst.msk [vmem:[#allocation2 + $0x48] sm:$0xff] %vm1753_vm8, %v1676_v3  ;;  %1762 = vst.msk [vmem:[#allocation2 + $0x40] sm:$0xff] %vm1753_vm8, %v1674_v61  ;;  %v4164_v3 = vld [vmem:[%s4810_s28 + $0x262] sm:$0xff]  ;;  %v4163_v61 = vld [vmem:[%s4810_s28 + $0x25a] sm:$0xff] }
 0x261   : > { %2113 = vrot.lane.b32.xlu1 %v6161_v50, %s4728_s30  ;;  %2111 = vrot.lane.b32.xlu0 %v6164_v51, %s4728_s30 }
 0x263   : > { %v1680_v23 = vpop.permute.xlu1 %1679  ;;  %v1678_v24 = vpop.permute.xlu0 %1677 }
 0x264   : > { %1765 = vst.msk [vmem:[#allocation2 + $0x58] sm:$0xff] %vm1753_vm8, %v1680_v23  ;;  %1764 = vst.msk [vmem:[#allocation2 + $0x50] sm:$0xff] %vm1753_vm8, %v1678_v24  ;;  %v3390_v23 = vld [vmem:[#allocation2] sm:$0xff]  ;;  %v3391_v24 = vld [vmem:[#allocation2 + $0x8] sm:$0xff] }
 0x265   : > { %2117 = vrot.lane.b32.xlu1 %v6173_v8, %s4728_s30  ;;  %2115 = vrot.lane.b32.xlu0 %v6176_v19, %s4728_s30 }
 0x267   : > { %v1684_v31 = vpop.permute.xlu1 %1683  ;;  %v1682_v32 = vpop.permute.xlu0 %1681 }
 0x268   : > { %1767 = vst.msk [vmem:[#allocation2 + $0x68] sm:$0xff] %vm1753_vm8, %v1684_v31  ;;  %1766 = vst.msk [vmem:[#allocation2 + $0x60] sm:$0xff] %vm1753_vm8, %v1682_v32 }
 0x269   : > { %2121 = vrot.lane.b32.xlu1 %v6185_v26, %s4728_s30  ;;  %2119 = vrot.lane.b32.xlu0 %v6188_v27, %s4728_s30 }
 0x26b   : > { %v1688_v37 = vpop.permute.xlu1 %1687  ;;  %v1686_v38 = vpop.permute.xlu0 %1685 }
 0x26c   : > { %1769 = vst.msk [vmem:[#allocation2 + $0x78] sm:$0xff] %vm1753_vm8, %v1688_v37  ;;  %1768 = vst.msk [vmem:[#allocation2 + $0x70] sm:$0xff] %vm1753_vm8, %v1686_v38 }
 0x26d   : > { %2125 = vrot.lane.b32.xlu1 %v4158_v34, %s4728_s30  ;;  %2123 = vrot.lane.b32.xlu0 %v4157_v35, %s4728_s30 }
 0x26f   : > { %v1692_v45 = vpop.permute.xlu1 %1691  ;;  %v1690_v48 = vpop.permute.xlu0 %1689 }
 0x270   : > { %1771 = vst.msk [vmem:[#allocation2 + $0x88] sm:$0xff] %vm1753_vm8, %v1692_v45  ;;  %1770 = vst.msk [vmem:[#allocation2 + $0x80] sm:$0xff] %vm1753_vm8, %v1690_v48  ;;  %v4165_v45 = vld [vmem:[%s4810_s28 + $0x272] sm:$0xff] }
 0x271   : > { %2129 = vrot.lane.b32.xlu1 %v4160_v40, %s4728_s30  ;;  %2127 = vrot.lane.b32.xlu0 %v4159_v41, %s4728_s30  ;;  %v4519_v40 = vpack.c.bf16 %v3391_v24, %v3390_v23  ;;  %v4166_v41 = vld [vmem:[%s4810_s28 + $0x27a] sm:$0xff]  ;;  %v3392_v23 = vld [vmem:[#allocation2 + $0x10] sm:$0xff] }
 0x272   : > { %v3393_v24 = vld [vmem:[#allocation2 + $0x18] sm:$0xff] }
 0x273   : > { %v1696_v14 = vpop.permute.xlu1 %1695  ;;  %v1694_v15 = vpop.permute.xlu0 %1693 }
 0x274   : > { %1773 = vst.msk [vmem:[#allocation2 + $0x98] sm:$0xff] %vm1753_vm8, %v1696_v14  ;;  %1772 = vst.msk [vmem:[#allocation2 + $0x90] sm:$0xff] %vm1753_vm8, %v1694_v15 }
 0x275   : > { %2133 = vrot.lane.b32.xlu1 %v4162_v52, %s4728_s30  ;;  %2131 = vrot.lane.b32.xlu0 %v4161_v53, %s4728_s30 }
 0x277   : > { %v1700_v31 = vpop.permute.xlu1 %1699  ;;  %v1698_v32 = vpop.permute.xlu0 %1697  ;;  %v3406_v34 = vld [vmem:[#allocation2 + $0x80] sm:$0xff]  ;;  %v3407_v35 = vld [vmem:[#allocation2 + $0x88] sm:$0xff] }
 0x278   : > { %1775 = vst.msk [vmem:[#allocation2 + $0xa8] sm:$0xff] %vm1753_vm8, %v1700_v31  ;;  %1774 = vst.msk [vmem:[#allocation2 + $0xa0] sm:$0xff] %vm1753_vm8, %v1698_v32  ;;  %v4516_v38 = vpack.c.bf16 %v3407_v35, %v3406_v34 }
 0x279   : > { %2137 = vrot.lane.b32.xlu1 %v4164_v3, %s4728_s30  ;;  %2135 = vrot.lane.b32.xlu0 %v4163_v61, %s4728_s30  ;;  %v6237_v3 = vld [vmem:[%s4810_s28 + $0x292] sm:$0xff]  ;;  %v6242_v61 = vld [vmem:[%s4810_s28 + $0x28a] sm:$0xff] }
 0x27a   : > { %4518 = vmatprep.subr.msk.bf16.mxu0 %vm6218_vm10, %v4516_v38  ;;  %v4525_v38 = vpack.c.bf16 %v3393_v24, %v3392_v23  ;;  %v3395_v23 = vld [vmem:[#allocation2 + $0x28] sm:$0xff] }
 0x27b   : > { %v1704_v48 = vpop.permute.xlu1 %1703  ;;  %v1702_v52 = vpop.permute.xlu0 %1701  ;;  %4521 = vmatpush3.bf16.xpose.msk.msra.mxu0 %vm6218_vm10, %v4519_v40  ;;  %v3408_v53 = vld [vmem:[#allocation2 + $0x90] sm:$0xff]  ;;  %v3409_v14 = vld [vmem:[#allocation2 + $0x98] sm:$0xff] }
 0x27c   : > { %1777 = vst.msk [vmem:[#allocation2 + $0xb8] sm:$0xff] %vm1753_vm8, %v1704_v48  ;;  %1776 = vst.msk [vmem:[#allocation2 + $0xb0] sm:$0xff] %vm1753_vm8, %v1702_v52  ;;  %v4522_v15 = vpack.c.bf16 %v3409_v14, %v3408_v53  ;;  %v6267_v53 = vld [vmem:[%s4810_s28 + $0x2c2] sm:$0xff]  ;;  %v6270_v14 = vld [vmem:[%s4810_s28 + $0x2ba] sm:$0xff] }
 0x27d   : > { %2141 = vrot.lane.b32.xlu1 %v4166_v41, %s4728_s30  ;;  %2139 = vrot.lane.b32.xlu0 %v4165_v45, %s4728_s30  ;;  %v6251_v41 = vld [vmem:[%s4810_s28 + $0x2aa] sm:$0xff]  ;;  %v6254_v45 = vld [vmem:[%s4810_s28 + $0x2a2] sm:$0xff] }
 0x27e   : > { %4524 = vmatprep.subr.msk.bf16.mxu0 %vm6218_vm10, %v4522_v15  ;;  %v3394_v15 = vld [vmem:[#allocation2 + $0x20] sm:$0xff] }
 0x27f   : > { %v1708_v31 = vpop.permute.xlu1 %1707  ;;  %v1706_v32 = vpop.permute.xlu0 %1705  ;;  %v3410_v34 = vld [vmem:[#allocation2 + $0xa0] sm:$0xff]  ;;  %v3411_v35 = vld [vmem:[#allocation2 + $0xa8] sm:$0xff] }
 0x280   : > { %1779 = vst.msk [vmem:[#allocation2 + $0xc8] sm:$0xff] %vm1753_vm8, %v1708_v31  ;;  %1778 = vst.msk [vmem:[#allocation2 + $0xc0] sm:$0xff] %vm1753_vm8, %v1706_v32  ;;  %v4528_v40 = vpack.c.bf16 %v3411_v35, %v3410_v34  ;;  %v4531_v35 = vpack.c.bf16 %v3395_v23, %v3394_v15  ;;  %v4176_v15 = vld [vmem:[%s4810_s28 + $0x2f2] sm:$0xff]  ;;  %v4175_v23 = vld [vmem:[%s4810_s28 + $0x2ea] sm:$0xff] }
 0x281   : > { %2145 = vrot.lane.b32.xlu1 %v6237_v3, %s4728_s30  ;;  %2143 = vrot.lane.b32.xlu0 %v6242_v61, %s4728_s30 }
 0x283   : > { %v1712_v48 = vpop.permute.xlu1 %1711  ;;  %v1710_v52 = vpop.permute.xlu0 %1709  ;;  %4527 = vmatpush3.bf16.xpose.msk.msra.mxu0 %vm6218_vm10, %v4525_v38  ;;  %v3412_v32 = vld [vmem:[#allocation2 + $0xb0] sm:$0xff]  ;;  %v3413_v34 = vld [vmem:[#allocation2 + $0xb8] sm:$0xff] }
 0x284   : > { %1781 = vst.msk [vmem:[#allocation2 + $0xd8] sm:$0xff] %vm1753_vm8, %v1712_v48  ;;  %1780 = vst.msk [vmem:[#allocation2 + $0xd0] sm:$0xff] %vm1753_vm8, %v1710_v52  ;;  %4530 = vmatprep.subr.msk.bf16.mxu0 %vm6218_vm10, %v4528_v40  ;;  %v4534_v38 = vpack.c.bf16 %v3413_v34, %v3412_v32  ;;  %v6279_v40 = vld [vmem:[%s4810_s28 + $0x2da] sm:$0xff]  ;;  %v6282_v48 = vld [vmem:[%s4810_s28 + $0x2d2] sm:$0xff] }
 0x285   : > { %2149 = vrot.lane.b32.xlu1 %v6251_v41, %s4728_s30  ;;  %2147 = vrot.lane.b32.xlu0 %v6254_v45, %s4728_s30 }
 0x287   : > { %v1716_v24 = vpop.permute.xlu1 %1715  ;;  %v1714_v31 = vpop.permute.xlu0 %1713 }
 0x288   : > { %1783 = vst.msk [vmem:[#allocation2 + $0xe8] sm:$0xff] %vm1753_vm8, %v1716_v24  ;;  %1782 = vst.msk [vmem:[#allocation2 + $0xe0] sm:$0xff] %vm1753_vm8, %v1714_v31  ;;  %v3396_v24 = vld [vmem:[#allocation2 + $0x30] sm:$0xff]  ;;  %v3397_v31 = vld [vmem:[#allocation2 + $0x38] sm:$0xff] }
 0x289   : > { %2153 = vrot.lane.b32.xlu1 %v6267_v53, %s4728_s30  ;;  %2151 = vrot.lane.b32.xlu0 %v6270_v14, %s4728_s30 }
 0x28b   : > { %v1720_v52 = vpop.permute.xlu1 %1719  ;;  %v1718_v20 = vpop.permute.xlu0 %1717  ;;  %4533 = vmatpush3.bf16.xpose.msk.msra.mxu0 %vm6218_vm10, %v4531_v35  ;;  %v3414_v35 = vld [vmem:[#allocation2 + $0xc0] sm:$0xff] }
 0x28c   : > { %1785 = vst.msk [vmem:[#allocation2 + $0xf8] sm:$0xff] %vm1753_vm8, %v1720_v52  ;;  %1784 = vst.msk [vmem:[#allocation2 + $0xf0] sm:$0xff] %vm1753_vm8, %v1718_v20  ;;  %4536 = vmatprep.subr.msk.bf16.mxu0 %vm6218_vm10, %v4534_v38  ;;  %v3415_v52 = vld [vmem:[#allocation2 + $0xc8] sm:$0xff]  ;;  %v4537_v20 = vpack.c.bf16 %v3397_v31, %v3396_v24  ;;  %v3398_v24 = vld [vmem:[#allocation2 + $0x40] sm:$0xff] }
 0x28d   : > { %2157 = vrot.lane.b32.xlu1 %v6279_v40, %s4728_s30  ;;  %2155 = vrot.lane.b32.xlu0 %v6282_v48, %s4728_s30  ;;  %v4540_v38 = vpack.c.bf16 %v3415_v52, %v3414_v35  ;;  %v3399_v31 = vld [vmem:[#allocation2 + $0x48] sm:$0xff]  ;;  %v3416_v35 = vld [vmem:[#allocation2 + $0xd0] sm:$0xff]  ;;  %v3417_v52 = vld [vmem:[#allocation2 + $0xd8] sm:$0xff] }
 0x28f   : > { %v1918_v32 = vpop.permute.xlu1 %1917  ;;  %v1916_v34 = vpop.permute.xlu0 %1915 }
 0x290   : > { %2012 = vst.msk [vmem:[#allocation2 + $0x108] sm:$0xff] %vm400_vm1, %v1918_v32  ;;  %2011 = vst.msk [vmem:[#allocation2 + $0x100] sm:$0xff] %vm400_vm1, %v1916_v34 }
 0x291   : > { %2161 = vrot.lane.b32.xlu1 %v4176_v15, %s4728_s30  ;;  %2159 = vrot.lane.b32.xlu0 %v4175_v23, %s4728_s30  ;;  %v4180_v15 = vld [vmem:[%s4810_s28 + $0x322] sm:$0xff]  ;;  %v4179_v23 = vld [vmem:[%s4810_s28 + $0x31a] sm:$0xff] }
 0x293   : > { %v1922_v58 = vpop.permute.xlu1 %1921  ;;  %v1920_v30 = vpop.permute.xlu0 %1919  ;;  %4539 = vmatpush3.bf16.xpose.msk.msra.mxu0 %vm6218_vm10, %v4537_v20  ;;  %v3400_v20 = vld [vmem:[#allocation2 + $0x50] sm:$0xff] }
 0x294   : > { %2014 = vst.msk [vmem:[#allocation2 + $0x118] sm:$0xff] %vm400_vm1, %v1922_v58  ;;  %2013 = vst.msk [vmem:[#allocation2 + $0x110] sm:$0xff] %vm400_vm1, %v1920_v30  ;;  %4542 = vmatprep.subr.msk.bf16.mxu0 %vm6218_vm10, %v4540_v38  ;;  %v4543_v30 = vpack.c.bf16 %v3399_v31, %v3398_v24  ;;  %v4546_v58 = vpack.c.bf16 %v3417_v52, %v3416_v35  ;;  %v3401_v38 = vld [vmem:[#allocation2 + $0x58] sm:$0xff]  ;;  %v3418_v24 = vld [vmem:[#allocation2 + $0xe0] sm:$0xff] }
 0x295   : > { %2165 = vrot.lane.b32.xlu1 %v4178_v7, %s4728_s30  ;;  %2163 = vrot.lane.b32.xlu0 %v4177_v1, %s4728_s30  ;;  %v3419_v31 = vld [vmem:[#allocation2 + $0xe8] sm:$0xff]  ;;  %v3402_v35 = vld [vmem:[#allocation2 + $0x60] sm:$0xff] }
 0x296   : > { %v3403_v52 = vld [vmem:[#allocation2 + $0x68] sm:$0xff] }
 0x297   : > { %v1926_v32 = vpop.permute.xlu1 %1925  ;;  %v1924_v34 = vpop.permute.xlu0 %1923 }
 0x298   : > { %2016 = vst.msk [vmem:[#allocation2 + $0x128] sm:$0xff] %vm400_vm1, %v1926_v32  ;;  %2015 = vst.msk [vmem:[#allocation2 + $0x120] sm:$0xff] %vm400_vm1, %v1924_v34  ;;  %v4552_v32 = vpack.c.bf16 %v3419_v31, %v3418_v24  ;;  %v3404_v24 = vld [vmem:[#allocation2 + $0x70] sm:$0xff]  ;;  %v3405_v31 = vld [vmem:[#allocation2 + $0x78] sm:$0xff] }
 0x299   : > { %2169 = vrot.lane.b32.xlu1 %v4180_v15, %s4728_s30  ;;  %2167 = vrot.lane.b32.xlu0 %v4179_v23, %s4728_s30 }
 0x29b   : > { %v1930_v7 = vpop.permute.xlu1 %1929  ;;  %v1928_v1 = vpop.permute.xlu0 %1927  ;;  %4545 = vmatpush3.bf16.xpose.msk.msra.mxu0 %vm6218_vm10, %v4543_v30 }
 0x29c   : > { %2018 = vst.msk [vmem:[#allocation2 + $0x138] sm:$0xff] %vm400_vm1, %v1930_v7  ;;  %2017 = vst.msk [vmem:[#allocation2 + $0x130] sm:$0xff] %vm400_vm1, %v1928_v1  ;;  %4548 = vmatprep.subr.msk.bf16.mxu0 %vm6218_vm10, %v4546_v58  ;;  %v3420_v7 = vld [vmem:[#allocation2 + $0xf0] sm:$0xff]  ;;  %v3421_v1 = vld [vmem:[#allocation2 + $0xf8] sm:$0xff] }
 0x29d   : > { %2302 = vrot.lane.b32.xlu1 %v5867_v56, %s4729_s4  ;;  %2300 = vrot.lane.b32.xlu0 %v5872_v10, %s4729_s4  ;;  %v4549_v56 = vpack.c.bf16 %v3401_v38, %v3400_v20  ;;  %v4555_v20 = vpack.c.bf16 %v3403_v52, %v3402_v35  ;;  %v4558_v38 = vpack.c.bf16 %v3421_v1, %v3420_v7 }
 0x29f   : > { %v1934_v15 = vpop.permute.xlu1 %1933  ;;  %v1932_v23 = vpop.permute.xlu0 %1931 }
 0x2a0   : > { %2020 = vst.msk [vmem:[#allocation2 + $0x148] sm:$0xff] %vm400_vm1, %v1934_v15  ;;  %2019 = vst.msk [vmem:[#allocation2 + $0x140] sm:$0xff] %vm400_vm1, %v1932_v23 }
 0x2a1   : > { %2306 = vrot.lane.b32.xlu1 %v5883_v12, %s4729_s4  ;;  %2304 = vrot.lane.b32.xlu0 %v5890_v63, %s4729_s4 }
 0x2a3   : > { %v1938_v34 = vpop.permute.xlu1 %1937  ;;  %v1936_v10 = vpop.permute.xlu0 %1935  ;;  %4551 = vmatpush3.bf16.xpose.msk.msra.mxu0 %vm6218_vm10, %v4549_v56 }
 0x2a4   : > { %2022 = vst.msk [vmem:[#allocation2 + $0x158] sm:$0xff] %vm400_vm1, %v1938_v34  ;;  %2021 = vst.msk [vmem:[#allocation2 + $0x150] sm:$0xff] %vm400_vm1, %v1936_v10  ;;  %4554 = vmatprep.subr.msk.bf16.mxu0 %vm6218_vm10, %v4552_v32  ;;  %v4561_v34 = vpack.c.bf16 %v3405_v31, %v3404_v24  ;;  %v4216_v31 = vld [vmem:[%s4810_s28 + $0x1e9] sm:$0xff] }
 0x2a5   : > { %2310 = vrot.lane.b32.xlu1 %v5899_v4, %s4729_s4  ;;  %2308 = vrot.lane.b32.xlu0 %v5906_v21, %s4729_s4 }
 0x2a7   : > { %v1942_v30 = vpop.permute.xlu1 %1941  ;;  %v1940_v58 = vpop.permute.xlu0 %1939 }
 0x2a8   : > { %2024 = vst.msk [vmem:[#allocation2 + $0x168] sm:$0xff] %vm400_vm1, %v1942_v30  ;;  %2023 = vst.msk [vmem:[#allocation2 + $0x160] sm:$0xff] %vm400_vm1, %v1940_v58 }
 0x2a9   : > { %2314 = vrot.lane.b32.xlu1 %v5915_v42, %s4729_s4  ;;  %2312 = vrot.lane.b32.xlu0 %v5926_v47, %s4729_s4 }
 0x2ab   : > { %v1946_v15 = vpop.permute.xlu1 %1945  ;;  %v1944_v23 = vpop.permute.xlu0 %1943  ;;  %4557 = vmatpush3.bf16.xpose.msk.msra.mxu0 %vm6218_vm10, %v4555_v20 }
 0x2ac   : > { %2026 = vst.msk [vmem:[#allocation2 + $0x178] sm:$0xff] %vm400_vm1, %v1946_v15  ;;  %2025 = vst.msk [vmem:[#allocation2 + $0x170] sm:$0xff] %vm400_vm1, %v1944_v23  ;;  %4560 = vmatprep.subr.msk.bf16.mxu0 %vm6218_vm10, %v4558_v38 }
 0x2ad   : > { %2318 = vrot.lane.b32.xlu1 %v5937_v54, %s4729_s4  ;;  %2316 = vrot.lane.b32.xlu0 %v5948_v17, %s4729_s4 }
 0x2af   : > { %v1950_v56 = vpop.permute.xlu1 %1949  ;;  %v1948_v32 = vpop.permute.xlu0 %1947 }
 0x2b0   : > { %2028 = vst.msk [vmem:[#allocation2 + $0x188] sm:$0xff] %vm400_vm1, %v1950_v56  ;;  %2027 = vst.msk [vmem:[#allocation2 + $0x180] sm:$0xff] %vm400_vm1, %v1948_v32  ;;  %v4215_v56 = vld [vmem:[%s4810_s28 + $0x1e1] sm:$0xff] }
 0x2b1   : > { %2322 = vrot.lane.b32.xlu1 %v5959_v0, %s4729_s4  ;;  %2320 = vrot.lane.b32.xlu0 %v5966_v6, %s4729_s4 }
 0x2b3   : > { %v1954_v10 = vpop.permute.xlu1 %1953  ;;  %v1952_v35 = vpop.permute.xlu0 %1951  ;;  %4563 = vmatpush3.bf16.xpose.msk.msra.mxu0 %vm6218_vm10, %v4561_v34 }
 0x2b4   : > { %2030 = vst.msk [vmem:[#allocation2 + $0x198] sm:$0xff] %vm400_vm1, %v1954_v10  ;;  %2029 = vst.msk [vmem:[#allocation2 + $0x190] sm:$0xff] %vm400_vm1, %v1952_v35 }
 0x2b5   : > { %2326 = vrot.lane.b32.xlu1 %v5975_v62, %s4729_s4  ;;  %2324 = vrot.lane.b32.xlu0 %v5982_v9, %s4729_s4 }
 0x2b7   : > { %v1958_v52 = vpop.permute.xlu1 %1957  ;;  %v1956_v30 = vpop.permute.xlu0 %1955 }
 0x2b8   : > { %2032 = vst.msk [vmem:[#allocation2 + $0x1a8] sm:$0xff] %vm400_vm1, %v1958_v52  ;;  %2031 = vst.msk [vmem:[#allocation2 + $0x1a0] sm:$0xff] %vm400_vm1, %v1956_v30  ;;  %v4312_v52 = vld [vmem:[%s4810_s28 + $0x201] sm:$0xff]  ;;  %v4311_v30 = vld [vmem:[%s4810_s28 + $0x1f9] sm:$0xff] }
 0x2b9   : > { %2330 = vrot.lane.b32.xlu1 %v5991_v22, %s4729_s4  ;;  %2328 = vrot.lane.b32.xlu0 %v5998_v25, %s4729_s4 }
 0x2bb   : > { %v1962_v58 = vpop.permute.xlu1 %1961  ;;  %v1960_v7 = vpop.permute.xlu0 %1959 }
 0x2bc   : > { %2034 = vst.msk [vmem:[#allocation2 + $0x1b8] sm:$0xff] %vm400_vm1, %v1962_v58  ;;  %2033 = vst.msk [vmem:[#allocation2 + $0x1b0] sm:$0xff] %vm400_vm1, %v1960_v7 }
 0x2bd   : > { %2334 = vrot.lane.b32.xlu1 %v6007_v28, %s4729_s4  ;;  %2332 = vrot.lane.b32.xlu0 %v6014_v33, %s4729_s4 }
 0x2bf   : > { %v1966_v62 = vpop.permute.xlu1 %1965  ;;  %v1964_v9 = vpop.permute.xlu0 %1963 }
 0x2c0   : > { %2036 = vst.msk [vmem:[#allocation2 + $0x1c8] sm:$0xff] %vm400_vm1, %v1966_v62  ;;  %2035 = vst.msk [vmem:[#allocation2 + $0x1c0] sm:$0xff] %vm400_vm1, %v1964_v9 }
 0x2c1   : > { %2526 = vrot.lane.b32.xlu1 %v6058_v11, %s4730_s5  ;;  %2524 = vrot.lane.b32.xlu0 %v6061_v16, %s4730_s5 }
 0x2c3   : > { %v1970_v22 = vpop.permute.xlu1 %1969  ;;  %v1968_v25 = vpop.permute.xlu0 %1967 }
 0x2c4   : > { %2038 = vst.msk [vmem:[#allocation2 + $0x1d8] sm:$0xff] %vm400_vm1, %v1970_v22  ;;  %2037 = vst.msk [vmem:[#allocation2 + $0x1d0] sm:$0xff] %vm400_vm1, %v1968_v25  ;;  %v4234_v22 = vld [vmem:[%s4810_s28 + $0x2c1] sm:$0xff]  ;;  %v4233_v25 = vld [vmem:[%s4810_s28 + $0x2b9] sm:$0xff] }
 0x2c5   : > { %2494 = vrot.lane.b32.xlu1 %v5918_v43, %s4730_s5  ;;  %2492 = vrot.lane.b32.xlu0 %v5921_v46, %s4730_s5 }
 0x2c7   : > { %v1974_v28 = vpop.permute.xlu1 %1973  ;;  %v1972_v33 = vpop.permute.xlu0 %1971 }
 0x2c8   : > { %2040 = vst.msk [vmem:[#allocation2 + $0x1e8] sm:$0xff] %vm400_vm1, %v1974_v28  ;;  %2039 = vst.msk [vmem:[#allocation2 + $0x1e0] sm:$0xff] %vm400_vm1, %v1972_v33 }
 0x2c9   : > { %2718 = vrot.lane.b32.xlu1 %v6237_v3, %s4731_s6  ;;  %2716 = vrot.lane.b32.xlu0 %v6242_v61, %s4731_s6 }
 0x2cb   : > { %v1978_v11 = vpop.permute.xlu1 %1977  ;;  %v1976_v16 = vpop.permute.xlu0 %1975 }
 0x2cc   : > { %2042 = vst.msk [vmem:[#allocation2 + $0x1f8] sm:$0xff] %vm400_vm1, %v1978_v11  ;;  %2041 = vst.msk [vmem:[#allocation2 + $0x1f0] sm:$0xff] %vm400_vm1, %v1976_v16 }
 0x2cd   : > { %2686 = vrot.lane.b32.xlu1 %v6161_v50, %s4731_s6  ;;  %2684 = vrot.lane.b32.xlu0 %v6164_v51, %s4731_s6 }
 0x2cf   : > { %v2110_v43 = vpop.permute.xlu1 %2109  ;;  %v2108_v46 = vpop.permute.xlu0 %2107 }
 0x2d0   : > { %2204 = vst.msk [vmem:[#allocation2 + $0x108] sm:$0xff] %vm593_vm2, %v2110_v43  ;;  %2203 = vst.msk [vmem:[#allocation2 + $0x100] sm:$0xff] %vm593_vm2, %v2108_v46 }
 0x2d1   : > { %2911 = vrot.lane.b32.xlu1 %v6023_v36, %s4732_s7  ;;  %2909 = vrot.lane.b32.xlu0 %v6030_v39, %s4732_s7 }
 0x2d3   : > { %v2114_v3 = vpop.permute.xlu1 %2113  ;;  %v2112_v61 = vpop.permute.xlu0 %2111 }
 0x2d4   : > { %2206 = vst.msk [vmem:[#allocation2 + $0x118] sm:$0xff] %vm593_vm2, %v2114_v3  ;;  %2205 = vst.msk [vmem:[#allocation2 + $0x110] sm:$0xff] %vm593_vm2, %v2112_v61 }
 0x2d5   : > { %2879 = vrot.lane.b32.xlu1 %v5883_v12, %s4732_s7  ;;  %2877 = vrot.lane.b32.xlu0 %v5890_v63, %s4732_s7 }
 0x2d7   : > { %v2118_v50 = vpop.permute.xlu1 %2117  ;;  %v2116_v51 = vpop.permute.xlu0 %2115 }
 0x2d8   : > { %2208 = vst.msk [vmem:[#allocation2 + $0x128] sm:$0xff] %vm593_vm2, %v2118_v50  ;;  %2207 = vst.msk [vmem:[#allocation2 + $0x120] sm:$0xff] %vm593_vm2, %v2116_v51 }
 0x2d9   : > { %3103 = vrot.lane.b32.xlu1 %v6080_v18, %s4733_s8  ;;  %3101 = vrot.lane.b32.xlu0 %v6083_v29, %s4733_s8 }
 0x2db   : > { %v2122_v1 = vpop.permute.xlu1 %2121  ;;  %v2120_v20 = vpop.permute.xlu0 %2119 }
 0x2dc   : > { %2210 = vst.msk [vmem:[#allocation2 + $0x138] sm:$0xff] %vm593_vm2, %v2122_v1  ;;  %2209 = vst.msk [vmem:[#allocation2 + $0x130] sm:$0xff] %vm593_vm2, %v2120_v20  ;;  %v4314_v1 = vld [vmem:[%s4810_s28 + $0x219] sm:$0xff]  ;;  %v4313_v20 = vld [vmem:[%s4810_s28 + $0x211] sm:$0xff] }
 0x2dd   : > { %3071 = vrot.lane.b32.xlu1 %v5940_v55, %s4733_s8  ;;  %3069 = vrot.lane.b32.xlu0 %v5943_v13, %s4733_s8 }
 0x2df   : > { %v2126_v12 = vpop.permute.xlu1 %2125  ;;  %v2124_v63 = vpop.permute.xlu0 %2123 }
 0x2e0   : > { %2212 = vst.msk [vmem:[#allocation2 + $0x148] sm:$0xff] %vm593_vm2, %v2126_v12  ;;  %2211 = vst.msk [vmem:[#allocation2 + $0x140] sm:$0xff] %vm593_vm2, %v2124_v63 }
 0x2e1   : > { %3295 = vrot.lane.b32.xlu1 %v6251_v41, %s4734_s9  ;;  %3293 = vrot.lane.b32.xlu0 %v6254_v45, %s4734_s9 }
 0x2e3   : > { %v2130_v38 = vpop.permute.xlu1 %2129  ;;  %v2128_v15 = vpop.permute.xlu0 %2127 }
 0x2e4   : > { %2214 = vst.msk [vmem:[#allocation2 + $0x158] sm:$0xff] %vm593_vm2, %v2130_v38  ;;  %2213 = vst.msk [vmem:[#allocation2 + $0x150] sm:$0xff] %vm593_vm2, %v2128_v15  ;;  %v4346_v38 = vld [vmem:[%s4810_s28 + $0x21a] sm:$0xff]  ;;  %v4345_v15 = vld [vmem:[%s4810_s28 + $0x212] sm:$0xff] }
 0x2e5   : > { %3263 = vrot.lane.b32.xlu1 %v6173_v8, %s4734_s9  ;;  %3261 = vrot.lane.b32.xlu0 %v6176_v19, %s4734_s9 }
 0x2e7   : > { %v2134_v55 = vpop.permute.xlu1 %2133  ;;  %v2132_v13 = vpop.permute.xlu0 %2131 }
 0x2e8   : > { %2216 = vst.msk [vmem:[#allocation2 + $0x168] sm:$0xff] %vm593_vm2, %v2134_v55  ;;  %2215 = vst.msk [vmem:[#allocation2 + $0x160] sm:$0xff] %vm593_vm2, %v2132_v13 }
 0x2e9   : > { %2338 = vrot.lane.b32.xlu1 %v6023_v36, %s4729_s4  ;;  %2336 = vrot.lane.b32.xlu0 %v6030_v39, %s4729_s4 }
 0x2eb   : > { %v2138_v23 = vpop.permute.xlu1 %2137  ;;  %v2136_v24 = vpop.permute.xlu0 %2135 }
 0x2ec   : > { %2218 = vst.msk [vmem:[#allocation2 + $0x178] sm:$0xff] %vm593_vm2, %v2138_v23  ;;  %2217 = vst.msk [vmem:[#allocation2 + $0x170] sm:$0xff] %vm593_vm2, %v2136_v24 }
 0x2ed   : > { %2530 = vrot.lane.b32.xlu1 %v6080_v18, %s4730_s5  ;;  %2528 = vrot.lane.b32.xlu0 %v6083_v29, %s4730_s5 }
 0x2ef   : > { %v2142_v32 = vpop.permute.xlu1 %2141  ;;  %v2140_v34 = vpop.permute.xlu0 %2139 }
 0x2f0   : > { %2220 = vst.msk [vmem:[#allocation2 + $0x188] sm:$0xff] %vm593_vm2, %v2142_v32  ;;  %2219 = vst.msk [vmem:[#allocation2 + $0x180] sm:$0xff] %vm593_vm2, %v2140_v34 }
 0x2f1   : > { %2498 = vrot.lane.b32.xlu1 %v4216_v31, %s4730_s5  ;;  %2496 = vrot.lane.b32.xlu0 %v4215_v56, %s4730_s5 }
 0x2f3   : > { %v2146_v36 = vpop.permute.xlu1 %2145  ;;  %v2144_v39 = vpop.permute.xlu0 %2143 }
 0x2f4   : > { %2222 = vst.msk [vmem:[#allocation2 + $0x198] sm:$0xff] %vm593_vm2, %v2146_v36  ;;  %2221 = vst.msk [vmem:[#allocation2 + $0x190] sm:$0xff] %vm593_vm2, %v2144_v39 }
 0x2f5   : > { %2722 = vrot.lane.b32.xlu1 %v6251_v41, %s4731_s6  ;;  %2720 = vrot.lane.b32.xlu0 %v6254_v45, %s4731_s6 }
 0x2f7   : > { %v2150_v18 = vpop.permute.xlu1 %2149  ;;  %v2148_v29 = vpop.permute.xlu0 %2147 }
 0x2f8   : > { %2224 = vst.msk [vmem:[#allocation2 + $0x1a8] sm:$0xff] %vm593_vm2, %v2150_v18  ;;  %2223 = vst.msk [vmem:[#allocation2 + $0x1a0] sm:$0xff] %vm593_vm2, %v2148_v29 }
 0x2f9   : > { %2690 = vrot.lane.b32.xlu1 %v6173_v8, %s4731_s6  ;;  %2688 = vrot.lane.b32.xlu0 %v6176_v19, %s4731_s6 }
 0x2fb   : > { %v2154_v10 = vpop.permute.xlu1 %2153  ;;  %v2152_v35 = vpop.permute.xlu0 %2151 }
 0x2fc   : > { %2226 = vst.msk [vmem:[#allocation2 + $0x1b8] sm:$0xff] %vm593_vm2, %v2154_v10  ;;  %2225 = vst.msk [vmem:[#allocation2 + $0x1b0] sm:$0xff] %vm593_vm2, %v2152_v35  ;;  %v4332_v35 = vld [vmem:[%s4810_s28 + $0x2f1] sm:$0xff] }
 0x2fd   : > { %2915 = vrot.lane.b32.xlu1 %v6039_v44, %s4732_s7  ;;  %2913 = vrot.lane.b32.xlu0 %v6046_v49, %s4732_s7 }
 0x2ff   : > { %v2158_v41 = vpop.permute.xlu1 %2157  ;;  %v2156_v45 = vpop.permute.xlu0 %2155 }
 0x300   : > { %2228 = vst.msk [vmem:[#allocation2 + $0x1c8] sm:$0xff] %vm593_vm2, %v2158_v41  ;;  %2227 = vst.msk [vmem:[#allocation2 + $0x1c0] sm:$0xff] %vm593_vm2, %v2156_v45  ;;  %v4331_v41 = vld [vmem:[%s4810_s28 + $0x2e9] sm:$0xff] }
 0x301   : > { %2883 = vrot.lane.b32.xlu1 %v5899_v4, %s4732_s7  ;;  %2881 = vrot.lane.b32.xlu0 %v5906_v21, %s4732_s7 }
 0x303   : > { %v2162_v8 = vpop.permute.xlu1 %2161  ;;  %v2160_v19 = vpop.permute.xlu0 %2159 }
 0x304   : > { %2230 = vst.msk [vmem:[#allocation2 + $0x1d8] sm:$0xff] %vm593_vm2, %v2162_v8  ;;  %2229 = vst.msk [vmem:[#allocation2 + $0x1d0] sm:$0xff] %vm593_vm2, %v2160_v19 }
 0x305   : > { %3107 = vrot.lane.b32.xlu1 %v6102_v59, %s4733_s8  ;;  %3105 = vrot.lane.b32.xlu0 %v6105_v2, %s4733_s8 }
 0x307   : > { %v2166_v58 = vpop.permute.xlu1 %2165  ;;  %v2164_v7 = vpop.permute.xlu0 %2163 }
 0x308   : > { %2232 = vst.msk [vmem:[#allocation2 + $0x1e8] sm:$0xff] %vm593_vm2, %v2166_v58  ;;  %2231 = vst.msk [vmem:[#allocation2 + $0x1e0] sm:$0xff] %vm593_vm2, %v2164_v7 }
 0x309   : > { %3075 = vrot.lane.b32.xlu1 %v4312_v52, %s4733_s8  ;;  %3073 = vrot.lane.b32.xlu0 %v4311_v30, %s4733_s8 }
 0x30b   : > { %v2170_v4 = vpop.permute.xlu1 %2169  ;;  %v2168_v21 = vpop.permute.xlu0 %2167 }
 0x30c   : > { %2234 = vst.msk [vmem:[#allocation2 + $0x1f8] sm:$0xff] %vm593_vm2, %v2170_v4  ;;  %2233 = vst.msk [vmem:[#allocation2 + $0x1f0] sm:$0xff] %vm593_vm2, %v2168_v21 }
 0x30d   : > { %3299 = vrot.lane.b32.xlu1 %v6267_v53, %s4734_s9  ;;  %3297 = vrot.lane.b32.xlu0 %v6270_v14, %s4734_s9 }
 0x30f   : > { %v2303_v59 = vpop.permute.xlu1 %2302  ;;  %v2301_v2 = vpop.permute.xlu0 %2300 }
 0x310   : > { %2397 = vst.msk [vmem:[#allocation2 + $0x108] sm:$0xff] %vm787_vm3, %v2303_v59  ;;  %2396 = vst.msk [vmem:[#allocation2 + $0x100] sm:$0xff] %vm787_vm3, %v2301_v2  ;;  %v4364_v2 = vld [vmem:[%s4810_s28 + $0x2f2] sm:$0xff] }
 0x311   : > { %3267 = vrot.lane.b32.xlu1 %v6185_v26, %s4734_s9  ;;  %3265 = vrot.lane.b32.xlu0 %v6188_v27, %s4734_s9 }
 0x313   : > { %v2307_v62 = vpop.permute.xlu1 %2306  ;;  %v2305_v9 = vpop.permute.xlu0 %2304 }
 0x314   : > { %2399 = vst.msk [vmem:[#allocation2 + $0x118] sm:$0xff] %vm787_vm3, %v2307_v62  ;;  %2398 = vst.msk [vmem:[#allocation2 + $0x110] sm:$0xff] %vm787_vm3, %v2305_v9  ;;  %v4363_v62 = vld [vmem:[%s4810_s28 + $0x2ea] sm:$0xff] }
 0x315   : > { %2342 = vrot.lane.b32.xlu1 %v6039_v44, %s4729_s4  ;;  %2340 = vrot.lane.b32.xlu0 %v6046_v49, %s4729_s4 }
 0x317   : > { %v2311_v28 = vpop.permute.xlu1 %2310  ;;  %v2309_v33 = vpop.permute.xlu0 %2308 }
 0x318   : > { %2401 = vst.msk [vmem:[#allocation2 + $0x128] sm:$0xff] %vm787_vm3, %v2311_v28  ;;  %2400 = vst.msk [vmem:[#allocation2 + $0x120] sm:$0xff] %vm787_vm3, %v2309_v33  ;;  %v4347_v28 = vld [vmem:[%s4810_s28 + $0x22a] sm:$0xff] }
 0x319   : > { %2534 = vrot.lane.b32.xlu1 %v4234_v22, %s4730_s5  ;;  %2532 = vrot.lane.b32.xlu0 %v4233_v25, %s4730_s5  ;;  %v4348_v25 = vld [vmem:[%s4810_s28 + $0x232] sm:$0xff] }
 0x31b   : > { %v2315_v11 = vpop.permute.xlu1 %2314  ;;  %v2313_v16 = vpop.permute.xlu0 %2312 }
 0x31c   : > { %2403 = vst.msk [vmem:[#allocation2 + $0x138] sm:$0xff] %vm787_vm3, %v2315_v11  ;;  %2402 = vst.msk [vmem:[#allocation2 + $0x130] sm:$0xff] %vm787_vm3, %v2313_v16 }
 0x31d   : > { %2502 = vrot.lane.b32.xlu1 %v4312_v52, %s4730_s5  ;;  %2500 = vrot.lane.b32.xlu0 %v4311_v30, %s4730_s5 }
 0x31f   : > { %v2319_v44 = vpop.permute.xlu1 %2318  ;;  %v2317_v49 = vpop.permute.xlu0 %2316 }
 0x320   : > { %2405 = vst.msk [vmem:[#allocation2 + $0x148] sm:$0xff] %vm787_vm3, %v2319_v44  ;;  %2404 = vst.msk [vmem:[#allocation2 + $0x140] sm:$0xff] %vm787_vm3, %v2317_v49 }
 0x321   : > { %2726 = vrot.lane.b32.xlu1 %v6267_v53, %s4731_s6  ;;  %2724 = vrot.lane.b32.xlu0 %v6270_v14, %s4731_s6 }
 0x323   : > { %v2323_v43 = vpop.permute.xlu1 %2322  ;;  %v2321_v46 = vpop.permute.xlu0 %2320 }
 0x324   : > { %2407 = vst.msk [vmem:[#allocation2 + $0x158] sm:$0xff] %vm787_vm3, %v2323_v43  ;;  %2406 = vst.msk [vmem:[#allocation2 + $0x150] sm:$0xff] %vm787_vm3, %v2321_v46 }
 0x325   : > { %2694 = vrot.lane.b32.xlu1 %v6185_v26, %s4731_s6  ;;  %2692 = vrot.lane.b32.xlu0 %v6188_v27, %s4731_s6  ;;  %v4330_v26 = vld [vmem:[%s4810_s28 + $0x2d9] sm:$0xff]  ;;  %v4329_v27 = vld [vmem:[%s4810_s28 + $0x2d1] sm:$0xff] }
 0x327   : > { %v2327_v3 = vpop.permute.xlu1 %2326  ;;  %v2325_v61 = vpop.permute.xlu0 %2324 }
 0x328   : > { %2409 = vst.msk [vmem:[#allocation2 + $0x168] sm:$0xff] %vm787_vm3, %v2327_v3  ;;  %2408 = vst.msk [vmem:[#allocation2 + $0x160] sm:$0xff] %vm787_vm3, %v2325_v61 }
 0x329   : > { %2919 = vrot.lane.b32.xlu1 %v6055_v57, %s4732_s7  ;;  %2917 = vrot.lane.b32.xlu0 %v6066_v60, %s4732_s7 }
 0x32b   : > { %v2331_v53 = vpop.permute.xlu1 %2330  ;;  %v2329_v14 = vpop.permute.xlu0 %2328 }
 0x32c   : > { %2411 = vst.msk [vmem:[#allocation2 + $0x178] sm:$0xff] %vm787_vm3, %v2331_v53  ;;  %2410 = vst.msk [vmem:[#allocation2 + $0x170] sm:$0xff] %vm787_vm3, %v2329_v14 }
 0x32d   : > { %2887 = vrot.lane.b32.xlu1 %v5915_v42, %s4732_s7  ;;  %2885 = vrot.lane.b32.xlu0 %v5926_v47, %s4732_s7 }
 0x32f   : > { %v2335_v50 = vpop.permute.xlu1 %2334  ;;  %v2333_v51 = vpop.permute.xlu0 %2332 }
 0x330   : > { %2413 = vst.msk [vmem:[#allocation2 + $0x188] sm:$0xff] %vm787_vm3, %v2335_v50  ;;  %2412 = vst.msk [vmem:[#allocation2 + $0x180] sm:$0xff] %vm787_vm3, %v2333_v51  ;;  %v7133_v50 = vld [vmem:[#allocation7_spill] sm:$0xff]  ;;  %v7134_v51 = vld [vmem:[#allocation8_spill] sm:$0xff] }
 0x331   : > { %3111 = vrot.lane.b32.xlu1 %v4330_v26, %s4733_s8  ;;  %3109 = vrot.lane.b32.xlu0 %v4329_v27, %s4733_s8 }
 0x333   : > { %v2527_v42 = vpop.permute.xlu1 %2526  ;;  %v2525_v12 = vpop.permute.xlu0 %2524 }
 0x334   : > { %2605 = vst.msk [vmem:[#allocation2 + $0x188] sm:$0xff] %vm980_vm4, %v2527_v42  ;;  %2604 = vst.msk [vmem:[#allocation2 + $0x180] sm:$0xff] %vm980_vm4, %v2525_v12  ;;  %v4334_v42 = vld [vmem:[%s4810_s28 + $0x309] sm:$0xff]  ;;  %v4333_v12 = vld [vmem:[%s4810_s28 + $0x301] sm:$0xff] }
 0x335   : > { %3079 = vrot.lane.b32.xlu1 %v4314_v1, %s4733_s8  ;;  %3077 = vrot.lane.b32.xlu0 %v4313_v20, %s4733_s8 }
 0x337   : > { %v2495_v47 = vpop.permute.xlu1 %2494  ;;  %v2493_v63 = vpop.permute.xlu0 %2492 }
 0x338   : > { %2589 = vst.msk [vmem:[#allocation2 + $0x108] sm:$0xff] %vm980_vm4, %v2495_v47  ;;  %2588 = vst.msk [vmem:[#allocation2 + $0x100] sm:$0xff] %vm980_vm4, %v2493_v63 }
 0x339   : > { %3303 = vrot.lane.b32.xlu1 %v6279_v40, %s4734_s9  ;;  %3301 = vrot.lane.b32.xlu0 %v6282_v48, %s4734_s9 }
 0x33b   : > { %v2719_v55 = vpop.permute.xlu1 %2718  ;;  %v2717_v13 = vpop.permute.xlu0 %2716 }
 0x33c   : > { %2797 = vst.msk [vmem:[#allocation2 + $0x188] sm:$0xff] %vm1173_vm5, %v2719_v55  ;;  %2796 = vst.msk [vmem:[#allocation2 + $0x180] sm:$0xff] %vm1173_vm5, %v2717_v13 }
 0x33d   : > { %3271 = vrot.lane.b32.xlu1 %v4346_v38, %s4734_s9  ;;  %3269 = vrot.lane.b32.xlu0 %v4345_v15, %s4734_s9 }
 0x33f   : > { %v2687_v23 = vpop.permute.xlu1 %2686  ;;  %v2685_v24 = vpop.permute.xlu0 %2684 }
 0x340   : > { %2781 = vst.msk [vmem:[#allocation2 + $0x108] sm:$0xff] %vm1173_vm5, %v2687_v23  ;;  %2780 = vst.msk [vmem:[#allocation2 + $0x100] sm:$0xff] %vm1173_vm5, %v2685_v24 }
 0x341   : > { %2346 = vrot.lane.b32.xlu1 %v6055_v57, %s4729_s4  ;;  %2344 = vrot.lane.b32.xlu0 %v6066_v60, %s4729_s4 }
 0x343   : > { %v2912_v31 = vpop.permute.xlu1 %2911  ;;  %v2910_v56 = vpop.permute.xlu0 %2909 }
 0x344   : > { %2990 = vst.msk [vmem:[#allocation2 + $0x188] sm:$0xff] %vm1367_vm6, %v2912_v31  ;;  %2989 = vst.msk [vmem:[#allocation2 + $0x180] sm:$0xff] %vm1367_vm6, %v2910_v56 }
 0x345   : > { %2538 = vrot.lane.b32.xlu1 %v4330_v26, %s4730_s5  ;;  %2536 = vrot.lane.b32.xlu0 %v4329_v27, %s4730_s5 }
 0x347   : > { %v2880_v32 = vpop.permute.xlu1 %2879  ;;  %v2878_v34 = vpop.permute.xlu0 %2877 }
 0x348   : > { %2974 = vst.msk [vmem:[#allocation2 + $0x108] sm:$0xff] %vm1367_vm6, %v2880_v32  ;;  %2973 = vst.msk [vmem:[#allocation2 + $0x100] sm:$0xff] %vm1367_vm6, %v2878_v34  ;;  %v4366_v32 = vld [vmem:[%s4810_s28 + $0x30a] sm:$0xff]  ;;  %v4365_v34 = vld [vmem:[%s4810_s28 + $0x302] sm:$0xff] }
 0x349   : > { %2506 = vrot.lane.b32.xlu1 %v4314_v1, %s4730_s5  ;;  %2504 = vrot.lane.b32.xlu0 %v4313_v20, %s4730_s5 }
 0x34b   : > { %v3104_v57 = vpop.permute.xlu1 %3103  ;;  %v3102_v60 = vpop.permute.xlu0 %3101 }
 0x34c   : > { %3182 = vst.msk [vmem:[#allocation2 + $0x188] sm:$0xff] %vm1560_vm7, %v3104_v57  ;;  %3181 = vst.msk [vmem:[#allocation2 + $0x180] sm:$0xff] %vm1560_vm7, %v3102_v60 }
 0x34d   : > { %2730 = vrot.lane.b32.xlu1 %v6279_v40, %s4731_s6  ;;  %2728 = vrot.lane.b32.xlu0 %v6282_v48, %s4731_s6  ;;  %v7132_v40 = vld [vmem:[#allocation6_spill] sm:$0xff] }
 0x34f   : > { %v3072_v36 = vpop.permute.xlu1 %3071  ;;  %v3070_v39 = vpop.permute.xlu0 %3069 }
 0x350   : > { %3166 = vst.msk [vmem:[#allocation2 + $0x108] sm:$0xff] %vm1560_vm7, %v3072_v36  ;;  %3165 = vst.msk [vmem:[#allocation2 + $0x100] sm:$0xff] %vm1560_vm7, %v3070_v39  ;;  %v4350_v36 = vld [vmem:[%s4810_s28 + $0x24a] sm:$0xff]  ;;  %v4349_v39 = vld [vmem:[%s4810_s28 + $0x242] sm:$0xff] }
 0x351   : > { %2698 = vrot.lane.b32.xlu1 %v4346_v38, %s4731_s6  ;;  %2696 = vrot.lane.b32.xlu0 %v4345_v15, %s4731_s6 }
 0x353   : > { %v3296_v18 = vpop.permute.xlu1 %3295  ;;  %v3294_v29 = vpop.permute.xlu0 %3293 }
 0x354   : > { %3374 = vst.msk [vmem:[#allocation2 + $0x188] sm:$0xff] %vm1753_vm8, %v3296_v18  ;;  %3373 = vst.msk [vmem:[#allocation2 + $0x180] sm:$0xff] %vm1753_vm8, %v3294_v29 }
 0x355   : > { %2923 = vrot.lane.b32.xlu1 %v6077_v5, %s4732_s7  ;;  %2921 = vrot.lane.b32.xlu0 %v7132_v40, %s4732_s7 }
 0x357   : > { %v3264_v48 = vpop.permute.xlu1 %3263  ;;  %v3262_v10 = vpop.permute.xlu0 %3261 }
 0x358   : > { %3358 = vst.msk [vmem:[#allocation2 + $0x108] sm:$0xff] %vm1753_vm8, %v3264_v48  ;;  %3357 = vst.msk [vmem:[#allocation2 + $0x100] sm:$0xff] %vm1753_vm8, %v3262_v10 }
 0x359   : > { %2891 = vrot.lane.b32.xlu1 %v5937_v54, %s4732_s7  ;;  %2889 = vrot.lane.b32.xlu0 %v5948_v17, %s4732_s7  ;;  %v4316_v54 = vld [vmem:[%s4810_s28 + $0x231] sm:$0xff]  ;;  %v4315_v17 = vld [vmem:[%s4810_s28 + $0x229] sm:$0xff] }
 0x35b   : > { %v2339_v45 = vpop.permute.xlu1 %2338  ;;  %v2337_v8 = vpop.permute.xlu0 %2336  ;;  %v3438_v19 = vld [vmem:[#allocation2 + $0x180] sm:$0xff]  ;;  %v3439_v52 = vld [vmem:[#allocation2 + $0x188] sm:$0xff] }
 0x35c   : > { %2415 = vst.msk [vmem:[#allocation2 + $0x198] sm:$0xff] %vm787_vm3, %v2339_v45  ;;  %2414 = vst.msk [vmem:[#allocation2 + $0x190] sm:$0xff] %vm787_vm3, %v2337_v8  ;;  %v4564_v30 = vpack.c.bf16 %v3439_v52, %v3438_v19 }
 0x35d   : > { %3115 = vrot.lane.b32.xlu1 %v4332_v35, %s4733_s8  ;;  %3113 = vrot.lane.b32.xlu0 %v4331_v41, %s4733_s8 }
 0x35e   : > { %4566 = vmatprep.subr.msk.bf16.mxu1 %vm6218_vm10, %v4564_v30 }
 0x35f   : > { %v2531_v58 = vpop.permute.xlu1 %2530  ;;  %v2529_v7 = vpop.permute.xlu0 %2528  ;;  %v3422_v4 = vld [vmem:[#allocation2 + $0x100] sm:$0xff]  ;;  %v3423_v21 = vld [vmem:[#allocation2 + $0x108] sm:$0xff] }
 0x360   : > { %2607 = vst.msk [vmem:[#allocation2 + $0x198] sm:$0xff] %vm980_vm4, %v2531_v58  ;;  %2606 = vst.msk [vmem:[#allocation2 + $0x190] sm:$0xff] %vm980_vm4, %v2529_v7  ;;  %v4567_v59 = vpack.c.bf16 %v3423_v21, %v3422_v4  ;;  %v7135_v58 = vld [vmem:[#allocation9_spill] sm:$0xff]  ;;  %v7136_v7 = vld [vmem:[#allocation10_spill] sm:$0xff] }
 0x361   : > { %3083 = vrot.lane.b32.xlu1 %v4316_v54, %s4733_s8  ;;  %3081 = vrot.lane.b32.xlu0 %v4315_v17, %s4733_s8  ;;  %v4288_v4 = vld [vmem:[%s4810_s28 + $0x260] sm:$0xff]  ;;  %v4287_v21 = vld [vmem:[%s4810_s28 + $0x258] sm:$0xff] }
 0x362   : > { %4569 = vmatpush3.bf16.xpose.msk.msra.mxu1 %vm6218_vm10, %v4567_v59 }
 0x363   : > { %v2499_v9 = vpop.permute.xlu1 %2498  ;;  %v2497_v22 = vpop.permute.xlu0 %2496 }
 0x364   : > { %2591 = vst.msk [vmem:[#allocation2 + $0x118] sm:$0xff] %vm980_vm4, %v2499_v9  ;;  %2590 = vst.msk [vmem:[#allocation2 + $0x110] sm:$0xff] %vm980_vm4, %v2497_v22  ;;  %v4335_v9 = vld [vmem:[%s4810_s28 + $0x319] sm:$0xff] }
 0x365   : > { %3307 = vrot.lane.b32.xlu1 %v4364_v2, %s4734_s9  ;;  %3305 = vrot.lane.b32.xlu0 %v4363_v62, %s4734_s9 }
 0x367   : > { %v2723_v33 = vpop.permute.xlu1 %2722  ;;  %v2721_v11 = vpop.permute.xlu0 %2720 }
 0x368   : > { %2799 = vst.msk [vmem:[#allocation2 + $0x198] sm:$0xff] %vm1173_vm5, %v2723_v33  ;;  %2798 = vst.msk [vmem:[#allocation2 + $0x190] sm:$0xff] %vm1173_vm5, %v2721_v11 }
 0x369   : > { %3275 = vrot.lane.b32.xlu1 %v4348_v25, %s4734_s9  ;;  %3273 = vrot.lane.b32.xlu0 %v4347_v28, %s4734_s9 }
 0x36b   : > { %v2691_v16 = vpop.permute.xlu1 %2690  ;;  %v2689_v44 = vpop.permute.xlu0 %2688 }
 0x36c   : > { %2783 = vst.msk [vmem:[#allocation2 + $0x118] sm:$0xff] %vm1173_vm5, %v2691_v16  ;;  %2782 = vst.msk [vmem:[#allocation2 + $0x110] sm:$0xff] %vm1173_vm5, %v2689_v44  ;;  %v4320_v16 = vld [vmem:[%s4810_s28 + $0x261] sm:$0xff]  ;;  %v4319_v44 = vld [vmem:[%s4810_s28 + $0x259] sm:$0xff] }
 0x36d   : > { %2350 = vrot.lane.b32.xlu1 %v6077_v5, %s4729_s4  ;;  %2348 = vrot.lane.b32.xlu0 %v7132_v40, %s4729_s4 }
 0x36f   : > { %v2916_v49 = vpop.permute.xlu1 %2915  ;;  %v2914_v43 = vpop.permute.xlu0 %2913 }
 0x370   : > { %2992 = vst.msk [vmem:[#allocation2 + $0x198] sm:$0xff] %vm1367_vm6, %v2916_v49  ;;  %2991 = vst.msk [vmem:[#allocation2 + $0x190] sm:$0xff] %vm1367_vm6, %v2914_v43 }
 0x371   : > { %2542 = vrot.lane.b32.xlu1 %v4332_v35, %s4730_s5  ;;  %2540 = vrot.lane.b32.xlu0 %v4331_v41, %s4730_s5 }
 0x373   : > { %v2884_v46 = vpop.permute.xlu1 %2883  ;;  %v2882_v3 = vpop.permute.xlu0 %2881 }
 0x374   : > { %2976 = vst.msk [vmem:[#allocation2 + $0x118] sm:$0xff] %vm1367_vm6, %v2884_v46  ;;  %2975 = vst.msk [vmem:[#allocation2 + $0x110] sm:$0xff] %vm1367_vm6, %v2882_v3 }
 0x375   : > { %2510 = vrot.lane.b32.xlu1 %v4316_v54, %s4730_s5  ;;  %2508 = vrot.lane.b32.xlu0 %v4315_v17, %s4730_s5 }
 0x377   : > { %v3108_v5 = vpop.permute.xlu1 %3107  ;;  %v3106_v61 = vpop.permute.xlu0 %3105 }
 0x378   : > { %3184 = vst.msk [vmem:[#allocation2 + $0x198] sm:$0xff] %vm1560_vm7, %v3108_v5  ;;  %3183 = vst.msk [vmem:[#allocation2 + $0x190] sm:$0xff] %vm1560_vm7, %v3106_v61  ;;  %v4368_v61 = vld [vmem:[%s4810_s28 + $0x322] sm:$0xff] }
 0x379   : > { %2734 = vrot.lane.b32.xlu1 %v4364_v2, %s4731_s6  ;;  %2732 = vrot.lane.b32.xlu0 %v4363_v62, %s4731_s6  ;;  %v4336_v62 = vld [vmem:[%s4810_s28 + $0x321] sm:$0xff] }
 0x37b   : > { %v3076_v53 = vpop.permute.xlu1 %3075  ;;  %v3074_v14 = vpop.permute.xlu0 %3073 }
 0x37c   : > { %3168 = vst.msk [vmem:[#allocation2 + $0x118] sm:$0xff] %vm1560_vm7, %v3076_v53  ;;  %3167 = vst.msk [vmem:[#allocation2 + $0x110] sm:$0xff] %vm1560_vm7, %v3074_v14  ;;  %v4367_v53 = vld [vmem:[%s4810_s28 + $0x31a] sm:$0xff] }
 0x37d   : > { %2702 = vrot.lane.b32.xlu1 %v4348_v25, %s4731_s6  ;;  %2700 = vrot.lane.b32.xlu0 %v4347_v28, %s4731_s6 }
 0x37f   : > { %v3300_v26 = vpop.permute.xlu1 %3299  ;;  %v3298_v27 = vpop.permute.xlu0 %3297 }
 0x380   : > { %3376 = vst.msk [vmem:[#allocation2 + $0x198] sm:$0xff] %vm1753_vm8, %v3300_v26  ;;  %3375 = vst.msk [vmem:[#allocation2 + $0x190] sm:$0xff] %vm1753_vm8, %v3298_v27  ;;  %v4352_v27 = vld [vmem:[%s4810_s28 + $0x262] sm:$0xff] }
 0x381   : > { %2927 = vrot.lane.b32.xlu1 %v7133_v50, %s4732_s7  ;;  %2925 = vrot.lane.b32.xlu0 %v7134_v51, %s4732_s7 }
 0x383   : > { %v3268_v1 = vpop.permute.xlu1 %3267  ;;  %v3266_v20 = vpop.permute.xlu0 %3265 }
 0x384   : > { %3360 = vst.msk [vmem:[#allocation2 + $0x118] sm:$0xff] %vm1753_vm8, %v3268_v1  ;;  %3359 = vst.msk [vmem:[#allocation2 + $0x110] sm:$0xff] %vm1753_vm8, %v3266_v20  ;;  %v4210_v20 = vld [vmem:[%s4810_s28 + $0x320] sm:$0xff] }
 0x385   : > { %2895 = vrot.lane.b32.xlu1 %v5959_v0, %s4732_s7  ;;  %2893 = vrot.lane.b32.xlu0 %v5966_v6, %s4732_s7  ;;  %v4318_v0 = vld [vmem:[%s4810_s28 + $0x249] sm:$0xff]  ;;  %v4317_v6 = vld [vmem:[%s4810_s28 + $0x241] sm:$0xff] }
 0x387   : > { %v2343_v47 = vpop.permute.xlu1 %2342  ;;  %v2341_v63 = vpop.permute.xlu0 %2340  ;;  %v3440_v38 = vld [vmem:[#allocation2 + $0x190] sm:$0xff]  ;;  %v3441_v15 = vld [vmem:[#allocation2 + $0x198] sm:$0xff] }
 0x388   : > { %2417 = vst.msk [vmem:[#allocation2 + $0x1a8] sm:$0xff] %vm787_vm3, %v2343_v47  ;;  %2416 = vst.msk [vmem:[#allocation2 + $0x1a0] sm:$0xff] %vm787_vm3, %v2341_v63  ;;  %v4570_v55 = vpack.c.bf16 %v3441_v15, %v3440_v38 }
 0x389   : > { %3119 = vrot.lane.b32.xlu1 %v4334_v42, %s4733_s8  ;;  %3117 = vrot.lane.b32.xlu0 %v4333_v12, %s4733_s8 }
 0x38a   : > { %4572 = vmatprep.subr.msk.bf16.mxu1 %vm6218_vm10, %v4570_v55 }
 0x38b   : > { %v2535_v13 = vpop.permute.xlu1 %2534  ;;  %v2533_v23 = vpop.permute.xlu0 %2532  ;;  %v3424_v24 = vld [vmem:[#allocation2 + $0x110] sm:$0xff]  ;;  %v3425_v31 = vld [vmem:[#allocation2 + $0x118] sm:$0xff] }
 0x38c   : > { %2609 = vst.msk [vmem:[#allocation2 + $0x1a8] sm:$0xff] %vm980_vm4, %v2535_v13  ;;  %2608 = vst.msk [vmem:[#allocation2 + $0x1a0] sm:$0xff] %vm980_vm4, %v2533_v23  ;;  %v4573_v56 = vpack.c.bf16 %v3425_v31, %v3424_v24  ;;  %v4306_v24 = vld [vmem:[%s4810_s28 + $0x338] sm:$0xff]  ;;  %v4305_v31 = vld [vmem:[%s4810_s28 + $0x330] sm:$0xff] }
 0x38d   : > { %3087 = vrot.lane.b32.xlu1 %v4318_v0, %s4733_s8  ;;  %3085 = vrot.lane.b32.xlu0 %v4317_v6, %s4733_s8 }
 0x38e   : > { %4575 = vmatpush3.bf16.xpose.msk.msra.mxu1 %vm6218_vm10, %v4573_v56 }
 0x38f   : > { %v2503_v57 = vpop.permute.xlu1 %2502  ;;  %v2501_v60 = vpop.permute.xlu0 %2500 }
 0x390   : > { %2593 = vst.msk [vmem:[#allocation2 + $0x128] sm:$0xff] %vm980_vm4, %v2503_v57  ;;  %2592 = vst.msk [vmem:[#allocation2 + $0x120] sm:$0xff] %vm980_vm4, %v2501_v60  ;;  %v4289_v57 = vld [vmem:[%s4810_s28 + $0x270] sm:$0xff] }
 0x391   : > { %3311 = vrot.lane.b32.xlu1 %v4366_v32, %s4734_s9  ;;  %3309 = vrot.lane.b32.xlu0 %v4365_v34, %s4734_s9 }
 0x393   : > { %v2727_v18 = vpop.permute.xlu1 %2726  ;;  %v2725_v29 = vpop.permute.xlu0 %2724 }
 0x394   : > { %2801 = vst.msk [vmem:[#allocation2 + $0x1a8] sm:$0xff] %vm1173_vm5, %v2727_v18  ;;  %2800 = vst.msk [vmem:[#allocation2 + $0x1a0] sm:$0xff] %vm1173_vm5, %v2725_v29  ;;  %v4337_v18 = vld [vmem:[%s4810_s28 + $0x331] sm:$0xff] }
 0x395   : > { %3279 = vrot.lane.b32.xlu1 %v4350_v36, %s4734_s9  ;;  %3277 = vrot.lane.b32.xlu0 %v4349_v39, %s4734_s9 }
 0x397   : > { %v2695_v40 = vpop.permute.xlu1 %2694  ;;  %v2693_v48 = vpop.permute.xlu0 %2692 }
 0x398   : > { %2785 = vst.msk [vmem:[#allocation2 + $0x128] sm:$0xff] %vm1173_vm5, %v2695_v40  ;;  %2784 = vst.msk [vmem:[#allocation2 + $0x120] sm:$0xff] %vm1173_vm5, %v2693_v48 }
 0x399   : > { %2354 = vrot.lane.b32.xlu1 %v7133_v50, %s4729_s4  ;;  %2352 = vrot.lane.b32.xlu0 %v7134_v51, %s4729_s4  ;;  %v4351_v50 = vld [vmem:[%s4810_s28 + $0x25a] sm:$0xff] }
 0x39b   : > { %v2920_v10 = vpop.permute.xlu1 %2919  ;;  %v2918_v35 = vpop.permute.xlu0 %2917 }
 0x39c   : > { %2994 = vst.msk [vmem:[#allocation2 + $0x1a8] sm:$0xff] %vm1367_vm6, %v2920_v10  ;;  %2993 = vst.msk [vmem:[#allocation2 + $0x1a0] sm:$0xff] %vm1367_vm6, %v2918_v35 }
 0x39d   : > { %2546 = vrot.lane.b32.xlu1 %v4334_v42, %s4730_s5  ;;  %2544 = vrot.lane.b32.xlu0 %v4333_v12, %s4730_s5  ;;  %v4209_v42 = vld [vmem:[%s4810_s28 + $0x318] sm:$0xff] }
 0x39f   : > { %v2888_v41 = vpop.permute.xlu1 %2887  ;;  %v2886_v45 = vpop.permute.xlu0 %2885 }
 0x3a0   : > { %2978 = vst.msk [vmem:[#allocation2 + $0x128] sm:$0xff] %vm1367_vm6, %v2888_v41  ;;  %2977 = vst.msk [vmem:[#allocation2 + $0x120] sm:$0xff] %vm1367_vm6, %v2886_v45  ;;  %v4322_v41 = vld [vmem:[%s4810_s28 + $0x279] sm:$0xff]  ;;  %v4321_v45 = vld [vmem:[%s4810_s28 + $0x271] sm:$0xff] }
 0x3a1   : > { %2514 = vrot.lane.b32.xlu1 %v4318_v0, %s4730_s5  ;;  %2512 = vrot.lane.b32.xlu0 %v4317_v6, %s4730_s5 }
 0x3a3   : > { %v3112_v8 = vpop.permute.xlu1 %3111  ;;  %v3110_v19 = vpop.permute.xlu0 %3109 }
 0x3a4   : > { %3186 = vst.msk [vmem:[#allocation2 + $0x1a8] sm:$0xff] %vm1560_vm7, %v3112_v8  ;;  %3185 = vst.msk [vmem:[#allocation2 + $0x1a0] sm:$0xff] %vm1560_vm7, %v3110_v19 }
 0x3a5   : > { %2738 = vrot.lane.b32.xlu1 %v4366_v32, %s4731_s6  ;;  %2736 = vrot.lane.b32.xlu0 %v4365_v34, %s4731_s6  ;;  %v4290_v34 = vld [vmem:[%s4810_s28 + $0x278] sm:$0xff] }
 0x3a7   : > { %v3080_v52 = vpop.permute.xlu1 %3079  ;;  %v3078_v30 = vpop.permute.xlu0 %3077 }
 0x3a8   : > { %3170 = vst.msk [vmem:[#allocation2 + $0x128] sm:$0xff] %vm1560_vm7, %v3080_v52  ;;  %3169 = vst.msk [vmem:[#allocation2 + $0x120] sm:$0xff] %vm1560_vm7, %v3078_v30 }
 0x3a9   : > { %2706 = vrot.lane.b32.xlu1 %v4350_v36, %s4731_s6  ;;  %2704 = vrot.lane.b32.xlu0 %v4349_v39, %s4731_s6  ;;  %v4338_v39 = vld [vmem:[%s4810_s28 + $0x339] sm:$0xff] }
 0x3ab   : > { %v3304_v54 = vpop.permute.xlu1 %3303  ;;  %v3302_v17 = vpop.permute.xlu0 %3301 }
 0x3ac   : > { %3378 = vst.msk [vmem:[#allocation2 + $0x1a8] sm:$0xff] %vm1753_vm8, %v3304_v54  ;;  %3377 = vst.msk [vmem:[#allocation2 + $0x1a0] sm:$0xff] %vm1753_vm8, %v3302_v17  ;;  %v4370_v17 = vld [vmem:[%s4810_s28 + $0x33a] sm:$0xff] }
 0x3ad   : > { %2931 = vrot.lane.b32.xlu1 %v7135_v58, %s4732_s7  ;;  %2929 = vrot.lane.b32.xlu0 %v7136_v7, %s4732_s7  ;;  %v4369_v58 = vld [vmem:[%s4810_s28 + $0x332] sm:$0xff] }
 0x3af   : > { %v3272_v59 = vpop.permute.xlu1 %3271  ;;  %v3270_v2 = vpop.permute.xlu0 %3269 }
 0x3b0   : > { %3362 = vst.msk [vmem:[#allocation2 + $0x128] sm:$0xff] %vm1753_vm8, %v3272_v59  ;;  %3361 = vst.msk [vmem:[#allocation2 + $0x120] sm:$0xff] %vm1753_vm8, %v3270_v2  ;;  %v4353_v59 = vld [vmem:[%s4810_s28 + $0x272] sm:$0xff] }
 0x3b1   : > { %2899 = vrot.lane.b32.xlu1 %v4288_v4, %s4732_s7  ;;  %2897 = vrot.lane.b32.xlu0 %v4287_v21, %s4732_s7  ;;  %v4354_v21 = vld [vmem:[%s4810_s28 + $0x27a] sm:$0xff] }
 0x3b3   : > { %v2347_v22 = vpop.permute.xlu1 %2346  ;;  %v2345_v25 = vpop.permute.xlu0 %2344  ;;  %v3442_v28 = vld [vmem:[#allocation2 + $0x1a0] sm:$0xff]  ;;  %v3443_v33 = vld [vmem:[#allocation2 + $0x1a8] sm:$0xff] }
 0x3b4   : > { %2419 = vst.msk [vmem:[#allocation2 + $0x1b8] sm:$0xff] %vm787_vm3, %v2347_v22  ;;  %2418 = vst.msk [vmem:[#allocation2 + $0x1b0] sm:$0xff] %vm787_vm3, %v2345_v25  ;;  %v4576_v11 = vpack.c.bf16 %v3443_v33, %v3442_v28 }
 0x3b5   : > { %3123 = vrot.lane.b32.xlu1 %v4336_v62, %s4733_s8  ;;  %3121 = vrot.lane.b32.xlu0 %v4335_v9, %s4733_s8 }
 0x3b6   : > { %4578 = vmatprep.subr.msk.bf16.mxu1 %vm6218_vm10, %v4576_v11 }
 0x3b7   : > { %v2539_v49 = vpop.permute.xlu1 %2538  ;;  %v2537_v43 = vpop.permute.xlu0 %2536  ;;  %v3426_v46 = vld [vmem:[#allocation2 + $0x120] sm:$0xff]  ;;  %v3427_v3 = vld [vmem:[#allocation2 + $0x128] sm:$0xff] }
 0x3b8   : > { %2611 = vst.msk [vmem:[#allocation2 + $0x1b8] sm:$0xff] %vm980_vm4, %v2539_v49  ;;  %2610 = vst.msk [vmem:[#allocation2 + $0x1b0] sm:$0xff] %vm980_vm4, %v2537_v43  ;;  %v4579_v5 = vpack.c.bf16 %v3427_v3, %v3426_v46  ;;  %v4308_v46 = vld [vmem:[%s4810_s28 + $0x350] sm:$0xff]  ;;  %v4307_v3 = vld [vmem:[%s4810_s28 + $0x348] sm:$0xff] }
 0x3b9   : > { %3091 = vrot.lane.b32.xlu1 %v4320_v16, %s4733_s8  ;;  %3089 = vrot.lane.b32.xlu0 %v4319_v44, %s4733_s8 }
 0x3ba   : > { %4581 = vmatpush3.bf16.xpose.msk.msra.mxu1 %vm6218_vm10, %v4579_v5 }
 0x3bb   : > { %v2507_v14 = vpop.permute.xlu1 %2506  ;;  %v2505_v26 = vpop.permute.xlu0 %2504 }
 0x3bc   : > { %2595 = vst.msk [vmem:[#allocation2 + $0x138] sm:$0xff] %vm980_vm4, %v2507_v14  ;;  %2594 = vst.msk [vmem:[#allocation2 + $0x130] sm:$0xff] %vm980_vm4, %v2505_v26  ;;  %v4291_v14 = vld [vmem:[%s4810_s28 + $0x288] sm:$0xff] }
 0x3bd   : > { %3315 = vrot.lane.b32.xlu1 %v4368_v61, %s4734_s9  ;;  %3313 = vrot.lane.b32.xlu0 %v4367_v53, %s4734_s9 }
 0x3bf   : > { %v2731_v51 = vpop.permute.xlu1 %2730  ;;  %v2729_v1 = vpop.permute.xlu0 %2728 }
 0x3c0   : > { %2803 = vst.msk [vmem:[#allocation2 + $0x1b8] sm:$0xff] %vm1173_vm5, %v2731_v51  ;;  %2802 = vst.msk [vmem:[#allocation2 + $0x1b0] sm:$0xff] %vm1173_vm5, %v2729_v1  ;;  %v4339_v51 = vld [vmem:[%s4810_s28 + $0x349] sm:$0xff] }
 0x3c1   : > { %3283 = vrot.lane.b32.xlu1 %v4352_v27, %s4734_s9  ;;  %3281 = vrot.lane.b32.xlu0 %v4351_v50, %s4734_s9 }
 0x3c3   : > { %v2699_v12 = vpop.permute.xlu1 %2698  ;;  %v2697_v47 = vpop.permute.xlu0 %2696 }
 0x3c4   : > { %2787 = vst.msk [vmem:[#allocation2 + $0x138] sm:$0xff] %vm1173_vm5, %v2699_v12  ;;  %2786 = vst.msk [vmem:[#allocation2 + $0x130] sm:$0xff] %vm1173_vm5, %v2697_v47 }
 0x3c5   : > { %2358 = vrot.lane.b32.xlu1 %v4210_v20, %s4729_s4  ;;  %2356 = vrot.lane.b32.xlu0 %v4209_v42, %s4729_s4 }
 0x3c7   : > { %v2924_v63 = vpop.permute.xlu1 %2923  ;;  %v2922_v38 = vpop.permute.xlu0 %2921 }
 0x3c8   : > { %2996 = vst.msk [vmem:[#allocation2 + $0x1b8] sm:$0xff] %vm1367_vm6, %v2924_v63  ;;  %2995 = vst.msk [vmem:[#allocation2 + $0x1b0] sm:$0xff] %vm1367_vm6, %v2922_v38  ;;  %v4324_v63 = vld [vmem:[%s4810_s28 + $0x291] sm:$0xff]  ;;  %v4323_v38 = vld [vmem:[%s4810_s28 + $0x289] sm:$0xff] }
 0x3c9   : > { %2550 = vrot.lane.b32.xlu1 %v4336_v62, %s4730_s5  ;;  %2548 = vrot.lane.b32.xlu0 %v4335_v9, %s4730_s5 }
 0x3cb   : > { %v2892_v15 = vpop.permute.xlu1 %2891  ;;  %v2890_v55 = vpop.permute.xlu0 %2889 }
 0x3cc   : > { %2980 = vst.msk [vmem:[#allocation2 + $0x138] sm:$0xff] %vm1367_vm6, %v2892_v15  ;;  %2979 = vst.msk [vmem:[#allocation2 + $0x130] sm:$0xff] %vm1367_vm6, %v2890_v55 }
 0x3cd   : > { %2518 = vrot.lane.b32.xlu1 %v4320_v16, %s4730_s5  ;;  %2516 = vrot.lane.b32.xlu0 %v4319_v44, %s4730_s5 }
 0x3cf   : > { %v3116_v0 = vpop.permute.xlu1 %3115  ;;  %v3114_v6 = vpop.permute.xlu0 %3113 }
 0x3d0   : > { %3188 = vst.msk [vmem:[#allocation2 + $0x1b8] sm:$0xff] %vm1560_vm7, %v3116_v0  ;;  %3187 = vst.msk [vmem:[#allocation2 + $0x1b0] sm:$0xff] %vm1560_vm7, %v3114_v6 }
 0x3d1   : > { %2742 = vrot.lane.b32.xlu1 %v4368_v61, %s4731_s6  ;;  %2740 = vrot.lane.b32.xlu0 %v4367_v53, %s4731_s6  ;;  %v4292_v53 = vld [vmem:[%s4810_s28 + $0x290] sm:$0xff] }
 0x3d3   : > { %v3084_v13 = vpop.permute.xlu1 %3083  ;;  %v3082_v23 = vpop.permute.xlu0 %3081 }
 0x3d4   : > { %3172 = vst.msk [vmem:[#allocation2 + $0x138] sm:$0xff] %vm1560_vm7, %v3084_v13  ;;  %3171 = vst.msk [vmem:[#allocation2 + $0x130] sm:$0xff] %vm1560_vm7, %v3082_v23  ;;  %v4372_v23 = vld [vmem:[%s4810_s28 + $0x352] sm:$0xff] }
 0x3d5   : > { %2710 = vrot.lane.b32.xlu1 %v4352_v27, %s4731_s6  ;;  %2708 = vrot.lane.b32.xlu0 %v4351_v50, %s4731_s6  ;;  %v4340_v50 = vld [vmem:[%s4810_s28 + $0x351] sm:$0xff] }
 0x3d7   : > { %v3308_v56 = vpop.permute.xlu1 %3307  ;;  %v3306_v32 = vpop.permute.xlu0 %3305 }
 0x3d8   : > { %3380 = vst.msk [vmem:[#allocation2 + $0x1b8] sm:$0xff] %vm1753_vm8, %v3308_v56  ;;  %3379 = vst.msk [vmem:[#allocation2 + $0x1b0] sm:$0xff] %vm1753_vm8, %v3306_v32  ;;  %v4356_v32 = vld [vmem:[%s4810_s28 + $0x292] sm:$0xff] }
 0x3d9   : > { %2935 = vrot.lane.b32.xlu1 %v4306_v24, %s4732_s7  ;;  %2933 = vrot.lane.b32.xlu0 %v4305_v31, %s4732_s7 }
 0x3db   : > { %v3276_v60 = vpop.permute.xlu1 %3275  ;;  %v3274_v36 = vpop.permute.xlu0 %3273 }
 0x3dc   : > { %3364 = vst.msk [vmem:[#allocation2 + $0x138] sm:$0xff] %vm1753_vm8, %v3276_v60  ;;  %3363 = vst.msk [vmem:[#allocation2 + $0x130] sm:$0xff] %vm1753_vm8, %v3274_v36 }
 0x3dd   : > { %2903 = vrot.lane.b32.xlu1 %v4290_v34, %s4732_s7  ;;  %2901 = vrot.lane.b32.xlu0 %v4289_v57, %s4732_s7  ;;  %v4355_v34 = vld [vmem:[%s4810_s28 + $0x28a] sm:$0xff]  ;;  %v6883_v57 = vld [vmem:[%s7022_s1] sm:$0xf] }
 0x3de   : > { %4480 = vmatprep.mubr.msk.f32.mxu0 %vm3460_vm9, %v6883_v57  ;;  %4514 = vmatprep.mubr.msk.f32.mxu1 %vm3460_vm9, %v6883_v57 }
 0x3df   : > { %v2351_v29 = vpop.permute.xlu1 %2350  ;;  %v2349_v40 = vpop.permute.xlu0 %2348  ;;  %v3444_v48 = vld [vmem:[#allocation2 + $0x1b0] sm:$0xff]  ;;  %v3445_v10 = vld [vmem:[#allocation2 + $0x1b8] sm:$0xff]  ;;  %4481 = vmatmul.mubr.msk.f32.vlgmr.msra.gmra.mrb[0].mxu0 %vm3460_vm9, %v6883_v57 }
 0x3e0   : > { %2421 = vst.msk [vmem:[#allocation2 + $0x1c8] sm:$0xff] %vm787_vm3, %v2351_v29  ;;  %2420 = vst.msk [vmem:[#allocation2 + $0x1c0] sm:$0xff] %vm787_vm3, %v2349_v40  ;;  %v4582_v35 = vpack.c.bf16 %v3445_v10, %v3444_v48  ;;  %v3454_v29 = vld [vmem:[%s7023_s2] sm:$0xf]  ;;  %v4735_v40 = vmov 0  }
 0x3e1   : > { %3127 = vrot.lane.b32.xlu1 %v4338_v39, %s4733_s8  ;;  %3125 = vrot.lane.b32.xlu0 %v4337_v18, %s4733_s8 }
 0x3e2   : > { %4584 = vmatprep.subr.msk.bf16.mxu1 %vm6218_vm10, %v4582_v35  ;;  %4662 = vset.pattern.permute.xlu0 %v4735_v40 }
 0x3e3   : > { %v2543_v8 = vpop.permute.xlu1 %2542  ;;  %v2541_v19 = vpop.permute.xlu0 %2540  ;;  %v3428_v52 = vld [vmem:[#allocation2 + $0x130] sm:$0xff]  ;;  %v3429_v30 = vld [vmem:[#allocation2 + $0x138] sm:$0xff] }
 0x3e4   : > { %2613 = vst.msk [vmem:[#allocation2 + $0x1c8] sm:$0xff] %vm980_vm4, %v2543_v8  ;;  %2612 = vst.msk [vmem:[#allocation2 + $0x1c0] sm:$0xff] %vm980_vm4, %v2541_v19  ;;  %v4585_v54 = vpack.c.bf16 %v3429_v30, %v3428_v52 }
 0x3e5   : > { %3095 = vrot.lane.b32.xlu1 %v4322_v41, %s4733_s8  ;;  %3093 = vrot.lane.b32.xlu0 %v4321_v45, %s4733_s8 }
 0x3e6   : > { %4587 = vmatpush3.bf16.xpose.msk.msra.mxu1 %vm6218_vm10, %v4585_v54 }
 0x3e7   : > { %v2511_v7 = vpop.permute.xlu1 %2510  ;;  %v2509_v4 = vpop.permute.xlu0 %2508 }
 0x3e8   : > { %2597 = vst.msk [vmem:[#allocation2 + $0x148] sm:$0xff] %vm980_vm4, %v2511_v7  ;;  %2596 = vst.msk [vmem:[#allocation2 + $0x140] sm:$0xff] %vm980_vm4, %v2509_v4 }
 0x3e9   : > { %3319 = vrot.lane.b32.xlu1 %v4370_v17, %s4734_s9  ;;  %3317 = vrot.lane.b32.xlu0 %v4369_v58, %s4734_s9 }
 0x3eb   : > { %v2735_v2 = vpop.permute.xlu1 %2734  ;;  %v2733_v62 = vpop.permute.xlu0 %2732 }
 0x3ec   : > { %2805 = vst.msk [vmem:[#allocation2 + $0x1c8] sm:$0xff] %vm1173_vm5, %v2735_v2  ;;  %2804 = vst.msk [vmem:[#allocation2 + $0x1c0] sm:$0xff] %vm1173_vm5, %v2733_v62 }
 0x3ed   : > { %3287 = vrot.lane.b32.xlu1 %v4354_v21, %s4734_s9  ;;  %3285 = vrot.lane.b32.xlu0 %v4353_v59, %s4734_s9 }
 0x3ef   : > { %v2703_v9 = vpop.permute.xlu1 %2702  ;;  %v2701_v22 = vpop.permute.xlu0 %2700 }
 0x3f0   : > { %2789 = vst.msk [vmem:[#allocation2 + $0x148] sm:$0xff] %vm1173_vm5, %v2703_v9  ;;  %2788 = vst.msk [vmem:[#allocation2 + $0x140] sm:$0xff] %vm1173_vm5, %v2701_v22 }
 0x3f1   : > { %2362 = vrot.lane.b32.xlu1 %v4306_v24, %s4729_s4  ;;  %2360 = vrot.lane.b32.xlu0 %v4305_v31, %s4729_s4  ;;  %v4371_v24 = vld [vmem:[%s4810_s28 + $0x34a] sm:$0xff]  ;;  %s6977_s4 = scalar_lea.hbm %s7024_s3, %s4447_s27 }
 0x3f3   : > { %v2928_v25 = vpop.permute.xlu1 %2927  ;;  %v2926_v28 = vpop.permute.xlu0 %2925 }
 0x3f4   : > { %2998 = vst.msk [vmem:[#allocation2 + $0x1c8] sm:$0xff] %vm1367_vm6, %v2928_v25  ;;  %2997 = vst.msk [vmem:[#allocation2 + $0x1c0] sm:$0xff] %vm1367_vm6, %v2926_v28 }
 0x3f5   : > { %2554 = vrot.lane.b32.xlu1 %v4338_v39, %s4730_s5  ;;  %2552 = vrot.lane.b32.xlu0 %v4337_v18, %s4730_s5 }
 0x3f7   : > { %v2896_v33 = vpop.permute.xlu1 %2895  ;;  %v2894_v11 = vpop.permute.xlu0 %2893 }
 0x3f8   : > { %2982 = vst.msk [vmem:[#allocation2 + $0x148] sm:$0xff] %vm1367_vm6, %v2896_v33  ;;  %2981 = vst.msk [vmem:[#allocation2 + $0x140] sm:$0xff] %vm1367_vm6, %v2894_v11 }
 0x3f9   : > { %2522 = vrot.lane.b32.xlu1 %v4322_v41, %s4730_s5  ;;  %2520 = vrot.lane.b32.xlu0 %v4321_v45, %s4730_s5  ;;  %s6979_s5 = scalar_lea.sflag [#allocation4], %s164_s20 }
 0x3fb   : > { %v3120_v16 = vpop.permute.xlu1 %3119  ;;  %v3118_v44 = vpop.permute.xlu0 %3117 }
 0x3fc   : > { %3190 = vst.msk [vmem:[#allocation2 + $0x1c8] sm:$0xff] %vm1560_vm7, %v3120_v16  ;;  %3189 = vst.msk [vmem:[#allocation2 + $0x1c0] sm:$0xff] %vm1560_vm7, %v3118_v44 }
 0x3fd   : > { %2746 = vrot.lane.b32.xlu1 %v4370_v17, %s4731_s6  ;;  %2744 = vrot.lane.b32.xlu0 %v4369_v58, %s4731_s6 }
 0x3ff   : > { %v3088_v49 = vpop.permute.xlu1 %3087  ;;  %v3086_v43 = vpop.permute.xlu0 %3085 }
 0x400   : > { %3174 = vst.msk [vmem:[#allocation2 + $0x148] sm:$0xff] %vm1560_vm7, %v3088_v49  ;;  %3173 = vst.msk [vmem:[#allocation2 + $0x140] sm:$0xff] %vm1560_vm7, %v3086_v43 }
 0x401   : > { %2714 = vrot.lane.b32.xlu1 %v4354_v21, %s4731_s6  ;;  %2712 = vrot.lane.b32.xlu0 %v4353_v59, %s4731_s6  ;;  %s4663_s6 = scalar_lea.vmem %s6972_s26, 256 }
 0x402   : > { %p4664_p11 = scmp.ne.s32.totalorder %s6972_s26, %s4663_s6 }
 0x403   : > { %v3312_v5 = vpop.permute.xlu1 %3311  ;;  %v3310_v61 = vpop.permute.xlu0 %3309 }
 0x404   : > { %3382 = vst.msk [vmem:[#allocation2 + $0x1c8] sm:$0xff] %vm1753_vm8, %v3312_v5  ;;  %3381 = vst.msk [vmem:[#allocation2 + $0x1c0] sm:$0xff] %vm1753_vm8, %v3310_v61  ;;  %p4665_p12 = pnand %p4664_p11, %p4796_p5 }
 0x405   : > { %2939 = vrot.lane.b32.xlu1 %v4308_v46, %s4732_s7  ;;  %2937 = vrot.lane.b32.xlu0 %v4307_v3, %s4732_s7 }
 0x406   : > { %p4666_p13 = pneg %p4665_p12 }
 0x407   : > { %v3280_v26 = vpop.permute.xlu1 %3279  ;;  %v3278_v27 = vpop.permute.xlu0 %3277 }
 0x408   : > { %3366 = vst.msk [vmem:[#allocation2 + $0x148] sm:$0xff] %vm1753_vm8, %v3280_v26  ;;  %3365 = vst.msk [vmem:[#allocation2 + $0x140] sm:$0xff] %vm1753_vm8, %v3278_v27 }
 0x409   : > { %2907 = vrot.lane.b32.xlu1 %v4292_v53, %s4732_s7  ;;  %2905 = vrot.lane.b32.xlu0 %v4291_v14, %s4732_s7  ;;  %s4667_s7 = sshll.u32 %s4736_s16, 4  ;;  %s4668_s7 = int_to_ptr.vmem [resolvable:$false] %s4667_s7 }
 0x40a   : > { %p4670_p0 = scmp.lt.s32.totalorder %s6972_s26, %s4668_s7 }
 0x40b   : > { %v2355_v1 = vpop.permute.xlu1 %2354  ;;  %v2353_v20 = vpop.permute.xlu0 %2352  ;;  %v3446_v42 = vld [vmem:[#allocation2 + $0x1c0] sm:$0xff]  ;;  %v3447_v12 = vld [vmem:[#allocation2 + $0x1c8] sm:$0xff] }
 0x40c   : > { %2423 = vst.msk [vmem:[#allocation2 + $0x1d8] sm:$0xff] %vm787_vm3, %v2355_v1  ;;  %2422 = vst.msk [vmem:[#allocation2 + $0x1d0] sm:$0xff] %vm787_vm3, %v2353_v20  ;;  %v4588_v47 = vpack.c.bf16 %v3447_v12, %v3446_v42 }
 0x40d   : > { %3131 = vrot.lane.b32.xlu1 %v4340_v50, %s4733_s8  ;;  %3129 = vrot.lane.b32.xlu0 %v4339_v51, %s4733_s8 }
 0x40e   : > { %4590 = vmatprep.subr.msk.bf16.mxu1 %vm6218_vm10, %v4588_v47 }
 0x40f   : > { %v2547_v15 = vpop.permute.xlu1 %2546  ;;  %v2545_v55 = vpop.permute.xlu0 %2544  ;;  %v3430_v0 = vld [vmem:[#allocation2 + $0x140] sm:$0xff]  ;;  %v3431_v6 = vld [vmem:[#allocation2 + $0x148] sm:$0xff] }
 0x410   : > { %2615 = vst.msk [vmem:[#allocation2 + $0x1d8] sm:$0xff] %vm980_vm4, %v2547_v15  ;;  %2614 = vst.msk [vmem:[#allocation2 + $0x1d0] sm:$0xff] %vm980_vm4, %v2545_v55  ;;  %v4591_v13 = vpack.c.bf16 %v3431_v6, %v3430_v0 }
 0x411   : > { %3099 = vrot.lane.b32.xlu1 %v4324_v63, %s4733_s8  ;;  %3097 = vrot.lane.b32.xlu0 %v4323_v38, %s4733_s8  ;;  %s4669_s8 = scalar_lea.vmem %s4668_s7, 512 }
 0x412   : > { %4593 = vmatpush3.bf16.xpose.msk.msra.mxu1 %vm6218_vm10, %v4591_v13  ;;  %p4671_p1 = scmp.lt.s32.totalorder %s4669_s8, %s4663_s6 }
 0x413   : > { %v2515_v31 = vpop.permute.xlu1 %2514  ;;  %v2513_v56 = vpop.permute.xlu0 %2512 }
 0x414   : > { %2599 = vst.msk [vmem:[#allocation2 + $0x158] sm:$0xff] %vm980_vm4, %v2515_v31  ;;  %2598 = vst.msk [vmem:[#allocation2 + $0x150] sm:$0xff] %vm980_vm4, %v2513_v56  ;;  %p4672_p2 = por %p4671_p1, %p4670_p0 }
 0x415   : > { %3323 = vrot.lane.b32.xlu1 %v4372_v23, %s4734_s9  ;;  %3321 = vrot.lane.b32.xlu0 %v4371_v24, %s4734_s9 }
 0x416   : > { %p4673_p3 = pnand %p4672_p2, %p4666_p13 }
 0x417   : > { %v2739_v60 = vpop.permute.xlu1 %2738  ;;  %v2737_v36 = vpop.permute.xlu0 %2736 }
 0x418   : > { %2807 = vst.msk [vmem:[#allocation2 + $0x1d8] sm:$0xff] %vm1173_vm5, %v2739_v60  ;;  %2806 = vst.msk [vmem:[#allocation2 + $0x1d0] sm:$0xff] %vm1173_vm5, %v2737_v36 }
 0x419   : > { %3291 = vrot.lane.b32.xlu1 %v4356_v32, %s4734_s9  ;;  %3289 = vrot.lane.b32.xlu0 %v4355_v34, %s4734_s9 }
 0x41b   : > { %v2707_v39 = vpop.permute.xlu1 %2706  ;;  %v2705_v18 = vpop.permute.xlu0 %2704 }
 0x41c   : > { %2791 = vst.msk [vmem:[#allocation2 + $0x158] sm:$0xff] %vm1173_vm5, %v2707_v39  ;;  %2790 = vst.msk [vmem:[#allocation2 + $0x150] sm:$0xff] %vm1173_vm5, %v2705_v18 }
 0x41d   : > { %3457 = vperm.xlu0 %4662, %v3454_v29  }
 0x41f   : > { %v2932_v48 = vpop.permute.xlu1 %2931  ;;  %v2930_v10 = vpop.permute.xlu0 %2929 }
 0x420   : > { %3000 = vst.msk [vmem:[#allocation2 + $0x1d8] sm:$0xff] %vm1367_vm6, %v2932_v48  ;;  %2999 = vst.msk [vmem:[#allocation2 + $0x1d0] sm:$0xff] %vm1367_vm6, %v2930_v10 }
 0x423   : > { %v2900_v35 = vpop.permute.xlu1 %2899  ;;  %v2898_v41 = vpop.permute.xlu0 %2897 }
 0x424   : > { %2984 = vst.msk [vmem:[#allocation2 + $0x158] sm:$0xff] %vm1367_vm6, %v2900_v35  ;;  %2983 = vst.msk [vmem:[#allocation2 + $0x150] sm:$0xff] %vm1367_vm6, %v2898_v41 }
 0x427   : > { %v3124_v45 = vpop.permute.xlu1 %3123  ;;  %v3122_v8 = vpop.permute.xlu0 %3121 }
 0x428   : > { %3192 = vst.msk [vmem:[#allocation2 + $0x1d8] sm:$0xff] %vm1560_vm7, %v3124_v45  ;;  %3191 = vst.msk [vmem:[#allocation2 + $0x1d0] sm:$0xff] %vm1560_vm7, %v3122_v8 }
 0x42b   : > { %v3092_v19 = vpop.permute.xlu1 %3091  ;;  %v3090_v52 = vpop.permute.xlu0 %3089 }
 0x42c   : > { %3176 = vst.msk [vmem:[#allocation2 + $0x158] sm:$0xff] %vm1560_vm7, %v3092_v19  ;;  %3175 = vst.msk [vmem:[#allocation2 + $0x150] sm:$0xff] %vm1560_vm7, %v3090_v52 }
 0x42f   : > { %v3316_v30 = vpop.permute.xlu1 %3315  ;;  %v3314_v54 = vpop.permute.xlu0 %3313 }
 0x430   : > { %3384 = vst.msk [vmem:[#allocation2 + $0x1d8] sm:$0xff] %vm1753_vm8, %v3316_v30  ;;  %3383 = vst.msk [vmem:[#allocation2 + $0x1d0] sm:$0xff] %vm1753_vm8, %v3314_v54 }
 0x433   : > { %v3284_v17 = vpop.permute.xlu1 %3283  ;;  %v3282_v58 = vpop.permute.xlu0 %3281 }
 0x434   : > { %3368 = vst.msk [vmem:[#allocation2 + $0x158] sm:$0xff] %vm1753_vm8, %v3284_v17  ;;  %3367 = vst.msk [vmem:[#allocation2 + $0x150] sm:$0xff] %vm1753_vm8, %v3282_v58 }
 0x437   : > { %v2359_v7 = vpop.permute.xlu1 %2358  ;;  %v2357_v4 = vpop.permute.xlu0 %2356  ;;  %v3448_v21 = vld [vmem:[#allocation2 + $0x1d0] sm:$0xff]  ;;  %v3449_v59 = vld [vmem:[#allocation2 + $0x1d8] sm:$0xff] }
 0x438   : > { %2425 = vst.msk [vmem:[#allocation2 + $0x1e8] sm:$0xff] %vm787_vm3, %v2359_v7  ;;  %2424 = vst.msk [vmem:[#allocation2 + $0x1e0] sm:$0xff] %vm787_vm3, %v2357_v4  ;;  %v4594_v2 = vpack.c.bf16 %v3449_v59, %v3448_v21 }
 0x43a   : > { %4596 = vmatprep.subr.msk.bf16.mxu1 %vm6218_vm10, %v4594_v2 }
 0x43b   : > { %v2551_v62 = vpop.permute.xlu1 %2550  ;;  %v2549_v9 = vpop.permute.xlu0 %2548  ;;  %v3432_v22 = vld [vmem:[#allocation2 + $0x150] sm:$0xff]  ;;  %v3433_v25 = vld [vmem:[#allocation2 + $0x158] sm:$0xff] }
 0x43c   : > { %2617 = vst.msk [vmem:[#allocation2 + $0x1e8] sm:$0xff] %vm980_vm4, %v2551_v62  ;;  %2616 = vst.msk [vmem:[#allocation2 + $0x1e0] sm:$0xff] %vm980_vm4, %v2549_v9  ;;  %v4597_v28 = vpack.c.bf16 %v3433_v25, %v3432_v22 }
 0x43e   : > { %4599 = vmatpush3.bf16.xpose.msk.msra.mxu1 %vm6218_vm10, %v4597_v28 }
 0x43f   : > { %v2519_v33 = vpop.permute.xlu1 %2518  ;;  %v2517_v11 = vpop.permute.xlu0 %2516 }
 0x440   : > { %2601 = vst.msk [vmem:[#allocation2 + $0x168] sm:$0xff] %vm980_vm4, %v2519_v33  ;;  %2600 = vst.msk [vmem:[#allocation2 + $0x160] sm:$0xff] %vm980_vm4, %v2517_v11 }
 0x443   : > { %v2743_v16 = vpop.permute.xlu1 %2742  ;;  %v2741_v44 = vpop.permute.xlu0 %2740 }
 0x444   : > { %2809 = vst.msk [vmem:[#allocation2 + $0x1e8] sm:$0xff] %vm1173_vm5, %v2743_v16  ;;  %2808 = vst.msk [vmem:[#allocation2 + $0x1e0] sm:$0xff] %vm1173_vm5, %v2741_v44 }
 0x447   : > { %v2711_v49 = vpop.permute.xlu1 %2710  ;;  %v2709_v43 = vpop.permute.xlu0 %2708 }
 0x448   : > { %2793 = vst.msk [vmem:[#allocation2 + $0x168] sm:$0xff] %vm1173_vm5, %v2711_v49  ;;  %2792 = vst.msk [vmem:[#allocation2 + $0x160] sm:$0xff] %vm1173_vm5, %v2709_v43 }
 0x44b   : > { %v2936_v46 = vpop.permute.xlu1 %2935  ;;  %v2934_v3 = vpop.permute.xlu0 %2933 }
 0x44c   : > { %3002 = vst.msk [vmem:[#allocation2 + $0x1e8] sm:$0xff] %vm1367_vm6, %v2936_v46  ;;  %3001 = vst.msk [vmem:[#allocation2 + $0x1e0] sm:$0xff] %vm1367_vm6, %v2934_v3 }
 0x44f   : > { %v2904_v5 = vpop.permute.xlu1 %2903  ;;  %v2902_v61 = vpop.permute.xlu0 %2901 }
 0x450   : > { %2986 = vst.msk [vmem:[#allocation2 + $0x168] sm:$0xff] %vm1367_vm6, %v2904_v5  ;;  %2985 = vst.msk [vmem:[#allocation2 + $0x160] sm:$0xff] %vm1367_vm6, %v2902_v61 }
 0x453   : > { %v3128_v53 = vpop.permute.xlu1 %3127  ;;  %v3126_v14 = vpop.permute.xlu0 %3125 }
 0x454   : > { %3194 = vst.msk [vmem:[#allocation2 + $0x1e8] sm:$0xff] %vm1560_vm7, %v3128_v53  ;;  %3193 = vst.msk [vmem:[#allocation2 + $0x1e0] sm:$0xff] %vm1560_vm7, %v3126_v14 }
 0x457   : > { %v3096_v26 = vpop.permute.xlu1 %3095  ;;  %v3094_v27 = vpop.permute.xlu0 %3093 }
 0x458   : > { %3178 = vst.msk [vmem:[#allocation2 + $0x168] sm:$0xff] %vm1560_vm7, %v3096_v26  ;;  %3177 = vst.msk [vmem:[#allocation2 + $0x160] sm:$0xff] %vm1560_vm7, %v3094_v27 }
 0x45b   : > { %v3320_v50 = vpop.permute.xlu1 %3319  ;;  %v3318_v51 = vpop.permute.xlu0 %3317 }
 0x45c   : > { %3386 = vst.msk [vmem:[#allocation2 + $0x1e8] sm:$0xff] %vm1753_vm8, %v3320_v50  ;;  %3385 = vst.msk [vmem:[#allocation2 + $0x1e0] sm:$0xff] %vm1753_vm8, %v3318_v51 }
 0x45f   : > { %v3288_v1 = vpop.permute.xlu1 %3287  ;;  %v3286_v20 = vpop.permute.xlu0 %3285 }
 0x460   : > { %3370 = vst.msk [vmem:[#allocation2 + $0x168] sm:$0xff] %vm1753_vm8, %v3288_v1  ;;  %3369 = vst.msk [vmem:[#allocation2 + $0x160] sm:$0xff] %vm1753_vm8, %v3286_v20 }
 0x463   : > { %v2363_v42 = vpop.permute.xlu1 %2362  ;;  %v2361_v12 = vpop.permute.xlu0 %2360  ;;  %v3450_v47 = vld [vmem:[#allocation2 + $0x1e0] sm:$0xff]  ;;  %v3451_v63 = vld [vmem:[#allocation2 + $0x1e8] sm:$0xff] }
 0x464   : > { %2427 = vst.msk [vmem:[#allocation2 + $0x1f8] sm:$0xff] %vm787_vm3, %v2363_v42  ;;  %2426 = vst.msk [vmem:[#allocation2 + $0x1f0] sm:$0xff] %vm787_vm3, %v2361_v12  ;;  %v4600_v38 = vpack.c.bf16 %v3451_v63, %v3450_v47 }
 0x466   : > { %4602 = vmatprep.subr.msk.bf16.mxu1 %vm6218_vm10, %v4600_v38 }
 0x467   : > { %v2555_v15 = vpop.permute.xlu1 %2554  ;;  %v2553_v55 = vpop.permute.xlu0 %2552  ;;  %v3434_v0 = vld [vmem:[#allocation2 + $0x160] sm:$0xff]  ;;  %v3435_v6 = vld [vmem:[#allocation2 + $0x168] sm:$0xff] }
 0x468   : > { %2619 = vst.msk [vmem:[#allocation2 + $0x1f8] sm:$0xff] %vm980_vm4, %v2555_v15  ;;  %2618 = vst.msk [vmem:[#allocation2 + $0x1f0] sm:$0xff] %vm980_vm4, %v2553_v55  ;;  %v4603_v13 = vpack.c.bf16 %v3435_v6, %v3434_v0 }
 0x46a   : > { %4605 = vmatpush3.bf16.xpose.msk.msra.mxu1 %vm6218_vm10, %v4603_v13 }
 0x46b   : > { %v2523_v23 = vpop.permute.xlu1 %2522  ;;  %v2521_v24 = vpop.permute.xlu0 %2520 }
 0x46c   : > { %2603 = vst.msk [vmem:[#allocation2 + $0x178] sm:$0xff] %vm980_vm4, %v2523_v23  ;;  %2602 = vst.msk [vmem:[#allocation2 + $0x170] sm:$0xff] %vm980_vm4, %v2521_v24 }
 0x46f   : > { %v2747_v31 = vpop.permute.xlu1 %2746  ;;  %v2745_v56 = vpop.permute.xlu0 %2744 }
 0x470   : > { %2811 = vst.msk [vmem:[#allocation2 + $0x1f8] sm:$0xff] %vm1173_vm5, %v2747_v31  ;;  %2810 = vst.msk [vmem:[#allocation2 + $0x1f0] sm:$0xff] %vm1173_vm5, %v2745_v56 }
 0x473   : > { %v2715_v32 = vpop.permute.xlu1 %2714  ;;  %v2713_v34 = vpop.permute.xlu0 %2712 }
 0x474   : > { %2795 = vst.msk [vmem:[#allocation2 + $0x178] sm:$0xff] %vm1173_vm5, %v2715_v32  ;;  %2794 = vst.msk [vmem:[#allocation2 + $0x170] sm:$0xff] %vm1173_vm5, %v2713_v34 }
 0x477   : > { %v2940_v60 = vpop.permute.xlu1 %2939  ;;  %v2938_v36 = vpop.permute.xlu0 %2937 }
 0x478   : > { %3004 = vst.msk [vmem:[#allocation2 + $0x1f8] sm:$0xff] %vm1367_vm6, %v2940_v60  ;;  %3003 = vst.msk [vmem:[#allocation2 + $0x1f0] sm:$0xff] %vm1367_vm6, %v2938_v36 }
 0x47b   : > { %v2908_v39 = vpop.permute.xlu1 %2907  ;;  %v2906_v18 = vpop.permute.xlu0 %2905 }
 0x47c   : > { %2988 = vst.msk [vmem:[#allocation2 + $0x178] sm:$0xff] %vm1367_vm6, %v2908_v39  ;;  %2987 = vst.msk [vmem:[#allocation2 + $0x170] sm:$0xff] %vm1367_vm6, %v2906_v18 }
 0x47f   : > { %v3132_v29 = vpop.permute.xlu1 %3131  ;;  %v3130_v40 = vpop.permute.xlu0 %3129 }
 0x480   : > { %3196 = vst.msk [vmem:[#allocation2 + $0x1f8] sm:$0xff] %vm1560_vm7, %v3132_v29  ;;  %3195 = vst.msk [vmem:[#allocation2 + $0x1f0] sm:$0xff] %vm1560_vm7, %v3130_v40 }
 0x483   : > { %v3100_v48 = vpop.permute.xlu1 %3099  ;;  %v3098_v10 = vpop.permute.xlu0 %3097 }
 0x484   : > { %3180 = vst.msk [vmem:[#allocation2 + $0x178] sm:$0xff] %vm1560_vm7, %v3100_v48  ;;  %3179 = vst.msk [vmem:[#allocation2 + $0x170] sm:$0xff] %vm1560_vm7, %v3098_v10 }
 0x487   : > { %v3324_v35 = vpop.permute.xlu1 %3323  ;;  %v3322_v41 = vpop.permute.xlu0 %3321 }
 0x488   : > { %3388 = vst.msk [vmem:[#allocation2 + $0x1f8] sm:$0xff] %vm1753_vm8, %v3324_v35  ;;  %3387 = vst.msk [vmem:[#allocation2 + $0x1f0] sm:$0xff] %vm1753_vm8, %v3322_v41 }
 0x48b   : > { %v3292_v45 = vpop.permute.xlu1 %3291  ;;  %v3290_v8 = vpop.permute.xlu0 %3289 }
 0x48c   : > { %3372 = vst.msk [vmem:[#allocation2 + $0x178] sm:$0xff] %vm1753_vm8, %v3292_v45  ;;  %3371 = vst.msk [vmem:[#allocation2 + $0x170] sm:$0xff] %vm1753_vm8, %v3290_v8 }
 0x48f   : > { %v3452_v19 = vld [vmem:[#allocation2 + $0x1f0] sm:$0xff]  ;;  %v3453_v52 = vld [vmem:[#allocation2 + $0x1f8] sm:$0xff] }
 0x490   : > { %v4606_v30 = vpack.c.bf16 %v3453_v52, %v3452_v19 }
 0x492   : > { %4608 = vmatprep.subr.msk.bf16.mxu1 %vm6218_vm10, %v4606_v30 }
 0x493   : > { %v3436_v54 = vld [vmem:[#allocation2 + $0x170] sm:$0xff]  ;;  %v3437_v17 = vld [vmem:[#allocation2 + $0x178] sm:$0xff] }
 0x494   : > { %v4609_v58 = vpack.c.bf16 %v3437_v17, %v3436_v54 }
 0x496   : > { %4611 = vmatpush3.bf16.xpose.msk.msra.mxu1 %vm6218_vm10, %v4609_v58 }
 0x49c   : > { %v3458_v4 = vpop.permute.xlu0 %3457 }
 0x49d   : > { %4515 = vmatmul.mubr.msk.f32.vlgmr.msra.gmra.mrb[0].mxu1 %vm3460_vm9, %v6883_v57 }
 0x4b2   : > { %v3722_v7 = vpop.f32.mrb[0].mxu0 }
 0x4b3   : > { %v3724_v21 = vpop.f32.mrb[1].mxu0  ;;  %v3723_v59 = vadd.f32 %v3722_v7, %v3458_v4 }
 0x4b4   : > { %v3725_v2 = vadd.f32 %v3724_v21, %v3458_v4 }
 0x4b6   : > { %v3800_v62 = vcombine.low %v3723_v59, %v3725_v2 }
 0x4b8   : > { %3802 = vst [vmem:[%s166_s25] sm:$0xff] %v3800_v62 }
 0x570   : > { %v3793_v9 = vpop.f32.mrb[0].mxu1 }
 0x571   : > { %v3794_v22 = vadd.f32 %v3793_v9, %v3458_v4  ;;  %v3795_v37 = vpop.f32.mrb[1].mxu1 }
 0x572   : > { %v3796_v25 = vadd.f32 %v3795_v37, %v3458_v4 }
 0x574   : > { %v3805_v57 = vcombine.low %v3794_v22, %v3796_v25 }
 0x576   : > { %4439 = vst [vmem:[%s166_s25 + $0x8] sm:$0xff] %v3805_v57 }
 0x577   : > { %4676 = shalt.err (!%p4673_p3)
}
 0x578   : > { %s4677_s9 = scalar_lea.hbm %s6977_s4, 256  ;;  %s4681_s17 = scalar_lea.hbm %s7024_s3, 512 }
 0x579   : > { %p4678_p4 = scmp.ne.s32.totalorder %s6977_s4, %s4677_s9  ;;  %p4682_p9 = scmp.lt.u32.totalorder %s6977_s4, %s7024_s3 }
 0x57a   : > { %p4683_p10 = scmp.lt.u32.totalorder %s4681_s17, %s4677_s9  ;;  %p4685_p12 = scmp.lt.u32.totalorder %s4677_s9, %s6977_s4 }
 0x57b   : > { %p4679_p7 = pnand %p4678_p4, %p4796_p5 }
 0x57c   : > { %p4684_p11 = por %p4683_p10, %p4682_p9 }
 0x57d   : > { %p4680_p8 = pneg %p4679_p7 }
 0x57e   : > { %p4686_p13 = por %p4685_p12, %p4684_p11 }
 0x580   : > { %p4687_p0 = pnand %p4686_p13, %p4680_p8 }
 0x582   : > { %4690 = shalt.err (!%p4687_p0)
}
 0x583   : > { %s4737_s24 = smov 128  }
 0x584   : > { %4613 = dma.vmem_to_hbm [thread:$0]  (%p4796_p5), %s6972_s26, 256, %s6977_s4, %s6979_s5, %s4737_s24, %s4737_s24, %s4728_s30  }
 0x585 PF: > { %p4619_p1 = scmp.ge.s32.totalorder %s4725_s15, 2  ;;  %s3839_s25 = sand.u32 1, %s4713_s12  }
 0x586   : > { %s3840_s27 = scalar_lea.sflag [#allocation4], %s3839_s25 }
 0x587   : > { %p4616_p2 = pnand %p4619_p1, %p4800_p6 }
 0x589   : > { %4708 = dma.done.wait (!%p4616_p2), %s3840_s27, 256  }
 0x58a   : > { %4710 = vsyncadd (!%p4616_p2), %s3840_s27, 4294967040  ;;  %p13_p3 = scmp.ge.s32.totalorder %s4783_s18, 4   ;;  %s7137_s12 = smov %s4717_s13 }
 0x58b   : > { %s7138_s13 = smov %s4721_s14  ;;  %s7139_s14 = smov %s4794_s21 }
 0x58c   : > { %s7140_s15 = smov %s4783_s18  ;;  %15 = sbr.rel (!%p13_p3) target bundleno = 3 (0x3), region = 73 }
 0x593   :  { %3845 = vsyncpa [#allocation4], 1 }
 0x594   :  { %3847 = vsyncpa [#allocation4 + $0x1], 1 }

</bundles_post_ra>
